<compile_context>
chip_gen: v6e
topology: v6e:2x2x1
jax: 0.10.0
libtpu: 0.0.40
codegen_flags: <defaults>
</compile_context>

<pallas_src>
import jax
import jax.numpy as jnp
from jax.experimental import pallas as pl
from jax.experimental.pallas import tpu as pltpu  # noqa: F401

# ----------------------------- config ---------------------------------------
IMG = 16            # image side
PATCH = 4           # patch side
IN_CH = 1           # channels
NP_SIDE = IMG // PATCH
NTOK = NP_SIDE * NP_SIDE           # 16 tokens
PDIM = PATCH * PATCH * IN_CH       # 16 values per patch
D = 32                             # embed_dim
HEADS = 4
HDIM = D // HEADS
MLP = 2 * D                        # mlp_ratio = 2
NUM_CLASSES = 10
EPS = 1e-5

# Feed the MXU bf16 operands (f32 accumulate) — bf16-native on v5e/v6e/v7x.
# Set False for exact f32 parity with the PyTorch reference.
MXU_BF16 = True


# --------------------------- small math helpers ------------------------------
def _dot(a, b):
    if MXU_BF16:
        a = a.astype(jnp.bfloat16)
        b = b.astype(jnp.bfloat16)
    return jnp.dot(a, b, preferred_element_type=jnp.float32)


def _bmm(spec, a, b):
    if MXU_BF16:
        a = a.astype(jnp.bfloat16)
        b = b.astype(jnp.bfloat16)
    return jnp.einsum(spec, a, b, preferred_element_type=jnp.float32)


def _layernorm(x, g, b):
    m = jnp.mean(x, axis=-1, keepdims=True)
    v = jnp.mean((x - m) ** 2, axis=-1, keepdims=True)
    return (x - m) * jax.lax.rsqrt(v + EPS) * g + b


def _transformer_block(x, batch, p):
    """Pre-LN transformer block on batch-folded tokens x: (B*N, D)."""
    (ln1g, ln1b, wq, bq, wk, bk, wv, bv, wo, bo,
     ln2g, ln2b, w1, b1, w2, b2) = p
    bn = batch * NTOK
    scale = 1.0 / (HDIM ** 0.5)

    # LN1 + multi-head self-attention.  Per-head weights are pre-split on the
    # host (wq/wk/wv: (HEADS, D, HDIM), wo: (HEADS, HDIM, D)), so no lane
    # slicing / concatenate is needed inside the kernel; head outputs are
    # accumulated straight through the per-head output projection.
    xn = _layernorm(x, ln1g[...], ln1b[...])
    attn = jnp.zeros((bn, D), jnp.float32)
    for hh in range(HEADS):                                   # static unroll
        qh = (_dot(xn, wq[hh]) + bq[hh]).reshape(batch, NTOK, HDIM)
        kh = (_dot(xn, wk[hh]) + bk[hh]).reshape(batch, NTOK, HDIM)
        vh = (_dot(xn, wv[hh]) + bv[hh]).reshape(batch, NTOK, HDIM)
        s = _bmm("bnd,bmd->bnm", qh, kh) * scale              # (B, N, N)
        s = s - jnp.max(s, axis=-1, keepdims=True)
        pe = jnp.exp(s)
        pe = pe * pl.reciprocal(jnp.sum(pe, axis=-1, keepdims=True),
                                approx=True)
        oh = _bmm("bnm,bmd->bnd", pe, vh)                     # (B, N, HDIM)
        attn = attn + _dot(oh.reshape(bn, HDIM), wo[hh])
    x = x + attn + bo[...]

    # LN2 + MLP.
    xn2 = _layernorm(x, ln2g[...], ln2b[...])
    # TODO(synk): PyTorch nn.GELU defaults to the exact erf form; the tanh
    # approximation is used here since erf lowering inside Mosaic is not
    # guaranteed (tiny numerical difference).
    hmid = jax.nn.gelu(_dot(xn2, w1[...]) + b1[...], approximate=True)
    x = x + _dot(hmid, w2[...]) + b2[...]
    return x


# ------------------------------ fused kernel ---------------------------------
def _fused_kernel(*refs):
    (xp_ref, le_ref, eps_ref, w_pe, b_pe) = refs[0:5]
    enc_blk = refs[5:21]
    (ehg, ehb, w_mu, b_mu, w_lv, b_lv) = refs[21:27]
    pos_ref = refs[27]
    dec_blk = refs[28:44]
    (dhg, dhb, w_out, b_out) = refs[44:48]
    recon_ref, mu_ref, lv_ref = refs[48], refs[49], refs[50]

    bn = xp_ref.shape[0]           # B * NTOK  (static)
    batch = bn // NTOK

    le = le_ref[...]                                            # (B, D)

    # PatchEmbed (conv k=s=patch expressed as a matmul) + label-embed add.
    tok = _dot(xp_ref[...], w_pe[...]) + b_pe[...]              # (B*N, D)
    tok = (tok.reshape(batch, NTOK, D) + le[:, None, :]).reshape(bn, D)

    # Encoder: transformer block + LN + mean-pool + mu/logvar heads.
    h = _transformer_block(tok, batch, enc_blk)
    hn = _layernorm(h, ehg[...], ehb[...])
    pooled = jnp.mean(hn.reshape(batch, NTOK, D), axis=1)       # (B, D)
    mu = _dot(pooled, w_mu[...]) + b_mu[...]
    logvar = _dot(pooled, w_lv[...]) + b_lv[...]

    # Reparameterize + label conditioning: z = mu + eps*exp(0.5*logvar) + le.
    z = mu + eps_ref[...] * jnp.exp(0.5 * logvar) + le          # (B, D)

    # Decoder: token init (z + pos), transformer block, LN + linear + sigmoid.
    toks = (z[:, None, :] + pos_ref[...][None, :, :]).reshape(bn, D)
    hd = _transformer_block(toks, batch, dec_blk)
    hdn = _layernorm(hd, dhg[...], dhb[...])
    out = jax.nn.sigmoid(_dot(hdn, w_out[...]) + b_out[...])    # (B*N, PDIM)

    recon_ref[...] = out.reshape(batch, NTOK, PDIM)
    mu_ref[...] = mu
    lv_ref[...] = logvar


# ----------------------------- parameters -----------------------------------
def init_params(key):
    keys = iter(jax.random.split(key, 32))

    def nrm(shape):
        return 0.02 * jax.random.normal(next(keys), shape, dtype=jnp.float32)

    def split_attn(wqkv, bqkv, wproj):
        # Host-side split into per-head layouts (done once, pure JAX glue).
        # wqkv: (D, 3D), bqkv: (1, 3D), wproj: (D, D).
        def per_head_w(w_slice):                 # (D, D) -> (HEADS, D, HDIM)
            return w_slice.reshape(D, HEADS, HDIM).transpose(1, 0, 2)

        def per_head_b(b_slice):                 # (D,)   -> (HEADS, 1, HDIM)
            return b_slice.reshape(HEADS, 1, HDIM)

        wq = per_head_w(wqkv[:, 0 * D:1 * D])
        wk = per_head_w(wqkv[:, 1 * D:2 * D])
        wv = per_head_w(wqkv[:, 2 * D:3 * D])
        bq = per_head_b(bqkv[0, 0 * D:1 * D])
        bk = per_head_b(bqkv[0, 1 * D:2 * D])
        bv = per_head_b(bqkv[0, 2 * D:3 * D])
        wo = wproj.reshape(HEADS, HDIM, D)       # rows h*HDIM..(h+1)*HDIM
        return wq, bq, wk, bk, wv, bv, wo

    def block_params():
        wqkv = nrm((D, 3 * D))
        bqkv = jnp.zeros((1, 3 * D), jnp.float32)
        wproj = nrm((D, D))
        bproj = jnp.zeros((1, D), jnp.float32)
        wq, bq, wk, bk, wv, bv, wo = split_attn(wqkv, bqkv, wproj)
        return (
            jnp.ones((1, D), jnp.float32), jnp.zeros((1, D), jnp.float32),  # ln1
            wq, bq, wk, bk, wv, bv,                                          # qkv
            wo, bproj,                                                       # proj
            jnp.ones((1, D), jnp.float32), jnp.zeros((1, D), jnp.float32),  # ln2
            nrm((D, MLP)), jnp.zeros((1, MLP), jnp.float32),                 # fc1
            nrm((MLP, D)), jnp.zeros((1, D), jnp.float32),                   # fc2
        )

    return dict(
        w_pe=nrm((PDIM, D)), b_pe=jnp.zeros((1, D), jnp.float32),
        label_table=nrm((NUM_CLASSES, D)),
        enc_block=block_params(),
        enc_head=(
            jnp.ones((1, D), jnp.float32), jnp.zeros((1, D), jnp.float32),
            nrm((D, D)), jnp.zeros((1, D), jnp.float32),
            nrm((D, D)), jnp.zeros((1, D), jnp.float32),
        ),
        pos=nrm((NTOK, D)),
        dec_block=block_params(),
        dec_head=(
            jnp.ones((1, D), jnp.float32), jnp.zeros((1, D), jnp.float32),
            nrm((D, PDIM)), jnp.zeros((1, PDIM), jnp.float32),
        ),
    )


# ----------------------------- forward --------------------------------------
def forward(x, labels, params, noise_key):
    B = x.shape[0]

    # patchify (pure reshape/transpose glue); pixel order (C, ph, pw) matches
    # a flattened Conv2d weight of shape (D, C, ph, pw).
    xp = x.reshape(B, IN_CH, NP_SIDE, PATCH, NP_SIDE, PATCH)
    xp = xp.transpose(0, 2, 4, 1, 3, 5).reshape(B * NTOK, PDIM)

    # label embedding gather (glue) and noise sampling (glue).
    le = params["label_table"][labels]                       # (B, D)
    eps = jax.random.normal(noise_key, (B, D), dtype=jnp.float32)

    flat_inputs = (
        xp, le, eps, params["w_pe"], params["b_pe"],
        *params["enc_block"],
        *params["enc_head"],
        params["pos"],
        *params["dec_block"],
        *params["dec_head"],
    )

    out_shapes = (
        jax.ShapeDtypeStruct((B, NTOK, PDIM), jnp.float32),
        jax.ShapeDtypeStruct((B, D), jnp.float32),
        jax.ShapeDtypeStruct((B, D), jnp.float32),
    )

    # One fused pallas_call: no grid, every operand is a single whole-array
    # VMEM block (total working set << 1 MiB on any TPU generation).
    patch_out, mu, logvar = pl.pallas_call(
        _fused_kernel,
        out_shape=out_shapes,
    )(*flat_inputs)

    # unpatchify (glue)
    recon = patch_out.reshape(B, NP_SIDE, NP_SIDE, IN_CH, PATCH, PATCH)
    recon = recon.transpose(0, 3, 1, 4, 2, 5).reshape(B, IN_CH, IMG, IMG)
    return recon, mu, logvar


# ------------------------------- main ----------------------------------------
if __name__ == "__main__":
    key = jax.random.PRNGKey(0)
    kp, kx, kl, ke = jax.random.split(key, 4)

    params = init_params(kp)
    x = jax.random.normal(kx, (2, IN_CH, IMG, IMG), dtype=jnp.float32)
    labels = jax.random.randint(kl, (2,), 0, NUM_CLASSES)

    recon, mu, logvar = jax.jit(forward)(x, labels, params, ke)
    jax.block_until_ready((recon, mu, logvar))

    assert recon.shape == (2, IN_CH, IMG, IMG)
    assert mu.shape == (2, D) and logvar.shape == (2, D)
    assert bool(jnp.all(jnp.isfinite(recon)))
    print("KERNEL_OK")
</pallas_src>

<mosaic_0001>
module attributes {stable_mosaic.version = 11 : i64} {
  func.func @_fused_kernel(%arg0: memref<32x16xf32, #tpu.memory_space<vmem>>, %arg1: memref<2x32xf32, #tpu.memory_space<vmem>>, %arg2: memref<2x32xf32, #tpu.memory_space<vmem>>, %arg3: memref<16x32xf32, #tpu.memory_space<vmem>>, %arg4: memref<1x32xf32, #tpu.memory_space<vmem>>, %arg5: memref<1x32xf32, #tpu.memory_space<vmem>>, %arg6: memref<1x32xf32, #tpu.memory_space<vmem>>, %arg7: memref<4x32x8xf32, #tpu.memory_space<vmem>>, %arg8: memref<4x1x8xf32, #tpu.memory_space<vmem>>, %arg9: memref<4x32x8xf32, #tpu.memory_space<vmem>>, %arg10: memref<4x1x8xf32, #tpu.memory_space<vmem>>, %arg11: memref<4x32x8xf32, #tpu.memory_space<vmem>>, %arg12: memref<4x1x8xf32, #tpu.memory_space<vmem>>, %arg13: memref<4x8x32xf32, #tpu.memory_space<vmem>>, %arg14: memref<1x32xf32, #tpu.memory_space<vmem>>, %arg15: memref<1x32xf32, #tpu.memory_space<vmem>>, %arg16: memref<1x32xf32, #tpu.memory_space<vmem>>, %arg17: memref<32x64xf32, #tpu.memory_space<vmem>>, %arg18: memref<1x64xf32, #tpu.memory_space<vmem>>, %arg19: memref<64x32xf32, #tpu.memory_space<vmem>>, %arg20: memref<1x32xf32, #tpu.memory_space<vmem>>, %arg21: memref<1x32xf32, #tpu.memory_space<vmem>>, %arg22: memref<1x32xf32, #tpu.memory_space<vmem>>, %arg23: memref<32x32xf32, #tpu.memory_space<vmem>>, %arg24: memref<1x32xf32, #tpu.memory_space<vmem>>, %arg25: memref<32x32xf32, #tpu.memory_space<vmem>>, %arg26: memref<1x32xf32, #tpu.memory_space<vmem>>, %arg27: memref<16x32xf32, #tpu.memory_space<vmem>>, %arg28: memref<1x32xf32, #tpu.memory_space<vmem>>, %arg29: memref<1x32xf32, #tpu.memory_space<vmem>>, %arg30: memref<4x32x8xf32, #tpu.memory_space<vmem>>, %arg31: memref<4x1x8xf32, #tpu.memory_space<vmem>>, %arg32: memref<4x32x8xf32, #tpu.memory_space<vmem>>, %arg33: memref<4x1x8xf32, #tpu.memory_space<vmem>>, %arg34: memref<4x32x8xf32, #tpu.memory_space<vmem>>, %arg35: memref<4x1x8xf32, #tpu.memory_space<vmem>>, %arg36: memref<4x8x32xf32, #tpu.memory_space<vmem>>, %arg37: memref<1x32xf32, #tpu.memory_space<vmem>>, %arg38: memref<1x32xf32, #tpu.memory_space<vmem>>, %arg39: memref<1x32xf32, #tpu.memory_space<vmem>>, %arg40: memref<32x64xf32, #tpu.memory_space<vmem>>, %arg41: memref<1x64xf32, #tpu.memory_space<vmem>>, %arg42: memref<64x32xf32, #tpu.memory_space<vmem>>, %arg43: memref<1x32xf32, #tpu.memory_space<vmem>>, %arg44: memref<1x32xf32, #tpu.memory_space<vmem>>, %arg45: memref<1x32xf32, #tpu.memory_space<vmem>>, %arg46: memref<32x16xf32, #tpu.memory_space<vmem>>, %arg47: memref<1x16xf32, #tpu.memory_space<vmem>>, %arg48: memref<2x16x16xf32, #tpu.memory_space<vmem>>, %arg49: memref<2x32xf32, #tpu.memory_space<vmem>>, %arg50: memref<2x32xf32, #tpu.memory_space<vmem>>) attributes {dimension_semantics = [], scalar_prefetch = 0 : i64, scratch_operands = 0 : i64, tpu.core_type = #tpu.core_type<tc>} {
    %c0 = arith.constant 0 : index
    %c0_0 = arith.constant 0 : index
    %0 = vector.load %arg1[%c0, %c0_0] : memref<2x32xf32, #tpu.memory_space<vmem>>, vector<2x32xf32>
    %c0_1 = arith.constant 0 : index
    %c0_2 = arith.constant 0 : index
    %1 = vector.load %arg0[%c0_1, %c0_2] : memref<32x16xf32, #tpu.memory_space<vmem>>, vector<32x16xf32>
    %c0_3 = arith.constant 0 : index
    %c0_4 = arith.constant 0 : index
    %2 = vector.load %arg3[%c0_3, %c0_4] : memref<16x32xf32, #tpu.memory_space<vmem>>, vector<16x32xf32>
    %3 = arith.truncf %1 : vector<32x16xf32> to vector<32x16xbf16>
    %4 = arith.truncf %2 : vector<16x32xf32> to vector<16x32xbf16>
    %cst = arith.constant dense<0.000000e+00> : vector<32x32xf32>
    %5 = tpu.matmul %3, %4, %cst {dimension_numbers = #tpu.dot_dimension_numbers<[1], [0], [0], [1], [0, 0, 1, 1], [], []>} : vector<32x16xbf16>, vector<16x32xbf16>, vector<32x32xf32> -> vector<32x32xf32>
    %c0_5 = arith.constant 0 : index
    %c0_6 = arith.constant 0 : index
    %6 = vector.load %arg4[%c0_5, %c0_6] : memref<1x32xf32, #tpu.memory_space<vmem>>, vector<1x32xf32>
    %7 = vector.broadcast %6 : vector<1x32xf32> to vector<32x32xf32>
    %8 = arith.addf %5, %7 : vector<32x32xf32>
    %9 = vector.shape_cast %8 : vector<32x32xf32> to vector<2x16x32xf32>
    %10 = vector.shape_cast %0 : vector<2x32xf32> to vector<2x1x32xf32>
    %11 = vector.broadcast %10 : vector<2x1x32xf32> to vector<2x16x32xf32>
    %12 = arith.addf %9, %11 : vector<2x16x32xf32>
    %13 = vector.shape_cast %12 : vector<2x16x32xf32> to vector<32x32xf32>
    %c0_7 = arith.constant 0 : index
    %c0_8 = arith.constant 0 : index
    %14 = vector.load %arg5[%c0_7, %c0_8] : memref<1x32xf32, #tpu.memory_space<vmem>>, vector<1x32xf32>
    %c0_9 = arith.constant 0 : index
    %c0_10 = arith.constant 0 : index
    %15 = vector.load %arg6[%c0_9, %c0_10] : memref<1x32xf32, #tpu.memory_space<vmem>>, vector<1x32xf32>
    %cst_11 = arith.constant dense<0.000000e+00> : vector<32xf32>
    %16 = vector.multi_reduction <add>, %13, %cst_11 [1] : vector<32x32xf32> to vector<32xf32>
    %17 = vector.shape_cast %16 : vector<32xf32> to vector<32x1xf32>
    %cst_12 = arith.constant 3.200000e+01 : f32
    %18 = vector.broadcast %cst_12 : f32 to vector<32x1xf32>
    %19 = arith.divf %17, %18 : vector<32x1xf32>
    %20 = vector.broadcast %19 : vector<32x1xf32> to vector<32x32xf32>
    %21 = arith.subf %13, %20 : vector<32x32xf32>
    %22 = arith.mulf %21, %21 : vector<32x32xf32>
    %cst_13 = arith.constant dense<0.000000e+00> : vector<32xf32>
    %23 = vector.multi_reduction <add>, %22, %cst_13 [1] : vector<32x32xf32> to vector<32xf32>
    %24 = vector.shape_cast %23 : vector<32xf32> to vector<32x1xf32>
    %cst_14 = arith.constant 3.200000e+01 : f32
    %25 = vector.broadcast %cst_14 : f32 to vector<32x1xf32>
    %26 = arith.divf %24, %25 : vector<32x1xf32>
    %27 = vector.broadcast %19 : vector<32x1xf32> to vector<32x32xf32>
    %28 = arith.subf %13, %27 : vector<32x32xf32>
    %cst_15 = arith.constant 9.99999974E-6 : f32
    %29 = vector.broadcast %cst_15 : f32 to vector<32x1xf32>
    %30 = arith.addf %26, %29 : vector<32x1xf32>
    %31 = math.rsqrt %30 : vector<32x1xf32>
    %32 = vector.broadcast %31 : vector<32x1xf32> to vector<32x32xf32>
    %33 = arith.mulf %28, %32 : vector<32x32xf32>
    %34 = vector.broadcast %14 : vector<1x32xf32> to vector<32x32xf32>
    %35 = arith.mulf %33, %34 : vector<32x32xf32>
    %36 = vector.broadcast %15 : vector<1x32xf32> to vector<32x32xf32>
    %37 = arith.addf %35, %36 : vector<32x32xf32>
    %cst_16 = arith.constant 0.000000e+00 : f32
    %38 = vector.broadcast %cst_16 : f32 to vector<32x32xf32>
    %c0_17 = arith.constant 0 : index
    %c0_18 = arith.constant 0 : index
    %c0_19 = arith.constant 0 : index
    %39 = vector.load %arg7[%c0_17, %c0_18, %c0_19] : memref<4x32x8xf32, #tpu.memory_space<vmem>>, vector<1x32x8xf32>
    %40 = vector.shape_cast %39 : vector<1x32x8xf32> to vector<32x8xf32>
    %41 = arith.truncf %37 : vector<32x32xf32> to vector<32x32xbf16>
    %42 = arith.truncf %40 : vector<32x8xf32> to vector<32x8xbf16>
    %cst_20 = arith.constant dense<0.000000e+00> : vector<32x8xf32>
    %43 = tpu.matmul %41, %42, %cst_20 {dimension_numbers = #tpu.dot_dimension_numbers<[1], [0], [0], [1], [0, 0, 1, 1], [], []>} : vector<32x32xbf16>, vector<32x8xbf16>, vector<32x8xf32> -> vector<32x8xf32>
    %c0_21 = arith.constant 0 : index
    %c0_22 = arith.constant 0 : index
    %c0_23 = arith.constant 0 : index
    %44 = vector.load %arg8[%c0_21, %c0_22, %c0_23] : memref<4x1x8xf32, #tpu.memory_space<vmem>>, vector<1x1x8xf32>
    %45 = vector.shape_cast %44 : vector<1x1x8xf32> to vector<1x8xf32>
    %46 = vector.broadcast %45 : vector<1x8xf32> to vector<32x8xf32>
    %47 = arith.addf %43, %46 : vector<32x8xf32>
    %48 = vector.shape_cast %47 : vector<32x8xf32> to vector<2x16x8xf32>
    %c0_24 = arith.constant 0 : index
    %c0_25 = arith.constant 0 : index
    %c0_26 = arith.constant 0 : index
    %49 = vector.load %arg9[%c0_24, %c0_25, %c0_26] : memref<4x32x8xf32, #tpu.memory_space<vmem>>, vector<1x32x8xf32>
    %50 = vector.shape_cast %49 : vector<1x32x8xf32> to vector<32x8xf32>
    %51 = arith.truncf %37 : vector<32x32xf32> to vector<32x32xbf16>
    %52 = arith.truncf %50 : vector<32x8xf32> to vector<32x8xbf16>
    %cst_27 = arith.constant dense<0.000000e+00> : vector<32x8xf32>
    %53 = tpu.matmul %51, %52, %cst_27 {dimension_numbers = #tpu.dot_dimension_numbers<[1], [0], [0], [1], [0, 0, 1, 1], [], []>} : vector<32x32xbf16>, vector<32x8xbf16>, vector<32x8xf32> -> vector<32x8xf32>
    %c0_28 = arith.constant 0 : index
    %c0_29 = arith.constant 0 : index
    %c0_30 = arith.constant 0 : index
    %54 = vector.load %arg10[%c0_28, %c0_29, %c0_30] : memref<4x1x8xf32, #tpu.memory_space<vmem>>, vector<1x1x8xf32>
    %55 = vector.shape_cast %54 : vector<1x1x8xf32> to vector<1x8xf32>
    %56 = vector.broadcast %55 : vector<1x8xf32> to vector<32x8xf32>
    %57 = arith.addf %53, %56 : vector<32x8xf32>
    %58 = vector.shape_cast %57 : vector<32x8xf32> to vector<2x16x8xf32>
    %c0_31 = arith.constant 0 : index
    %c0_32 = arith.constant 0 : index
    %c0_33 = arith.constant 0 : index
    %59 = vector.load %arg11[%c0_31, %c0_32, %c0_33] : memref<4x32x8xf32, #tpu.memory_space<vmem>>, vector<1x32x8xf32>
    %60 = vector.shape_cast %59 : vector<1x32x8xf32> to vector<32x8xf32>
    %61 = arith.truncf %37 : vector<32x32xf32> to vector<32x32xbf16>
    %62 = arith.truncf %60 : vector<32x8xf32> to vector<32x8xbf16>
    %cst_34 = arith.constant dense<0.000000e+00> : vector<32x8xf32>
    %63 = tpu.matmul %61, %62, %cst_34 {dimension_numbers = #tpu.dot_dimension_numbers<[1], [0], [0], [1], [0, 0, 1, 1], [], []>} : vector<32x32xbf16>, vector<32x8xbf16>, vector<32x8xf32> -> vector<32x8xf32>
    %c0_35 = arith.constant 0 : index
    %c0_36 = arith.constant 0 : index
    %c0_37 = arith.constant 0 : index
    %64 = vector.load %arg12[%c0_35, %c0_36, %c0_37] : memref<4x1x8xf32, #tpu.memory_space<vmem>>, vector<1x1x8xf32>
    %65 = vector.shape_cast %64 : vector<1x1x8xf32> to vector<1x8xf32>
    %66 = vector.broadcast %65 : vector<1x8xf32> to vector<32x8xf32>
    %67 = arith.addf %63, %66 : vector<32x8xf32>
    %68 = vector.shape_cast %67 : vector<32x8xf32> to vector<2x16x8xf32>
    %69 = arith.truncf %48 : vector<2x16x8xf32> to vector<2x16x8xbf16>
    %70 = arith.truncf %58 : vector<2x16x8xf32> to vector<2x16x8xbf16>
    "tpu.trace_start"() <{level = 10 : i32, message = "bnd,bmd->bnm"}> : () -> ()
    %cst_38 = arith.constant dense<0.000000e+00> : vector<2x16x16xf32>
    %71 = tpu.matmul %69, %70, %cst_38 {dimension_numbers = #tpu.dot_dimension_numbers<[2], [2], [1], [1], [0, 0, 0, 1, 1, 1], [0], [0]>} : vector<2x16x8xbf16>, vector<2x16x8xbf16>, vector<2x16x16xf32> -> vector<2x16x16xf32>
    "tpu.trace_stop"() : () -> ()
    %cst_39 = arith.constant 0.353553385 : f32
    %72 = vector.broadcast %cst_39 : f32 to vector<2x16x16xf32>
    %73 = arith.mulf %71, %72 : vector<2x16x16xf32>
    %cst_40 = arith.constant dense<0xFF800000> : vector<2x16xf32>
    %74 = vector.multi_reduction <maximumf>, %73, %cst_40 [2] : vector<2x16x16xf32> to vector<2x16xf32>
    %75 = vector.shape_cast %74 : vector<2x16xf32> to vector<2x16x1xf32>
    %76 = vector.broadcast %75 : vector<2x16x1xf32> to vector<2x16x16xf32>
    %77 = arith.subf %73, %76 : vector<2x16x16xf32>
    %78 = math.exp %77 : vector<2x16x16xf32>
    %cst_41 = arith.constant dense<0.000000e+00> : vector<2x16xf32>
    %79 = vector.multi_reduction <add>, %78, %cst_41 [2] : vector<2x16x16xf32> to vector<2x16xf32>
    %80 = vector.shape_cast %79 : vector<2x16xf32> to vector<2x16x1xf32>
    %81 = tpu.reciprocal %80 {approx = true} : vector<2x16x1xf32> -> vector<2x16x1xf32>
    %82 = vector.broadcast %81 : vector<2x16x1xf32> to vector<2x16x16xf32>
    %83 = arith.mulf %78, %82 : vector<2x16x16xf32>
    %84 = arith.truncf %83 : vector<2x16x16xf32> to vector<2x16x16xbf16>
    %85 = arith.truncf %68 : vector<2x16x8xf32> to vector<2x16x8xbf16>
    "tpu.trace_start"() <{level = 10 : i32, message = "bnm,bmd->bnd"}> : () -> ()
    %cst_42 = arith.constant dense<0.000000e+00> : vector<2x16x8xf32>
    %86 = tpu.matmul %84, %85, %cst_42 {dimension_numbers = #tpu.dot_dimension_numbers<[2], [1], [1], [2], [0, 0, 0, 1, 1, 2], [0], [0]>} : vector<2x16x16xbf16>, vector<2x16x8xbf16>, vector<2x16x8xf32> -> vector<2x16x8xf32>
    "tpu.trace_stop"() : () -> ()
    %87 = vector.shape_cast %86 : vector<2x16x8xf32> to vector<32x8xf32>
    %c0_43 = arith.constant 0 : index
    %c0_44 = arith.constant 0 : index
    %c0_45 = arith.constant 0 : index
    %88 = vector.load %arg13[%c0_43, %c0_44, %c0_45] : memref<4x8x32xf32, #tpu.memory_space<vmem>>, vector<1x8x32xf32>
    %89 = vector.shape_cast %88 : vector<1x8x32xf32> to vector<8x32xf32>
    %90 = arith.truncf %87 : vector<32x8xf32> to vector<32x8xbf16>
    %91 = arith.truncf %89 : vector<8x32xf32> to vector<8x32xbf16>
    %cst_46 = arith.constant dense<0.000000e+00> : vector<32x32xf32>
    %92 = tpu.matmul %90, %91, %cst_46 {dimension_numbers = #tpu.dot_dimension_numbers<[1], [0], [0], [1], [0, 0, 1, 1], [], []>} : vector<32x8xbf16>, vector<8x32xbf16>, vector<32x32xf32> -> vector<32x32xf32>
    %93 = arith.addf %38, %92 : vector<32x32xf32>
    %c1 = arith.constant 1 : index
    %c0_47 = arith.constant 0 : index
    %c0_48 = arith.constant 0 : index
    %94 = vector.load %arg7[%c1, %c0_47, %c0_48] : memref<4x32x8xf32, #tpu.memory_space<vmem>>, vector<1x32x8xf32>
    %95 = vector.shape_cast %94 : vector<1x32x8xf32> to vector<32x8xf32>
    %96 = arith.truncf %37 : vector<32x32xf32> to vector<32x32xbf16>
    %97 = arith.truncf %95 : vector<32x8xf32> to vector<32x8xbf16>
    %cst_49 = arith.constant dense<0.000000e+00> : vector<32x8xf32>
    %98 = tpu.matmul %96, %97, %cst_49 {dimension_numbers = #tpu.dot_dimension_numbers<[1], [0], [0], [1], [0, 0, 1, 1], [], []>} : vector<32x32xbf16>, vector<32x8xbf16>, vector<32x8xf32> -> vector<32x8xf32>
    %c1_50 = arith.constant 1 : index
    %c0_51 = arith.constant 0 : index
    %c0_52 = arith.constant 0 : index
    %99 = vector.load %arg8[%c1_50, %c0_51, %c0_52] : memref<4x1x8xf32, #tpu.memory_space<vmem>>, vector<1x1x8xf32>
    %100 = vector.shape_cast %99 : vector<1x1x8xf32> to vector<1x8xf32>
    %101 = vector.broadcast %100 : vector<1x8xf32> to vector<32x8xf32>
    %102 = arith.addf %98, %101 : vector<32x8xf32>
    %103 = vector.shape_cast %102 : vector<32x8xf32> to vector<2x16x8xf32>
    %c1_53 = arith.constant 1 : index
    %c0_54 = arith.constant 0 : index
    %c0_55 = arith.constant 0 : index
    %104 = vector.load %arg9[%c1_53, %c0_54, %c0_55] : memref<4x32x8xf32, #tpu.memory_space<vmem>>, vector<1x32x8xf32>
    %105 = vector.shape_cast %104 : vector<1x32x8xf32> to vector<32x8xf32>
    %106 = arith.truncf %37 : vector<32x32xf32> to vector<32x32xbf16>
    %107 = arith.truncf %105 : vector<32x8xf32> to vector<32x8xbf16>
    %cst_56 = arith.constant dense<0.000000e+00> : vector<32x8xf32>
    %108 = tpu.matmul %106, %107, %cst_56 {dimension_numbers = #tpu.dot_dimension_numbers<[1], [0], [0], [1], [0, 0, 1, 1], [], []>} : vector<32x32xbf16>, vector<32x8xbf16>, vector<32x8xf32> -> vector<32x8xf32>
    %c1_57 = arith.constant 1 : index
    %c0_58 = arith.constant 0 : index
    %c0_59 = arith.constant 0 : index
    %109 = vector.load %arg10[%c1_57, %c0_58, %c0_59] : memref<4x1x8xf32, #tpu.memory_space<vmem>>, vector<1x1x8xf32>
    %110 = vector.shape_cast %109 : vector<1x1x8xf32> to vector<1x8xf32>
    %111 = vector.broadcast %110 : vector<1x8xf32> to vector<32x8xf32>
    %112 = arith.addf %108, %111 : vector<32x8xf32>
    %113 = vector.shape_cast %112 : vector<32x8xf32> to vector<2x16x8xf32>
    %c1_60 = arith.constant 1 : index
    %c0_61 = arith.constant 0 : index
    %c0_62 = arith.constant 0 : index
    %114 = vector.load %arg11[%c1_60, %c0_61, %c0_62] : memref<4x32x8xf32, #tpu.memory_space<vmem>>, vector<1x32x8xf32>
    %115 = vector.shape_cast %114 : vector<1x32x8xf32> to vector<32x8xf32>
    %116 = arith.truncf %37 : vector<32x32xf32> to vector<32x32xbf16>
    %117 = arith.truncf %115 : vector<32x8xf32> to vector<32x8xbf16>
    %cst_63 = arith.constant dense<0.000000e+00> : vector<32x8xf32>
    %118 = tpu.matmul %116, %117, %cst_63 {dimension_numbers = #tpu.dot_dimension_numbers<[1], [0], [0], [1], [0, 0, 1, 1], [], []>} : vector<32x32xbf16>, vector<32x8xbf16>, vector<32x8xf32> -> vector<32x8xf32>
    %c1_64 = arith.constant 1 : index
    %c0_65 = arith.constant 0 : index
    %c0_66 = arith.constant 0 : index
    %119 = vector.load %arg12[%c1_64, %c0_65, %c0_66] : memref<4x1x8xf32, #tpu.memory_space<vmem>>, vector<1x1x8xf32>
    %120 = vector.shape_cast %119 : vector<1x1x8xf32> to vector<1x8xf32>
    %121 = vector.broadcast %120 : vector<1x8xf32> to vector<32x8xf32>
    %122 = arith.addf %118, %121 : vector<32x8xf32>
    %123 = vector.shape_cast %122 : vector<32x8xf32> to vector<2x16x8xf32>
    %124 = arith.truncf %103 : vector<2x16x8xf32> to vector<2x16x8xbf16>
    %125 = arith.truncf %113 : vector<2x16x8xf32> to vector<2x16x8xbf16>
    "tpu.trace_start"() <{level = 10 : i32, message = "bnd,bmd->bnm"}> : () -> ()
    %cst_67 = arith.constant dense<0.000000e+00> : vector<2x16x16xf32>
    %126 = tpu.matmul %124, %125, %cst_67 {dimension_numbers = #tpu.dot_dimension_numbers<[2], [2], [1], [1], [0, 0, 0, 1, 1, 1], [0], [0]>} : vector<2x16x8xbf16>, vector<2x16x8xbf16>, vector<2x16x16xf32> -> vector<2x16x16xf32>
    "tpu.trace_stop"() : () -> ()
    %cst_68 = arith.constant 0.353553385 : f32
    %127 = vector.broadcast %cst_68 : f32 to vector<2x16x16xf32>
    %128 = arith.mulf %126, %127 : vector<2x16x16xf32>
    %cst_69 = arith.constant dense<0xFF800000> : vector<2x16xf32>
    %129 = vector.multi_reduction <maximumf>, %128, %cst_69 [2] : vector<2x16x16xf32> to vector<2x16xf32>
    %130 = vector.shape_cast %129 : vector<2x16xf32> to vector<2x16x1xf32>
    %131 = vector.broadcast %130 : vector<2x16x1xf32> to vector<2x16x16xf32>
    %132 = arith.subf %128, %131 : vector<2x16x16xf32>
    %133 = math.exp %132 : vector<2x16x16xf32>
    %cst_70 = arith.constant dense<0.000000e+00> : vector<2x16xf32>
    %134 = vector.multi_reduction <add>, %133, %cst_70 [2] : vector<2x16x16xf32> to vector<2x16xf32>
    %135 = vector.shape_cast %134 : vector<2x16xf32> to vector<2x16x1xf32>
    %136 = tpu.reciprocal %135 {approx = true} : vector<2x16x1xf32> -> vector<2x16x1xf32>
    %137 = vector.broadcast %136 : vector<2x16x1xf32> to vector<2x16x16xf32>
    %138 = arith.mulf %133, %137 : vector<2x16x16xf32>
    %139 = arith.truncf %138 : vector<2x16x16xf32> to vector<2x16x16xbf16>
    %140 = arith.truncf %123 : vector<2x16x8xf32> to vector<2x16x8xbf16>
    "tpu.trace_start"() <{level = 10 : i32, message = "bnm,bmd->bnd"}> : () -> ()
    %cst_71 = arith.constant dense<0.000000e+00> : vector<2x16x8xf32>
    %141 = tpu.matmul %139, %140, %cst_71 {dimension_numbers = #tpu.dot_dimension_numbers<[2], [1], [1], [2], [0, 0, 0, 1, 1, 2], [0], [0]>} : vector<2x16x16xbf16>, vector<2x16x8xbf16>, vector<2x16x8xf32> -> vector<2x16x8xf32>
    "tpu.trace_stop"() : () -> ()
    %142 = vector.shape_cast %141 : vector<2x16x8xf32> to vector<32x8xf32>
    %c1_72 = arith.constant 1 : index
    %c0_73 = arith.constant 0 : index
    %c0_74 = arith.constant 0 : index
    %143 = vector.load %arg13[%c1_72, %c0_73, %c0_74] : memref<4x8x32xf32, #tpu.memory_space<vmem>>, vector<1x8x32xf32>
    %144 = vector.shape_cast %143 : vector<1x8x32xf32> to vector<8x32xf32>
    %145 = arith.truncf %142 : vector<32x8xf32> to vector<32x8xbf16>
    %146 = arith.truncf %144 : vector<8x32xf32> to vector<8x32xbf16>
    %cst_75 = arith.constant dense<0.000000e+00> : vector<32x32xf32>
    %147 = tpu.matmul %145, %146, %cst_75 {dimension_numbers = #tpu.dot_dimension_numbers<[1], [0], [0], [1], [0, 0, 1, 1], [], []>} : vector<32x8xbf16>, vector<8x32xbf16>, vector<32x32xf32> -> vector<32x32xf32>
    %148 = arith.addf %93, %147 : vector<32x32xf32>
    %c2 = arith.constant 2 : index
    %c0_76 = arith.constant 0 : index
    %c0_77 = arith.constant 0 : index
    %149 = vector.load %arg7[%c2, %c0_76, %c0_77] : memref<4x32x8xf32, #tpu.memory_space<vmem>>, vector<1x32x8xf32>
    %150 = vector.shape_cast %149 : vector<1x32x8xf32> to vector<32x8xf32>
    %151 = arith.truncf %37 : vector<32x32xf32> to vector<32x32xbf16>
    %152 = arith.truncf %150 : vector<32x8xf32> to vector<32x8xbf16>
    %cst_78 = arith.constant dense<0.000000e+00> : vector<32x8xf32>
    %153 = tpu.matmul %151, %152, %cst_78 {dimension_numbers = #tpu.dot_dimension_numbers<[1], [0], [0], [1], [0, 0, 1, 1], [], []>} : vector<32x32xbf16>, vector<32x8xbf16>, vector<32x8xf32> -> vector<32x8xf32>
    %c2_79 = arith.constant 2 : index
    %c0_80 = arith.constant 0 : index
    %c0_81 = arith.constant 0 : index
    %154 = vector.load %arg8[%c2_79, %c0_80, %c0_81] : memref<4x1x8xf32, #tpu.memory_space<vmem>>, vector<1x1x8xf32>
    %155 = vector.shape_cast %154 : vector<1x1x8xf32> to vector<1x8xf32>
    %156 = vector.broadcast %155 : vector<1x8xf32> to vector<32x8xf32>
    %157 = arith.addf %153, %156 : vector<32x8xf32>
    %158 = vector.shape_cast %157 : vector<32x8xf32> to vector<2x16x8xf32>
    %c2_82 = arith.constant 2 : index
    %c0_83 = arith.constant 0 : index
    %c0_84 = arith.constant 0 : index
    %159 = vector.load %arg9[%c2_82, %c0_83, %c0_84] : memref<4x32x8xf32, #tpu.memory_space<vmem>>, vector<1x32x8xf32>
    %160 = vector.shape_cast %159 : vector<1x32x8xf32> to vector<32x8xf32>
    %161 = arith.truncf %37 : vector<32x32xf32> to vector<32x32xbf16>
    %162 = arith.truncf %160 : vector<32x8xf32> to vector<32x8xbf16>
    %cst_85 = arith.constant dense<0.000000e+00> : vector<32x8xf32>
    %163 = tpu.matmul %161, %162, %cst_85 {dimension_numbers = #tpu.dot_dimension_numbers<[1], [0], [0], [1], [0, 0, 1, 1], [], []>} : vector<32x32xbf16>, vector<32x8xbf16>, vector<32x8xf32> -> vector<32x8xf32>
    %c2_86 = arith.constant 2 : index
    %c0_87 = arith.constant 0 : index
    %c0_88 = arith.constant 0 : index
    %164 = vector.load %arg10[%c2_86, %c0_87, %c0_88] : memref<4x1x8xf32, #tpu.memory_space<vmem>>, vector<1x1x8xf32>
    %165 = vector.shape_cast %164 : vector<1x1x8xf32> to vector<1x8xf32>
    %166 = vector.broadcast %165 : vector<1x8xf32> to vector<32x8xf32>
    %167 = arith.addf %163, %166 : vector<32x8xf32>
    %168 = vector.shape_cast %167 : vector<32x8xf32> to vector<2x16x8xf32>
    %c2_89 = arith.constant 2 : index
    %c0_90 = arith.constant 0 : index
    %c0_91 = arith.constant 0 : index
    %169 = vector.load %arg11[%c2_89, %c0_90, %c0_91] : memref<4x32x8xf32, #tpu.memory_space<vmem>>, vector<1x32x8xf32>
    %170 = vector.shape_cast %169 : vector<1x32x8xf32> to vector<32x8xf32>
    %171 = arith.truncf %37 : vector<32x32xf32> to vector<32x32xbf16>
    %172 = arith.truncf %170 : vector<32x8xf32> to vector<32x8xbf16>
    %cst_92 = arith.constant dense<0.000000e+00> : vector<32x8xf32>
    %173 = tpu.matmul %171, %172, %cst_92 {dimension_numbers = #tpu.dot_dimension_numbers<[1], [0], [0], [1], [0, 0, 1, 1], [], []>} : vector<32x32xbf16>, vector<32x8xbf16>, vector<32x8xf32> -> vector<32x8xf32>
    %c2_93 = arith.constant 2 : index
    %c0_94 = arith.constant 0 : index
    %c0_95 = arith.constant 0 : index
    %174 = vector.load %arg12[%c2_93, %c0_94, %c0_95] : memref<4x1x8xf32, #tpu.memory_space<vmem>>, vector<1x1x8xf32>
    %175 = vector.shape_cast %174 : vector<1x1x8xf32> to vector<1x8xf32>
    %176 = vector.broadcast %175 : vector<1x8xf32> to vector<32x8xf32>
    %177 = arith.addf %173, %176 : vector<32x8xf32>
    %178 = vector.shape_cast %177 : vector<32x8xf32> to vector<2x16x8xf32>
    %179 = arith.truncf %158 : vector<2x16x8xf32> to vector<2x16x8xbf16>
    %180 = arith.truncf %168 : vector<2x16x8xf32> to vector<2x16x8xbf16>
    "tpu.trace_start"() <{level = 10 : i32, message = "bnd,bmd->bnm"}> : () -> ()
    %cst_96 = arith.constant dense<0.000000e+00> : vector<2x16x16xf32>
    %181 = tpu.matmul %179, %180, %cst_96 {dimension_numbers = #tpu.dot_dimension_numbers<[2], [2], [1], [1], [0, 0, 0, 1, 1, 1], [0], [0]>} : vector<2x16x8xbf16>, vector<2x16x8xbf16>, vector<2x16x16xf32> -> vector<2x16x16xf32>
    "tpu.trace_stop"() : () -> ()
    %cst_97 = arith.constant 0.353553385 : f32
    %182 = vector.broadcast %cst_97 : f32 to vector<2x16x16xf32>
    %183 = arith.mulf %181, %182 : vector<2x16x16xf32>
    %cst_98 = arith.constant dense<0xFF800000> : vector<2x16xf32>
    %184 = vector.multi_reduction <maximumf>, %183, %cst_98 [2] : vector<2x16x16xf32> to vector<2x16xf32>
    %185 = vector.shape_cast %184 : vector<2x16xf32> to vector<2x16x1xf32>
    %186 = vector.broadcast %185 : vector<2x16x1xf32> to vector<2x16x16xf32>
    %187 = arith.subf %183, %186 : vector<2x16x16xf32>
    %188 = math.exp %187 : vector<2x16x16xf32>
    %cst_99 = arith.constant dense<0.000000e+00> : vector<2x16xf32>
    %189 = vector.multi_reduction <add>, %188, %cst_99 [2] : vector<2x16x16xf32> to vector<2x16xf32>
    %190 = vector.shape_cast %189 : vector<2x16xf32> to vector<2x16x1xf32>
    %191 = tpu.reciprocal %190 {approx = true} : vector<2x16x1xf32> -> vector<2x16x1xf32>
    %192 = vector.broadcast %191 : vector<2x16x1xf32> to vector<2x16x16xf32>
    %193 = arith.mulf %188, %192 : vector<2x16x16xf32>
    %194 = arith.truncf %193 : vector<2x16x16xf32> to vector<2x16x16xbf16>
    %195 = arith.truncf %178 : vector<2x16x8xf32> to vector<2x16x8xbf16>
    "tpu.trace_start"() <{level = 10 : i32, message = "bnm,bmd->bnd"}> : () -> ()
    %cst_100 = arith.constant dense<0.000000e+00> : vector<2x16x8xf32>
    %196 = tpu.matmul %194, %195, %cst_100 {dimension_numbers = #tpu.dot_dimension_numbers<[2], [1], [1], [2], [0, 0, 0, 1, 1, 2], [0], [0]>} : vector<2x16x16xbf16>, vector<2x16x8xbf16>, vector<2x16x8xf32> -> vector<2x16x8xf32>
    "tpu.trace_stop"() : () -> ()
    %197 = vector.shape_cast %196 : vector<2x16x8xf32> to vector<32x8xf32>
    %c2_101 = arith.constant 2 : index
    %c0_102 = arith.constant 0 : index
    %c0_103 = arith.constant 0 : index
    %198 = vector.load %arg13[%c2_101, %c0_102, %c0_103] : memref<4x8x32xf32, #tpu.memory_space<vmem>>, vector<1x8x32xf32>
    %199 = vector.shape_cast %198 : vector<1x8x32xf32> to vector<8x32xf32>
    %200 = arith.truncf %197 : vector<32x8xf32> to vector<32x8xbf16>
    %201 = arith.truncf %199 : vector<8x32xf32> to vector<8x32xbf16>
    %cst_104 = arith.constant dense<0.000000e+00> : vector<32x32xf32>
    %202 = tpu.matmul %200, %201, %cst_104 {dimension_numbers = #tpu.dot_dimension_numbers<[1], [0], [0], [1], [0, 0, 1, 1], [], []>} : vector<32x8xbf16>, vector<8x32xbf16>, vector<32x32xf32> -> vector<32x32xf32>
    %203 = arith.addf %148, %202 : vector<32x32xf32>
    %c3 = arith.constant 3 : index
    %c0_105 = arith.constant 0 : index
    %c0_106 = arith.constant 0 : index
    %204 = vector.load %arg7[%c3, %c0_105, %c0_106] : memref<4x32x8xf32, #tpu.memory_space<vmem>>, vector<1x32x8xf32>
    %205 = vector.shape_cast %204 : vector<1x32x8xf32> to vector<32x8xf32>
    %206 = arith.truncf %37 : vector<32x32xf32> to vector<32x32xbf16>
    %207 = arith.truncf %205 : vector<32x8xf32> to vector<32x8xbf16>
    %cst_107 = arith.constant dense<0.000000e+00> : vector<32x8xf32>
    %208 = tpu.matmul %206, %207, %cst_107 {dimension_numbers = #tpu.dot_dimension_numbers<[1], [0], [0], [1], [0, 0, 1, 1], [], []>} : vector<32x32xbf16>, vector<32x8xbf16>, vector<32x8xf32> -> vector<32x8xf32>
    %c3_108 = arith.constant 3 : index
    %c0_109 = arith.constant 0 : index
    %c0_110 = arith.constant 0 : index
    %209 = vector.load %arg8[%c3_108, %c0_109, %c0_110] : memref<4x1x8xf32, #tpu.memory_space<vmem>>, vector<1x1x8xf32>
    %210 = vector.shape_cast %209 : vector<1x1x8xf32> to vector<1x8xf32>
    %211 = vector.broadcast %210 : vector<1x8xf32> to vector<32x8xf32>
    %212 = arith.addf %208, %211 : vector<32x8xf32>
    %213 = vector.shape_cast %212 : vector<32x8xf32> to vector<2x16x8xf32>
    %c3_111 = arith.constant 3 : index
    %c0_112 = arith.constant 0 : index
    %c0_113 = arith.constant 0 : index
    %214 = vector.load %arg9[%c3_111, %c0_112, %c0_113] : memref<4x32x8xf32, #tpu.memory_space<vmem>>, vector<1x32x8xf32>
    %215 = vector.shape_cast %214 : vector<1x32x8xf32> to vector<32x8xf32>
    %216 = arith.truncf %37 : vector<32x32xf32> to vector<32x32xbf16>
    %217 = arith.truncf %215 : vector<32x8xf32> to vector<32x8xbf16>
    %cst_114 = arith.constant dense<0.000000e+00> : vector<32x8xf32>
    %218 = tpu.matmul %216, %217, %cst_114 {dimension_numbers = #tpu.dot_dimension_numbers<[1], [0], [0], [1], [0, 0, 1, 1], [], []>} : vector<32x32xbf16>, vector<32x8xbf16>, vector<32x8xf32> -> vector<32x8xf32>
    %c3_115 = arith.constant 3 : index
    %c0_116 = arith.constant 0 : index
    %c0_117 = arith.constant 0 : index
    %219 = vector.load %arg10[%c3_115, %c0_116, %c0_117] : memref<4x1x8xf32, #tpu.memory_space<vmem>>, vector<1x1x8xf32>
    %220 = vector.shape_cast %219 : vector<1x1x8xf32> to vector<1x8xf32>
    %221 = vector.broadcast %220 : vector<1x8xf32> to vector<32x8xf32>
    %222 = arith.addf %218, %221 : vector<32x8xf32>
    %223 = vector.shape_cast %222 : vector<32x8xf32> to vector<2x16x8xf32>
    %c3_118 = arith.constant 3 : index
    %c0_119 = arith.constant 0 : index
    %c0_120 = arith.constant 0 : index
    %224 = vector.load %arg11[%c3_118, %c0_119, %c0_120] : memref<4x32x8xf32, #tpu.memory_space<vmem>>, vector<1x32x8xf32>
    %225 = vector.shape_cast %224 : vector<1x32x8xf32> to vector<32x8xf32>
    %226 = arith.truncf %37 : vector<32x32xf32> to vector<32x32xbf16>
    %227 = arith.truncf %225 : vector<32x8xf32> to vector<32x8xbf16>
    %cst_121 = arith.constant dense<0.000000e+00> : vector<32x8xf32>
    %228 = tpu.matmul %226, %227, %cst_121 {dimension_numbers = #tpu.dot_dimension_numbers<[1], [0], [0], [1], [0, 0, 1, 1], [], []>} : vector<32x32xbf16>, vector<32x8xbf16>, vector<32x8xf32> -> vector<32x8xf32>
    %c3_122 = arith.constant 3 : index
    %c0_123 = arith.constant 0 : index
    %c0_124 = arith.constant 0 : index
    %229 = vector.load %arg12[%c3_122, %c0_123, %c0_124] : memref<4x1x8xf32, #tpu.memory_space<vmem>>, vector<1x1x8xf32>
    %230 = vector.shape_cast %229 : vector<1x1x8xf32> to vector<1x8xf32>
    %231 = vector.broadcast %230 : vector<1x8xf32> to vector<32x8xf32>
    %232 = arith.addf %228, %231 : vector<32x8xf32>
    %233 = vector.shape_cast %232 : vector<32x8xf32> to vector<2x16x8xf32>
    %234 = arith.truncf %213 : vector<2x16x8xf32> to vector<2x16x8xbf16>
    %235 = arith.truncf %223 : vector<2x16x8xf32> to vector<2x16x8xbf16>
    "tpu.trace_start"() <{level = 10 : i32, message = "bnd,bmd->bnm"}> : () -> ()
    %cst_125 = arith.constant dense<0.000000e+00> : vector<2x16x16xf32>
    %236 = tpu.matmul %234, %235, %cst_125 {dimension_numbers = #tpu.dot_dimension_numbers<[2], [2], [1], [1], [0, 0, 0, 1, 1, 1], [0], [0]>} : vector<2x16x8xbf16>, vector<2x16x8xbf16>, vector<2x16x16xf32> -> vector<2x16x16xf32>
    "tpu.trace_stop"() : () -> ()
    %cst_126 = arith.constant 0.353553385 : f32
    %237 = vector.broadcast %cst_126 : f32 to vector<2x16x16xf32>
    %238 = arith.mulf %236, %237 : vector<2x16x16xf32>
    %cst_127 = arith.constant dense<0xFF800000> : vector<2x16xf32>
    %239 = vector.multi_reduction <maximumf>, %238, %cst_127 [2] : vector<2x16x16xf32> to vector<2x16xf32>
    %240 = vector.shape_cast %239 : vector<2x16xf32> to vector<2x16x1xf32>
    %241 = vector.broadcast %240 : vector<2x16x1xf32> to vector<2x16x16xf32>
    %242 = arith.subf %238, %241 : vector<2x16x16xf32>
    %243 = math.exp %242 : vector<2x16x16xf32>
    %cst_128 = arith.constant dense<0.000000e+00> : vector<2x16xf32>
    %244 = vector.multi_reduction <add>, %243, %cst_128 [2] : vector<2x16x16xf32> to vector<2x16xf32>
    %245 = vector.shape_cast %244 : vector<2x16xf32> to vector<2x16x1xf32>
    %246 = tpu.reciprocal %245 {approx = true} : vector<2x16x1xf32> -> vector<2x16x1xf32>
    %247 = vector.broadcast %246 : vector<2x16x1xf32> to vector<2x16x16xf32>
    %248 = arith.mulf %243, %247 : vector<2x16x16xf32>
    %249 = arith.truncf %248 : vector<2x16x16xf32> to vector<2x16x16xbf16>
    %250 = arith.truncf %233 : vector<2x16x8xf32> to vector<2x16x8xbf16>
    "tpu.trace_start"() <{level = 10 : i32, message = "bnm,bmd->bnd"}> : () -> ()
    %cst_129 = arith.constant dense<0.000000e+00> : vector<2x16x8xf32>
    %251 = tpu.matmul %249, %250, %cst_129 {dimension_numbers = #tpu.dot_dimension_numbers<[2], [1], [1], [2], [0, 0, 0, 1, 1, 2], [0], [0]>} : vector<2x16x16xbf16>, vector<2x16x8xbf16>, vector<2x16x8xf32> -> vector<2x16x8xf32>
    "tpu.trace_stop"() : () -> ()
    %252 = vector.shape_cast %251 : vector<2x16x8xf32> to vector<32x8xf32>
    %c3_130 = arith.constant 3 : index
    %c0_131 = arith.constant 0 : index
    %c0_132 = arith.constant 0 : index
    %253 = vector.load %arg13[%c3_130, %c0_131, %c0_132] : memref<4x8x32xf32, #tpu.memory_space<vmem>>, vector<1x8x32xf32>
    %254 = vector.shape_cast %253 : vector<1x8x32xf32> to vector<8x32xf32>
    %255 = arith.truncf %252 : vector<32x8xf32> to vector<32x8xbf16>
    %256 = arith.truncf %254 : vector<8x32xf32> to vector<8x32xbf16>
    %cst_133 = arith.constant dense<0.000000e+00> : vector<32x32xf32>
    %257 = tpu.matmul %255, %256, %cst_133 {dimension_numbers = #tpu.dot_dimension_numbers<[1], [0], [0], [1], [0, 0, 1, 1], [], []>} : vector<32x8xbf16>, vector<8x32xbf16>, vector<32x32xf32> -> vector<32x32xf32>
    %258 = arith.addf %203, %257 : vector<32x32xf32>
    %259 = arith.addf %13, %258 : vector<32x32xf32>
    %c0_134 = arith.constant 0 : index
    %c0_135 = arith.constant 0 : index
    %260 = vector.load %arg14[%c0_134, %c0_135] : memref<1x32xf32, #tpu.memory_space<vmem>>, vector<1x32xf32>
    %261 = vector.broadcast %260 : vector<1x32xf32> to vector<32x32xf32>
    %262 = arith.addf %259, %261 : vector<32x32xf32>
    %c0_136 = arith.constant 0 : index
    %c0_137 = arith.constant 0 : index
    %263 = vector.load %arg15[%c0_136, %c0_137] : memref<1x32xf32, #tpu.memory_space<vmem>>, vector<1x32xf32>
    %c0_138 = arith.constant 0 : index
    %c0_139 = arith.constant 0 : index
    %264 = vector.load %arg16[%c0_138, %c0_139] : memref<1x32xf32, #tpu.memory_space<vmem>>, vector<1x32xf32>
    %cst_140 = arith.constant dense<0.000000e+00> : vector<32xf32>
    %265 = vector.multi_reduction <add>, %262, %cst_140 [1] : vector<32x32xf32> to vector<32xf32>
    %266 = vector.shape_cast %265 : vector<32xf32> to vector<32x1xf32>
    %cst_141 = arith.constant 3.200000e+01 : f32
    %267 = vector.broadcast %cst_141 : f32 to vector<32x1xf32>
    %268 = arith.divf %266, %267 : vector<32x1xf32>
    %269 = vector.broadcast %268 : vector<32x1xf32> to vector<32x32xf32>
    %270 = arith.subf %262, %269 : vector<32x32xf32>
    %271 = arith.mulf %270, %270 : vector<32x32xf32>
    %cst_142 = arith.constant dense<0.000000e+00> : vector<32xf32>
    %272 = vector.multi_reduction <add>, %271, %cst_142 [1] : vector<32x32xf32> to vector<32xf32>
    %273 = vector.shape_cast %272 : vector<32xf32> to vector<32x1xf32>
    %cst_143 = arith.constant 3.200000e+01 : f32
    %274 = vector.broadcast %cst_143 : f32 to vector<32x1xf32>
    %275 = arith.divf %273, %274 : vector<32x1xf32>
    %276 = vector.broadcast %268 : vector<32x1xf32> to vector<32x32xf32>
    %277 = arith.subf %262, %276 : vector<32x32xf32>
    %cst_144 = arith.constant 9.99999974E-6 : f32
    %278 = vector.broadcast %cst_144 : f32 to vector<32x1xf32>
    %279 = arith.addf %275, %278 : vector<32x1xf32>
    %280 = math.rsqrt %279 : vector<32x1xf32>
    %281 = vector.broadcast %280 : vector<32x1xf32> to vector<32x32xf32>
    %282 = arith.mulf %277, %281 : vector<32x32xf32>
    %283 = vector.broadcast %263 : vector<1x32xf32> to vector<32x32xf32>
    %284 = arith.mulf %282, %283 : vector<32x32xf32>
    %285 = vector.broadcast %264 : vector<1x32xf32> to vector<32x32xf32>
    %286 = arith.addf %284, %285 : vector<32x32xf32>
    %c0_145 = arith.constant 0 : index
    %c0_146 = arith.constant 0 : index
    %287 = vector.load %arg17[%c0_145, %c0_146] : memref<32x64xf32, #tpu.memory_space<vmem>>, vector<32x64xf32>
    %288 = arith.truncf %286 : vector<32x32xf32> to vector<32x32xbf16>
    %289 = arith.truncf %287 : vector<32x64xf32> to vector<32x64xbf16>
    %cst_147 = arith.constant dense<0.000000e+00> : vector<32x64xf32>
    %290 = tpu.matmul %288, %289, %cst_147 {dimension_numbers = #tpu.dot_dimension_numbers<[1], [0], [0], [1], [0, 0, 1, 1], [], []>} : vector<32x32xbf16>, vector<32x64xbf16>, vector<32x64xf32> -> vector<32x64xf32>
    %c0_148 = arith.constant 0 : index
    %c0_149 = arith.constant 0 : index
    %291 = vector.load %arg18[%c0_148, %c0_149] : memref<1x64xf32, #tpu.memory_space<vmem>>, vector<1x64xf32>
    %292 = vector.broadcast %291 : vector<1x64xf32> to vector<32x64xf32>
    %293 = arith.addf %290, %292 : vector<32x64xf32>
    %294 = arith.mulf %293, %293 : vector<32x64xf32>
    %295 = arith.mulf %293, %294 : vector<32x64xf32>
    %cst_150 = arith.constant 4.471500e-02 : f32
    %296 = vector.broadcast %cst_150 : f32 to vector<32x64xf32>
    %297 = arith.mulf %296, %295 : vector<32x64xf32>
    %298 = arith.addf %293, %297 : vector<32x64xf32>
    %cst_151 = arith.constant 0.797884583 : f32
    %299 = vector.broadcast %cst_151 : f32 to vector<32x64xf32>
    %300 = arith.mulf %299, %298 : vector<32x64xf32>
    %301 = math.tanh %300 : vector<32x64xf32>
    %cst_152 = arith.constant 1.000000e+00 : f32
    %302 = vector.broadcast %cst_152 : f32 to vector<32x64xf32>
    %303 = arith.addf %302, %301 : vector<32x64xf32>
    %cst_153 = arith.constant 5.000000e-01 : f32
    %304 = vector.broadcast %cst_153 : f32 to vector<32x64xf32>
    %305 = arith.mulf %304, %303 : vector<32x64xf32>
    %306 = arith.mulf %293, %305 : vector<32x64xf32>
    %c0_154 = arith.constant 0 : index
    %c0_155 = arith.constant 0 : index
    %307 = vector.load %arg19[%c0_154, %c0_155] : memref<64x32xf32, #tpu.memory_space<vmem>>, vector<64x32xf32>
    %308 = arith.truncf %306 : vector<32x64xf32> to vector<32x64xbf16>
    %309 = arith.truncf %307 : vector<64x32xf32> to vector<64x32xbf16>
    %cst_156 = arith.constant dense<0.000000e+00> : vector<32x32xf32>
    %310 = tpu.matmul %308, %309, %cst_156 {dimension_numbers = #tpu.dot_dimension_numbers<[1], [0], [0], [1], [0, 0, 1, 1], [], []>} : vector<32x64xbf16>, vector<64x32xbf16>, vector<32x32xf32> -> vector<32x32xf32>
    %311 = arith.addf %262, %310 : vector<32x32xf32>
    %c0_157 = arith.constant 0 : index
    %c0_158 = arith.constant 0 : index
    %312 = vector.load %arg20[%c0_157, %c0_158] : memref<1x32xf32, #tpu.memory_space<vmem>>, vector<1x32xf32>
    %313 = vector.broadcast %312 : vector<1x32xf32> to vector<32x32xf32>
    %314 = arith.addf %311, %313 : vector<32x32xf32>
    %c0_159 = arith.constant 0 : index
    %c0_160 = arith.constant 0 : index
    %315 = vector.load %arg21[%c0_159, %c0_160] : memref<1x32xf32, #tpu.memory_space<vmem>>, vector<1x32xf32>
    %c0_161 = arith.constant 0 : index
    %c0_162 = arith.constant 0 : index
    %316 = vector.load %arg22[%c0_161, %c0_162] : memref<1x32xf32, #tpu.memory_space<vmem>>, vector<1x32xf32>
    %cst_163 = arith.constant dense<0.000000e+00> : vector<32xf32>
    %317 = vector.multi_reduction <add>, %314, %cst_163 [1] : vector<32x32xf32> to vector<32xf32>
    %318 = vector.shape_cast %317 : vector<32xf32> to vector<32x1xf32>
    %cst_164 = arith.constant 3.200000e+01 : f32
    %319 = vector.broadcast %cst_164 : f32 to vector<32x1xf32>
    %320 = arith.divf %318, %319 : vector<32x1xf32>
    %321 = vector.broadcast %320 : vector<32x1xf32> to vector<32x32xf32>
    %322 = arith.subf %314, %321 : vector<32x32xf32>
    %323 = arith.mulf %322, %322 : vector<32x32xf32>
    %cst_165 = arith.constant dense<0.000000e+00> : vector<32xf32>
    %324 = vector.multi_reduction <add>, %323, %cst_165 [1] : vector<32x32xf32> to vector<32xf32>
    %325 = vector.shape_cast %324 : vector<32xf32> to vector<32x1xf32>
    %cst_166 = arith.constant 3.200000e+01 : f32
    %326 = vector.broadcast %cst_166 : f32 to vector<32x1xf32>
    %327 = arith.divf %325, %326 : vector<32x1xf32>
    %328 = vector.broadcast %320 : vector<32x1xf32> to vector<32x32xf32>
    %329 = arith.subf %314, %328 : vector<32x32xf32>
    %cst_167 = arith.constant 9.99999974E-6 : f32
    %330 = vector.broadcast %cst_167 : f32 to vector<32x1xf32>
    %331 = arith.addf %327, %330 : vector<32x1xf32>
    %332 = math.rsqrt %331 : vector<32x1xf32>
    %333 = vector.broadcast %332 : vector<32x1xf32> to vector<32x32xf32>
    %334 = arith.mulf %329, %333 : vector<32x32xf32>
    %335 = vector.broadcast %315 : vector<1x32xf32> to vector<32x32xf32>
    %336 = arith.mulf %334, %335 : vector<32x32xf32>
    %337 = vector.broadcast %316 : vector<1x32xf32> to vector<32x32xf32>
    %338 = arith.addf %336, %337 : vector<32x32xf32>
    %339 = vector.shape_cast %338 : vector<32x32xf32> to vector<2x16x32xf32>
    %cst_168 = arith.constant dense<0.000000e+00> : vector<2x32xf32>
    %340 = vector.multi_reduction <add>, %339, %cst_168 [1] : vector<2x16x32xf32> to vector<2x32xf32>
    %cst_169 = arith.constant 1.600000e+01 : f32
    %341 = vector.broadcast %cst_169 : f32 to vector<2x32xf32>
    %342 = arith.divf %340, %341 : vector<2x32xf32>
    %c0_170 = arith.constant 0 : index
    %c0_171 = arith.constant 0 : index
    %343 = vector.load %arg23[%c0_170, %c0_171] : memref<32x32xf32, #tpu.memory_space<vmem>>, vector<32x32xf32>
    %344 = arith.truncf %342 : vector<2x32xf32> to vector<2x32xbf16>
    %345 = arith.truncf %343 : vector<32x32xf32> to vector<32x32xbf16>
    %cst_172 = arith.constant dense<0.000000e+00> : vector<2x32xf32>
    %346 = tpu.matmul %344, %345, %cst_172 {dimension_numbers = #tpu.dot_dimension_numbers<[1], [0], [0], [1], [0, 0, 1, 1], [], []>} : vector<2x32xbf16>, vector<32x32xbf16>, vector<2x32xf32> -> vector<2x32xf32>
    %c0_173 = arith.constant 0 : index
    %c0_174 = arith.constant 0 : index
    %347 = vector.load %arg24[%c0_173, %c0_174] : memref<1x32xf32, #tpu.memory_space<vmem>>, vector<1x32xf32>
    %348 = vector.broadcast %347 : vector<1x32xf32> to vector<2x32xf32>
    %349 = arith.addf %346, %348 : vector<2x32xf32>
    %c0_175 = arith.constant 0 : index
    %c0_176 = arith.constant 0 : index
    %350 = vector.load %arg25[%c0_175, %c0_176] : memref<32x32xf32, #tpu.memory_space<vmem>>, vector<32x32xf32>
    %351 = arith.truncf %342 : vector<2x32xf32> to vector<2x32xbf16>
    %352 = arith.truncf %350 : vector<32x32xf32> to vector<32x32xbf16>
    %cst_177 = arith.constant dense<0.000000e+00> : vector<2x32xf32>
    %353 = tpu.matmul %351, %352, %cst_177 {dimension_numbers = #tpu.dot_dimension_numbers<[1], [0], [0], [1], [0, 0, 1, 1], [], []>} : vector<2x32xbf16>, vector<32x32xbf16>, vector<2x32xf32> -> vector<2x32xf32>
    %c0_178 = arith.constant 0 : index
    %c0_179 = arith.constant 0 : index
    %354 = vector.load %arg26[%c0_178, %c0_179] : memref<1x32xf32, #tpu.memory_space<vmem>>, vector<1x32xf32>
    %355 = vector.broadcast %354 : vector<1x32xf32> to vector<2x32xf32>
    %356 = arith.addf %353, %355 : vector<2x32xf32>
    %c0_180 = arith.constant 0 : index
    %c0_181 = arith.constant 0 : index
    %357 = vector.load %arg2[%c0_180, %c0_181] : memref<2x32xf32, #tpu.memory_space<vmem>>, vector<2x32xf32>
    %cst_182 = arith.constant 5.000000e-01 : f32
    %358 = vector.broadcast %cst_182 : f32 to vector<2x32xf32>
    %359 = arith.mulf %358, %356 : vector<2x32xf32>
    %360 = math.exp %359 : vector<2x32xf32>
    %361 = arith.mulf %357, %360 : vector<2x32xf32>
    %362 = arith.addf %349, %361 : vector<2x32xf32>
    %363 = arith.addf %362, %0 : vector<2x32xf32>
    %364 = vector.shape_cast %363 : vector<2x32xf32> to vector<2x1x32xf32>
    %c0_183 = arith.constant 0 : index
    %c0_184 = arith.constant 0 : index
    %365 = vector.load %arg27[%c0_183, %c0_184] : memref<16x32xf32, #tpu.memory_space<vmem>>, vector<16x32xf32>
    %366 = vector.shape_cast %365 : vector<16x32xf32> to vector<1x16x32xf32>
    %367 = vector.broadcast %364 : vector<2x1x32xf32> to vector<2x16x32xf32>
    %368 = vector.broadcast %366 : vector<1x16x32xf32> to vector<2x16x32xf32>
    %369 = arith.addf %367, %368 : vector<2x16x32xf32>
    %370 = vector.shape_cast %369 : vector<2x16x32xf32> to vector<32x32xf32>
    %c0_185 = arith.constant 0 : index
    %c0_186 = arith.constant 0 : index
    %371 = vector.load %arg28[%c0_185, %c0_186] : memref<1x32xf32, #tpu.memory_space<vmem>>, vector<1x32xf32>
    %c0_187 = arith.constant 0 : index
    %c0_188 = arith.constant 0 : index
    %372 = vector.load %arg29[%c0_187, %c0_188] : memref<1x32xf32, #tpu.memory_space<vmem>>, vector<1x32xf32>
    %cst_189 = arith.constant dense<0.000000e+00> : vector<32xf32>
    %373 = vector.multi_reduction <add>, %370, %cst_189 [1] : vector<32x32xf32> to vector<32xf32>
    %374 = vector.shape_cast %373 : vector<32xf32> to vector<32x1xf32>
    %cst_190 = arith.constant 3.200000e+01 : f32
    %375 = vector.broadcast %cst_190 : f32 to vector<32x1xf32>
    %376 = arith.divf %374, %375 : vector<32x1xf32>
    %377 = vector.broadcast %376 : vector<32x1xf32> to vector<32x32xf32>
    %378 = arith.subf %370, %377 : vector<32x32xf32>
    %379 = arith.mulf %378, %378 : vector<32x32xf32>
    %cst_191 = arith.constant dense<0.000000e+00> : vector<32xf32>
    %380 = vector.multi_reduction <add>, %379, %cst_191 [1] : vector<32x32xf32> to vector<32xf32>
    %381 = vector.shape_cast %380 : vector<32xf32> to vector<32x1xf32>
    %cst_192 = arith.constant 3.200000e+01 : f32
    %382 = vector.broadcast %cst_192 : f32 to vector<32x1xf32>
    %383 = arith.divf %381, %382 : vector<32x1xf32>
    %384 = vector.broadcast %376 : vector<32x1xf32> to vector<32x32xf32>
    %385 = arith.subf %370, %384 : vector<32x32xf32>
    %cst_193 = arith.constant 9.99999974E-6 : f32
    %386 = vector.broadcast %cst_193 : f32 to vector<32x1xf32>
    %387 = arith.addf %383, %386 : vector<32x1xf32>
    %388 = math.rsqrt %387 : vector<32x1xf32>
    %389 = vector.broadcast %388 : vector<32x1xf32> to vector<32x32xf32>
    %390 = arith.mulf %385, %389 : vector<32x32xf32>
    %391 = vector.broadcast %371 : vector<1x32xf32> to vector<32x32xf32>
    %392 = arith.mulf %390, %391 : vector<32x32xf32>
    %393 = vector.broadcast %372 : vector<1x32xf32> to vector<32x32xf32>
    %394 = arith.addf %392, %393 : vector<32x32xf32>
    %cst_194 = arith.constant 0.000000e+00 : f32
    %395 = vector.broadcast %cst_194 : f32 to vector<32x32xf32>
    %c0_195 = arith.constant 0 : index
    %c0_196 = arith.constant 0 : index
    %c0_197 = arith.constant 0 : index
    %396 = vector.load %arg30[%c0_195, %c0_196, %c0_197] : memref<4x32x8xf32, #tpu.memory_space<vmem>>, vector<1x32x8xf32>
    %397 = vector.shape_cast %396 : vector<1x32x8xf32> to vector<32x8xf32>
    %398 = arith.truncf %394 : vector<32x32xf32> to vector<32x32xbf16>
    %399 = arith.truncf %397 : vector<32x8xf32> to vector<32x8xbf16>
    %cst_198 = arith.constant dense<0.000000e+00> : vector<32x8xf32>
    %400 = tpu.matmul %398, %399, %cst_198 {dimension_numbers = #tpu.dot_dimension_numbers<[1], [0], [0], [1], [0, 0, 1, 1], [], []>} : vector<32x32xbf16>, vector<32x8xbf16>, vector<32x8xf32> -> vector<32x8xf32>
    %c0_199 = arith.constant 0 : index
    %c0_200 = arith.constant 0 : index
    %c0_201 = arith.constant 0 : index
    %401 = vector.load %arg31[%c0_199, %c0_200, %c0_201] : memref<4x1x8xf32, #tpu.memory_space<vmem>>, vector<1x1x8xf32>
    %402 = vector.shape_cast %401 : vector<1x1x8xf32> to vector<1x8xf32>
    %403 = vector.broadcast %402 : vector<1x8xf32> to vector<32x8xf32>
    %404 = arith.addf %400, %403 : vector<32x8xf32>
    %405 = vector.shape_cast %404 : vector<32x8xf32> to vector<2x16x8xf32>
    %c0_202 = arith.constant 0 : index
    %c0_203 = arith.constant 0 : index
    %c0_204 = arith.constant 0 : index
    %406 = vector.load %arg32[%c0_202, %c0_203, %c0_204] : memref<4x32x8xf32, #tpu.memory_space<vmem>>, vector<1x32x8xf32>
    %407 = vector.shape_cast %406 : vector<1x32x8xf32> to vector<32x8xf32>
    %408 = arith.truncf %394 : vector<32x32xf32> to vector<32x32xbf16>
    %409 = arith.truncf %407 : vector<32x8xf32> to vector<32x8xbf16>
    %cst_205 = arith.constant dense<0.000000e+00> : vector<32x8xf32>
    %410 = tpu.matmul %408, %409, %cst_205 {dimension_numbers = #tpu.dot_dimension_numbers<[1], [0], [0], [1], [0, 0, 1, 1], [], []>} : vector<32x32xbf16>, vector<32x8xbf16>, vector<32x8xf32> -> vector<32x8xf32>
    %c0_206 = arith.constant 0 : index
    %c0_207 = arith.constant 0 : index
    %c0_208 = arith.constant 0 : index
    %411 = vector.load %arg33[%c0_206, %c0_207, %c0_208] : memref<4x1x8xf32, #tpu.memory_space<vmem>>, vector<1x1x8xf32>
    %412 = vector.shape_cast %411 : vector<1x1x8xf32> to vector<1x8xf32>
    %413 = vector.broadcast %412 : vector<1x8xf32> to vector<32x8xf32>
    %414 = arith.addf %410, %413 : vector<32x8xf32>
    %415 = vector.shape_cast %414 : vector<32x8xf32> to vector<2x16x8xf32>
    %c0_209 = arith.constant 0 : index
    %c0_210 = arith.constant 0 : index
    %c0_211 = arith.constant 0 : index
    %416 = vector.load %arg34[%c0_209, %c0_210, %c0_211] : memref<4x32x8xf32, #tpu.memory_space<vmem>>, vector<1x32x8xf32>
    %417 = vector.shape_cast %416 : vector<1x32x8xf32> to vector<32x8xf32>
    %418 = arith.truncf %394 : vector<32x32xf32> to vector<32x32xbf16>
    %419 = arith.truncf %417 : vector<32x8xf32> to vector<32x8xbf16>
    %cst_212 = arith.constant dense<0.000000e+00> : vector<32x8xf32>
    %420 = tpu.matmul %418, %419, %cst_212 {dimension_numbers = #tpu.dot_dimension_numbers<[1], [0], [0], [1], [0, 0, 1, 1], [], []>} : vector<32x32xbf16>, vector<32x8xbf16>, vector<32x8xf32> -> vector<32x8xf32>
    %c0_213 = arith.constant 0 : index
    %c0_214 = arith.constant 0 : index
    %c0_215 = arith.constant 0 : index
    %421 = vector.load %arg35[%c0_213, %c0_214, %c0_215] : memref<4x1x8xf32, #tpu.memory_space<vmem>>, vector<1x1x8xf32>
    %422 = vector.shape_cast %421 : vector<1x1x8xf32> to vector<1x8xf32>
    %423 = vector.broadcast %422 : vector<1x8xf32> to vector<32x8xf32>
    %424 = arith.addf %420, %423 : vector<32x8xf32>
    %425 = vector.shape_cast %424 : vector<32x8xf32> to vector<2x16x8xf32>
    %426 = arith.truncf %405 : vector<2x16x8xf32> to vector<2x16x8xbf16>
    %427 = arith.truncf %415 : vector<2x16x8xf32> to vector<2x16x8xbf16>
    "tpu.trace_start"() <{level = 10 : i32, message = "bnd,bmd->bnm"}> : () -> ()
    %cst_216 = arith.constant dense<0.000000e+00> : vector<2x16x16xf32>
    %428 = tpu.matmul %426, %427, %cst_216 {dimension_numbers = #tpu.dot_dimension_numbers<[2], [2], [1], [1], [0, 0, 0, 1, 1, 1], [0], [0]>} : vector<2x16x8xbf16>, vector<2x16x8xbf16>, vector<2x16x16xf32> -> vector<2x16x16xf32>
    "tpu.trace_stop"() : () -> ()
    %cst_217 = arith.constant 0.353553385 : f32
    %429 = vector.broadcast %cst_217 : f32 to vector<2x16x16xf32>
    %430 = arith.mulf %428, %429 : vector<2x16x16xf32>
    %cst_218 = arith.constant dense<0xFF800000> : vector<2x16xf32>
    %431 = vector.multi_reduction <maximumf>, %430, %cst_218 [2] : vector<2x16x16xf32> to vector<2x16xf32>
    %432 = vector.shape_cast %431 : vector<2x16xf32> to vector<2x16x1xf32>
    %433 = vector.broadcast %432 : vector<2x16x1xf32> to vector<2x16x16xf32>
    %434 = arith.subf %430, %433 : vector<2x16x16xf32>
    %435 = math.exp %434 : vector<2x16x16xf32>
    %cst_219 = arith.constant dense<0.000000e+00> : vector<2x16xf32>
    %436 = vector.multi_reduction <add>, %435, %cst_219 [2] : vector<2x16x16xf32> to vector<2x16xf32>
    %437 = vector.shape_cast %436 : vector<2x16xf32> to vector<2x16x1xf32>
    %438 = tpu.reciprocal %437 {approx = true} : vector<2x16x1xf32> -> vector<2x16x1xf32>
    %439 = vector.broadcast %438 : vector<2x16x1xf32> to vector<2x16x16xf32>
    %440 = arith.mulf %435, %439 : vector<2x16x16xf32>
    %441 = arith.truncf %440 : vector<2x16x16xf32> to vector<2x16x16xbf16>
    %442 = arith.truncf %425 : vector<2x16x8xf32> to vector<2x16x8xbf16>
    "tpu.trace_start"() <{level = 10 : i32, message = "bnm,bmd->bnd"}> : () -> ()
    %cst_220 = arith.constant dense<0.000000e+00> : vector<2x16x8xf32>
    %443 = tpu.matmul %441, %442, %cst_220 {dimension_numbers = #tpu.dot_dimension_numbers<[2], [1], [1], [2], [0, 0, 0, 1, 1, 2], [0], [0]>} : vector<2x16x16xbf16>, vector<2x16x8xbf16>, vector<2x16x8xf32> -> vector<2x16x8xf32>
    "tpu.trace_stop"() : () -> ()
    %444 = vector.shape_cast %443 : vector<2x16x8xf32> to vector<32x8xf32>
    %c0_221 = arith.constant 0 : index
    %c0_222 = arith.constant 0 : index
    %c0_223 = arith.constant 0 : index
    %445 = vector.load %arg36[%c0_221, %c0_222, %c0_223] : memref<4x8x32xf32, #tpu.memory_space<vmem>>, vector<1x8x32xf32>
    %446 = vector.shape_cast %445 : vector<1x8x32xf32> to vector<8x32xf32>
    %447 = arith.truncf %444 : vector<32x8xf32> to vector<32x8xbf16>
    %448 = arith.truncf %446 : vector<8x32xf32> to vector<8x32xbf16>
    %cst_224 = arith.constant dense<0.000000e+00> : vector<32x32xf32>
    %449 = tpu.matmul %447, %448, %cst_224 {dimension_numbers = #tpu.dot_dimension_numbers<[1], [0], [0], [1], [0, 0, 1, 1], [], []>} : vector<32x8xbf16>, vector<8x32xbf16>, vector<32x32xf32> -> vector<32x32xf32>
    %450 = arith.addf %395, %449 : vector<32x32xf32>
    %c1_225 = arith.constant 1 : index
    %c0_226 = arith.constant 0 : index
    %c0_227 = arith.constant 0 : index
    %451 = vector.load %arg30[%c1_225, %c0_226, %c0_227] : memref<4x32x8xf32, #tpu.memory_space<vmem>>, vector<1x32x8xf32>
    %452 = vector.shape_cast %451 : vector<1x32x8xf32> to vector<32x8xf32>
    %453 = arith.truncf %394 : vector<32x32xf32> to vector<32x32xbf16>
    %454 = arith.truncf %452 : vector<32x8xf32> to vector<32x8xbf16>
    %cst_228 = arith.constant dense<0.000000e+00> : vector<32x8xf32>
    %455 = tpu.matmul %453, %454, %cst_228 {dimension_numbers = #tpu.dot_dimension_numbers<[1], [0], [0], [1], [0, 0, 1, 1], [], []>} : vector<32x32xbf16>, vector<32x8xbf16>, vector<32x8xf32> -> vector<32x8xf32>
    %c1_229 = arith.constant 1 : index
    %c0_230 = arith.constant 0 : index
    %c0_231 = arith.constant 0 : index
    %456 = vector.load %arg31[%c1_229, %c0_230, %c0_231] : memref<4x1x8xf32, #tpu.memory_space<vmem>>, vector<1x1x8xf32>
    %457 = vector.shape_cast %456 : vector<1x1x8xf32> to vector<1x8xf32>
    %458 = vector.broadcast %457 : vector<1x8xf32> to vector<32x8xf32>
    %459 = arith.addf %455, %458 : vector<32x8xf32>
    %460 = vector.shape_cast %459 : vector<32x8xf32> to vector<2x16x8xf32>
    %c1_232 = arith.constant 1 : index
    %c0_233 = arith.constant 0 : index
    %c0_234 = arith.constant 0 : index
    %461 = vector.load %arg32[%c1_232, %c0_233, %c0_234] : memref<4x32x8xf32, #tpu.memory_space<vmem>>, vector<1x32x8xf32>
    %462 = vector.shape_cast %461 : vector<1x32x8xf32> to vector<32x8xf32>
    %463 = arith.truncf %394 : vector<32x32xf32> to vector<32x32xbf16>
    %464 = arith.truncf %462 : vector<32x8xf32> to vector<32x8xbf16>
    %cst_235 = arith.constant dense<0.000000e+00> : vector<32x8xf32>
    %465 = tpu.matmul %463, %464, %cst_235 {dimension_numbers = #tpu.dot_dimension_numbers<[1], [0], [0], [1], [0, 0, 1, 1], [], []>} : vector<32x32xbf16>, vector<32x8xbf16>, vector<32x8xf32> -> vector<32x8xf32>
    %c1_236 = arith.constant 1 : index
    %c0_237 = arith.constant 0 : index
    %c0_238 = arith.constant 0 : index
    %466 = vector.load %arg33[%c1_236, %c0_237, %c0_238] : memref<4x1x8xf32, #tpu.memory_space<vmem>>, vector<1x1x8xf32>
    %467 = vector.shape_cast %466 : vector<1x1x8xf32> to vector<1x8xf32>
    %468 = vector.broadcast %467 : vector<1x8xf32> to vector<32x8xf32>
    %469 = arith.addf %465, %468 : vector<32x8xf32>
    %470 = vector.shape_cast %469 : vector<32x8xf32> to vector<2x16x8xf32>
    %c1_239 = arith.constant 1 : index
    %c0_240 = arith.constant 0 : index
    %c0_241 = arith.constant 0 : index
    %471 = vector.load %arg34[%c1_239, %c0_240, %c0_241] : memref<4x32x8xf32, #tpu.memory_space<vmem>>, vector<1x32x8xf32>
    %472 = vector.shape_cast %471 : vector<1x32x8xf32> to vector<32x8xf32>
    %473 = arith.truncf %394 : vector<32x32xf32> to vector<32x32xbf16>
    %474 = arith.truncf %472 : vector<32x8xf32> to vector<32x8xbf16>
    %cst_242 = arith.constant dense<0.000000e+00> : vector<32x8xf32>
    %475 = tpu.matmul %473, %474, %cst_242 {dimension_numbers = #tpu.dot_dimension_numbers<[1], [0], [0], [1], [0, 0, 1, 1], [], []>} : vector<32x32xbf16>, vector<32x8xbf16>, vector<32x8xf32> -> vector<32x8xf32>
    %c1_243 = arith.constant 1 : index
    %c0_244 = arith.constant 0 : index
    %c0_245 = arith.constant 0 : index
    %476 = vector.load %arg35[%c1_243, %c0_244, %c0_245] : memref<4x1x8xf32, #tpu.memory_space<vmem>>, vector<1x1x8xf32>
    %477 = vector.shape_cast %476 : vector<1x1x8xf32> to vector<1x8xf32>
    %478 = vector.broadcast %477 : vector<1x8xf32> to vector<32x8xf32>
    %479 = arith.addf %475, %478 : vector<32x8xf32>
    %480 = vector.shape_cast %479 : vector<32x8xf32> to vector<2x16x8xf32>
    %481 = arith.truncf %460 : vector<2x16x8xf32> to vector<2x16x8xbf16>
    %482 = arith.truncf %470 : vector<2x16x8xf32> to vector<2x16x8xbf16>
    "tpu.trace_start"() <{level = 10 : i32, message = "bnd,bmd->bnm"}> : () -> ()
    %cst_246 = arith.constant dense<0.000000e+00> : vector<2x16x16xf32>
    %483 = tpu.matmul %481, %482, %cst_246 {dimension_numbers = #tpu.dot_dimension_numbers<[2], [2], [1], [1], [0, 0, 0, 1, 1, 1], [0], [0]>} : vector<2x16x8xbf16>, vector<2x16x8xbf16>, vector<2x16x16xf32> -> vector<2x16x16xf32>
    "tpu.trace_stop"() : () -> ()
    %cst_247 = arith.constant 0.353553385 : f32
    %484 = vector.broadcast %cst_247 : f32 to vector<2x16x16xf32>
    %485 = arith.mulf %483, %484 : vector<2x16x16xf32>
    %cst_248 = arith.constant dense<0xFF800000> : vector<2x16xf32>
    %486 = vector.multi_reduction <maximumf>, %485, %cst_248 [2] : vector<2x16x16xf32> to vector<2x16xf32>
    %487 = vector.shape_cast %486 : vector<2x16xf32> to vector<2x16x1xf32>
    %488 = vector.broadcast %487 : vector<2x16x1xf32> to vector<2x16x16xf32>
    %489 = arith.subf %485, %488 : vector<2x16x16xf32>
    %490 = math.exp %489 : vector<2x16x16xf32>
    %cst_249 = arith.constant dense<0.000000e+00> : vector<2x16xf32>
    %491 = vector.multi_reduction <add>, %490, %cst_249 [2] : vector<2x16x16xf32> to vector<2x16xf32>
    %492 = vector.shape_cast %491 : vector<2x16xf32> to vector<2x16x1xf32>
    %493 = tpu.reciprocal %492 {approx = true} : vector<2x16x1xf32> -> vector<2x16x1xf32>
    %494 = vector.broadcast %493 : vector<2x16x1xf32> to vector<2x16x16xf32>
    %495 = arith.mulf %490, %494 : vector<2x16x16xf32>
    %496 = arith.truncf %495 : vector<2x16x16xf32> to vector<2x16x16xbf16>
    %497 = arith.truncf %480 : vector<2x16x8xf32> to vector<2x16x8xbf16>
    "tpu.trace_start"() <{level = 10 : i32, message = "bnm,bmd->bnd"}> : () -> ()
    %cst_250 = arith.constant dense<0.000000e+00> : vector<2x16x8xf32>
    %498 = tpu.matmul %496, %497, %cst_250 {dimension_numbers = #tpu.dot_dimension_numbers<[2], [1], [1], [2], [0, 0, 0, 1, 1, 2], [0], [0]>} : vector<2x16x16xbf16>, vector<2x16x8xbf16>, vector<2x16x8xf32> -> vector<2x16x8xf32>
    "tpu.trace_stop"() : () -> ()
    %499 = vector.shape_cast %498 : vector<2x16x8xf32> to vector<32x8xf32>
    %c1_251 = arith.constant 1 : index
    %c0_252 = arith.constant 0 : index
    %c0_253 = arith.constant 0 : index
    %500 = vector.load %arg36[%c1_251, %c0_252, %c0_253] : memref<4x8x32xf32, #tpu.memory_space<vmem>>, vector<1x8x32xf32>
    %501 = vector.shape_cast %500 : vector<1x8x32xf32> to vector<8x32xf32>
    %502 = arith.truncf %499 : vector<32x8xf32> to vector<32x8xbf16>
    %503 = arith.truncf %501 : vector<8x32xf32> to vector<8x32xbf16>
    %cst_254 = arith.constant dense<0.000000e+00> : vector<32x32xf32>
    %504 = tpu.matmul %502, %503, %cst_254 {dimension_numbers = #tpu.dot_dimension_numbers<[1], [0], [0], [1], [0, 0, 1, 1], [], []>} : vector<32x8xbf16>, vector<8x32xbf16>, vector<32x32xf32> -> vector<32x32xf32>
    %505 = arith.addf %450, %504 : vector<32x32xf32>
    %c2_255 = arith.constant 2 : index
    %c0_256 = arith.constant 0 : index
    %c0_257 = arith.constant 0 : index
    %506 = vector.load %arg30[%c2_255, %c0_256, %c0_257] : memref<4x32x8xf32, #tpu.memory_space<vmem>>, vector<1x32x8xf32>
    %507 = vector.shape_cast %506 : vector<1x32x8xf32> to vector<32x8xf32>
    %508 = arith.truncf %394 : vector<32x32xf32> to vector<32x32xbf16>
    %509 = arith.truncf %507 : vector<32x8xf32> to vector<32x8xbf16>
    %cst_258 = arith.constant dense<0.000000e+00> : vector<32x8xf32>
    %510 = tpu.matmul %508, %509, %cst_258 {dimension_numbers = #tpu.dot_dimension_numbers<[1], [0], [0], [1], [0, 0, 1, 1], [], []>} : vector<32x32xbf16>, vector<32x8xbf16>, vector<32x8xf32> -> vector<32x8xf32>
    %c2_259 = arith.constant 2 : index
    %c0_260 = arith.constant 0 : index
    %c0_261 = arith.constant 0 : index
    %511 = vector.load %arg31[%c2_259, %c0_260, %c0_261] : memref<4x1x8xf32, #tpu.memory_space<vmem>>, vector<1x1x8xf32>
    %512 = vector.shape_cast %511 : vector<1x1x8xf32> to vector<1x8xf32>
    %513 = vector.broadcast %512 : vector<1x8xf32> to vector<32x8xf32>
    %514 = arith.addf %510, %513 : vector<32x8xf32>
    %515 = vector.shape_cast %514 : vector<32x8xf32> to vector<2x16x8xf32>
    %c2_262 = arith.constant 2 : index
    %c0_263 = arith.constant 0 : index
    %c0_264 = arith.constant 0 : index
    %516 = vector.load %arg32[%c2_262, %c0_263, %c0_264] : memref<4x32x8xf32, #tpu.memory_space<vmem>>, vector<1x32x8xf32>
    %517 = vector.shape_cast %516 : vector<1x32x8xf32> to vector<32x8xf32>
    %518 = arith.truncf %394 : vector<32x32xf32> to vector<32x32xbf16>
    %519 = arith.truncf %517 : vector<32x8xf32> to vector<32x8xbf16>
    %cst_265 = arith.constant dense<0.000000e+00> : vector<32x8xf32>
    %520 = tpu.matmul %518, %519, %cst_265 {dimension_numbers = #tpu.dot_dimension_numbers<[1], [0], [0], [1], [0, 0, 1, 1], [], []>} : vector<32x32xbf16>, vector<32x8xbf16>, vector<32x8xf32> -> vector<32x8xf32>
    %c2_266 = arith.constant 2 : index
    %c0_267 = arith.constant 0 : index
    %c0_268 = arith.constant 0 : index
    %521 = vector.load %arg33[%c2_266, %c0_267, %c0_268] : memref<4x1x8xf32, #tpu.memory_space<vmem>>, vector<1x1x8xf32>
    %522 = vector.shape_cast %521 : vector<1x1x8xf32> to vector<1x8xf32>
    %523 = vector.broadcast %522 : vector<1x8xf32> to vector<32x8xf32>
    %524 = arith.addf %520, %523 : vector<32x8xf32>
    %525 = vector.shape_cast %524 : vector<32x8xf32> to vector<2x16x8xf32>
    %c2_269 = arith.constant 2 : index
    %c0_270 = arith.constant 0 : index
    %c0_271 = arith.constant 0 : index
    %526 = vector.load %arg34[%c2_269, %c0_270, %c0_271] : memref<4x32x8xf32, #tpu.memory_space<vmem>>, vector<1x32x8xf32>
    %527 = vector.shape_cast %526 : vector<1x32x8xf32> to vector<32x8xf32>
    %528 = arith.truncf %394 : vector<32x32xf32> to vector<32x32xbf16>
    %529 = arith.truncf %527 : vector<32x8xf32> to vector<32x8xbf16>
    %cst_272 = arith.constant dense<0.000000e+00> : vector<32x8xf32>
    %530 = tpu.matmul %528, %529, %cst_272 {dimension_numbers = #tpu.dot_dimension_numbers<[1], [0], [0], [1], [0, 0, 1, 1], [], []>} : vector<32x32xbf16>, vector<32x8xbf16>, vector<32x8xf32> -> vector<32x8xf32>
    %c2_273 = arith.constant 2 : index
    %c0_274 = arith.constant 0 : index
    %c0_275 = arith.constant 0 : index
    %531 = vector.load %arg35[%c2_273, %c0_274, %c0_275] : memref<4x1x8xf32, #tpu.memory_space<vmem>>, vector<1x1x8xf32>
    %532 = vector.shape_cast %531 : vector<1x1x8xf32> to vector<1x8xf32>
    %533 = vector.broadcast %532 : vector<1x8xf32> to vector<32x8xf32>
    %534 = arith.addf %530, %533 : vector<32x8xf32>
    %535 = vector.shape_cast %534 : vector<32x8xf32> to vector<2x16x8xf32>
    %536 = arith.truncf %515 : vector<2x16x8xf32> to vector<2x16x8xbf16>
    %537 = arith.truncf %525 : vector<2x16x8xf32> to vector<2x16x8xbf16>
    "tpu.trace_start"() <{level = 10 : i32, message = "bnd,bmd->bnm"}> : () -> ()
    %cst_276 = arith.constant dense<0.000000e+00> : vector<2x16x16xf32>
    %538 = tpu.matmul %536, %537, %cst_276 {dimension_numbers = #tpu.dot_dimension_numbers<[2], [2], [1], [1], [0, 0, 0, 1, 1, 1], [0], [0]>} : vector<2x16x8xbf16>, vector<2x16x8xbf16>, vector<2x16x16xf32> -> vector<2x16x16xf32>
    "tpu.trace_stop"() : () -> ()
    %cst_277 = arith.constant 0.353553385 : f32
    %539 = vector.broadcast %cst_277 : f32 to vector<2x16x16xf32>
    %540 = arith.mulf %538, %539 : vector<2x16x16xf32>
    %cst_278 = arith.constant dense<0xFF800000> : vector<2x16xf32>
    %541 = vector.multi_reduction <maximumf>, %540, %cst_278 [2] : vector<2x16x16xf32> to vector<2x16xf32>
    %542 = vector.shape_cast %541 : vector<2x16xf32> to vector<2x16x1xf32>
    %543 = vector.broadcast %542 : vector<2x16x1xf32> to vector<2x16x16xf32>
    %544 = arith.subf %540, %543 : vector<2x16x16xf32>
    %545 = math.exp %544 : vector<2x16x16xf32>
    %cst_279 = arith.constant dense<0.000000e+00> : vector<2x16xf32>
    %546 = vector.multi_reduction <add>, %545, %cst_279 [2] : vector<2x16x16xf32> to vector<2x16xf32>
    %547 = vector.shape_cast %546 : vector<2x16xf32> to vector<2x16x1xf32>
    %548 = tpu.reciprocal %547 {approx = true} : vector<2x16x1xf32> -> vector<2x16x1xf32>
    %549 = vector.broadcast %548 : vector<2x16x1xf32> to vector<2x16x16xf32>
    %550 = arith.mulf %545, %549 : vector<2x16x16xf32>
    %551 = arith.truncf %550 : vector<2x16x16xf32> to vector<2x16x16xbf16>
    %552 = arith.truncf %535 : vector<2x16x8xf32> to vector<2x16x8xbf16>
    "tpu.trace_start"() <{level = 10 : i32, message = "bnm,bmd->bnd"}> : () -> ()
    %cst_280 = arith.constant dense<0.000000e+00> : vector<2x16x8xf32>
    %553 = tpu.matmul %551, %552, %cst_280 {dimension_numbers = #tpu.dot_dimension_numbers<[2], [1], [1], [2], [0, 0, 0, 1, 1, 2], [0], [0]>} : vector<2x16x16xbf16>, vector<2x16x8xbf16>, vector<2x16x8xf32> -> vector<2x16x8xf32>
    "tpu.trace_stop"() : () -> ()
    %554 = vector.shape_cast %553 : vector<2x16x8xf32> to vector<32x8xf32>
    %c2_281 = arith.constant 2 : index
    %c0_282 = arith.constant 0 : index
    %c0_283 = arith.constant 0 : index
    %555 = vector.load %arg36[%c2_281, %c0_282, %c0_283] : memref<4x8x32xf32, #tpu.memory_space<vmem>>, vector<1x8x32xf32>
    %556 = vector.shape_cast %555 : vector<1x8x32xf32> to vector<8x32xf32>
    %557 = arith.truncf %554 : vector<32x8xf32> to vector<32x8xbf16>
    %558 = arith.truncf %556 : vector<8x32xf32> to vector<8x32xbf16>
    %cst_284 = arith.constant dense<0.000000e+00> : vector<32x32xf32>
    %559 = tpu.matmul %557, %558, %cst_284 {dimension_numbers = #tpu.dot_dimension_numbers<[1], [0], [0], [1], [0, 0, 1, 1], [], []>} : vector<32x8xbf16>, vector<8x32xbf16>, vector<32x32xf32> -> vector<32x32xf32>
    %560 = arith.addf %505, %559 : vector<32x32xf32>
    %c3_285 = arith.constant 3 : index
    %c0_286 = arith.constant 0 : index
    %c0_287 = arith.constant 0 : index
    %561 = vector.load %arg30[%c3_285, %c0_286, %c0_287] : memref<4x32x8xf32, #tpu.memory_space<vmem>>, vector<1x32x8xf32>
    %562 = vector.shape_cast %561 : vector<1x32x8xf32> to vector<32x8xf32>
    %563 = arith.truncf %394 : vector<32x32xf32> to vector<32x32xbf16>
    %564 = arith.truncf %562 : vector<32x8xf32> to vector<32x8xbf16>
    %cst_288 = arith.constant dense<0.000000e+00> : vector<32x8xf32>
    %565 = tpu.matmul %563, %564, %cst_288 {dimension_numbers = #tpu.dot_dimension_numbers<[1], [0], [0], [1], [0, 0, 1, 1], [], []>} : vector<32x32xbf16>, vector<32x8xbf16>, vector<32x8xf32> -> vector<32x8xf32>
    %c3_289 = arith.constant 3 : index
    %c0_290 = arith.constant 0 : index
    %c0_291 = arith.constant 0 : index
    %566 = vector.load %arg31[%c3_289, %c0_290, %c0_291] : memref<4x1x8xf32, #tpu.memory_space<vmem>>, vector<1x1x8xf32>
    %567 = vector.shape_cast %566 : vector<1x1x8xf32> to vector<1x8xf32>
    %568 = vector.broadcast %567 : vector<1x8xf32> to vector<32x8xf32>
    %569 = arith.addf %565, %568 : vector<32x8xf32>
    %570 = vector.shape_cast %569 : vector<32x8xf32> to vector<2x16x8xf32>
    %c3_292 = arith.constant 3 : index
    %c0_293 = arith.constant 0 : index
    %c0_294 = arith.constant 0 : index
    %571 = vector.load %arg32[%c3_292, %c0_293, %c0_294] : memref<4x32x8xf32, #tpu.memory_space<vmem>>, vector<1x32x8xf32>
    %572 = vector.shape_cast %571 : vector<1x32x8xf32> to vector<32x8xf32>
    %573 = arith.truncf %394 : vector<32x32xf32> to vector<32x32xbf16>
    %574 = arith.truncf %572 : vector<32x8xf32> to vector<32x8xbf16>
    %cst_295 = arith.constant dense<0.000000e+00> : vector<32x8xf32>
    %575 = tpu.matmul %573, %574, %cst_295 {dimension_numbers = #tpu.dot_dimension_numbers<[1], [0], [0], [1], [0, 0, 1, 1], [], []>} : vector<32x32xbf16>, vector<32x8xbf16>, vector<32x8xf32> -> vector<32x8xf32>
    %c3_296 = arith.constant 3 : index
    %c0_297 = arith.constant 0 : index
    %c0_298 = arith.constant 0 : index
    %576 = vector.load %arg33[%c3_296, %c0_297, %c0_298] : memref<4x1x8xf32, #tpu.memory_space<vmem>>, vector<1x1x8xf32>
    %577 = vector.shape_cast %576 : vector<1x1x8xf32> to vector<1x8xf32>
    %578 = vector.broadcast %577 : vector<1x8xf32> to vector<32x8xf32>
    %579 = arith.addf %575, %578 : vector<32x8xf32>
    %580 = vector.shape_cast %579 : vector<32x8xf32> to vector<2x16x8xf32>
    %c3_299 = arith.constant 3 : index
    %c0_300 = arith.constant 0 : index
    %c0_301 = arith.constant 0 : index
    %581 = vector.load %arg34[%c3_299, %c0_300, %c0_301] : memref<4x32x8xf32, #tpu.memory_space<vmem>>, vector<1x32x8xf32>
    %582 = vector.shape_cast %581 : vector<1x32x8xf32> to vector<32x8xf32>
    %583 = arith.truncf %394 : vector<32x32xf32> to vector<32x32xbf16>
    %584 = arith.truncf %582 : vector<32x8xf32> to vector<32x8xbf16>
    %cst_302 = arith.constant dense<0.000000e+00> : vector<32x8xf32>
    %585 = tpu.matmul %583, %584, %cst_302 {dimension_numbers = #tpu.dot_dimension_numbers<[1], [0], [0], [1], [0, 0, 1, 1], [], []>} : vector<32x32xbf16>, vector<32x8xbf16>, vector<32x8xf32> -> vector<32x8xf32>
    %c3_303 = arith.constant 3 : index
    %c0_304 = arith.constant 0 : index
    %c0_305 = arith.constant 0 : index
    %586 = vector.load %arg35[%c3_303, %c0_304, %c0_305] : memref<4x1x8xf32, #tpu.memory_space<vmem>>, vector<1x1x8xf32>
    %587 = vector.shape_cast %586 : vector<1x1x8xf32> to vector<1x8xf32>
    %588 = vector.broadcast %587 : vector<1x8xf32> to vector<32x8xf32>
    %589 = arith.addf %585, %588 : vector<32x8xf32>
    %590 = vector.shape_cast %589 : vector<32x8xf32> to vector<2x16x8xf32>
    %591 = arith.truncf %570 : vector<2x16x8xf32> to vector<2x16x8xbf16>
    %592 = arith.truncf %580 : vector<2x16x8xf32> to vector<2x16x8xbf16>
    "tpu.trace_start"() <{level = 10 : i32, message = "bnd,bmd->bnm"}> : () -> ()
    %cst_306 = arith.constant dense<0.000000e+00> : vector<2x16x16xf32>
    %593 = tpu.matmul %591, %592, %cst_306 {dimension_numbers = #tpu.dot_dimension_numbers<[2], [2], [1], [1], [0, 0, 0, 1, 1, 1], [0], [0]>} : vector<2x16x8xbf16>, vector<2x16x8xbf16>, vector<2x16x16xf32> -> vector<2x16x16xf32>
    "tpu.trace_stop"() : () -> ()
    %cst_307 = arith.constant 0.353553385 : f32
    %594 = vector.broadcast %cst_307 : f32 to vector<2x16x16xf32>
    %595 = arith.mulf %593, %594 : vector<2x16x16xf32>
    %cst_308 = arith.constant dense<0xFF800000> : vector<2x16xf32>
    %596 = vector.multi_reduction <maximumf>, %595, %cst_308 [2] : vector<2x16x16xf32> to vector<2x16xf32>
    %597 = vector.shape_cast %596 : vector<2x16xf32> to vector<2x16x1xf32>
    %598 = vector.broadcast %597 : vector<2x16x1xf32> to vector<2x16x16xf32>
    %599 = arith.subf %595, %598 : vector<2x16x16xf32>
    %600 = math.exp %599 : vector<2x16x16xf32>
    %cst_309 = arith.constant dense<0.000000e+00> : vector<2x16xf32>
    %601 = vector.multi_reduction <add>, %600, %cst_309 [2] : vector<2x16x16xf32> to vector<2x16xf32>
    %602 = vector.shape_cast %601 : vector<2x16xf32> to vector<2x16x1xf32>
    %603 = tpu.reciprocal %602 {approx = true} : vector<2x16x1xf32> -> vector<2x16x1xf32>
    %604 = vector.broadcast %603 : vector<2x16x1xf32> to vector<2x16x16xf32>
    %605 = arith.mulf %600, %604 : vector<2x16x16xf32>
    %606 = arith.truncf %605 : vector<2x16x16xf32> to vector<2x16x16xbf16>
    %607 = arith.truncf %590 : vector<2x16x8xf32> to vector<2x16x8xbf16>
    "tpu.trace_start"() <{level = 10 : i32, message = "bnm,bmd->bnd"}> : () -> ()
    %cst_310 = arith.constant dense<0.000000e+00> : vector<2x16x8xf32>
    %608 = tpu.matmul %606, %607, %cst_310 {dimension_numbers = #tpu.dot_dimension_numbers<[2], [1], [1], [2], [0, 0, 0, 1, 1, 2], [0], [0]>} : vector<2x16x16xbf16>, vector<2x16x8xbf16>, vector<2x16x8xf32> -> vector<2x16x8xf32>
    "tpu.trace_stop"() : () -> ()
    %609 = vector.shape_cast %608 : vector<2x16x8xf32> to vector<32x8xf32>
    %c3_311 = arith.constant 3 : index
    %c0_312 = arith.constant 0 : index
    %c0_313 = arith.constant 0 : index
    %610 = vector.load %arg36[%c3_311, %c0_312, %c0_313] : memref<4x8x32xf32, #tpu.memory_space<vmem>>, vector<1x8x32xf32>
    %611 = vector.shape_cast %610 : vector<1x8x32xf32> to vector<8x32xf32>
    %612 = arith.truncf %609 : vector<32x8xf32> to vector<32x8xbf16>
    %613 = arith.truncf %611 : vector<8x32xf32> to vector<8x32xbf16>
    %cst_314 = arith.constant dense<0.000000e+00> : vector<32x32xf32>
    %614 = tpu.matmul %612, %613, %cst_314 {dimension_numbers = #tpu.dot_dimension_numbers<[1], [0], [0], [1], [0, 0, 1, 1], [], []>} : vector<32x8xbf16>, vector<8x32xbf16>, vector<32x32xf32> -> vector<32x32xf32>
    %615 = arith.addf %560, %614 : vector<32x32xf32>
    %616 = arith.addf %370, %615 : vector<32x32xf32>
    %c0_315 = arith.constant 0 : index
    %c0_316 = arith.constant 0 : index
    %617 = vector.load %arg37[%c0_315, %c0_316] : memref<1x32xf32, #tpu.memory_space<vmem>>, vector<1x32xf32>
    %618 = vector.broadcast %617 : vector<1x32xf32> to vector<32x32xf32>
    %619 = arith.addf %616, %618 : vector<32x32xf32>
    %c0_317 = arith.constant 0 : index
    %c0_318 = arith.constant 0 : index
    %620 = vector.load %arg38[%c0_317, %c0_318] : memref<1x32xf32, #tpu.memory_space<vmem>>, vector<1x32xf32>
    %c0_319 = arith.constant 0 : index
    %c0_320 = arith.constant 0 : index
    %621 = vector.load %arg39[%c0_319, %c0_320] : memref<1x32xf32, #tpu.memory_space<vmem>>, vector<1x32xf32>
    %cst_321 = arith.constant dense<0.000000e+00> : vector<32xf32>
    %622 = vector.multi_reduction <add>, %619, %cst_321 [1] : vector<32x32xf32> to vector<32xf32>
    %623 = vector.shape_cast %622 : vector<32xf32> to vector<32x1xf32>
    %cst_322 = arith.constant 3.200000e+01 : f32
    %624 = vector.broadcast %cst_322 : f32 to vector<32x1xf32>
    %625 = arith.divf %623, %624 : vector<32x1xf32>
    %626 = vector.broadcast %625 : vector<32x1xf32> to vector<32x32xf32>
    %627 = arith.subf %619, %626 : vector<32x32xf32>
    %628 = arith.mulf %627, %627 : vector<32x32xf32>
    %cst_323 = arith.constant dense<0.000000e+00> : vector<32xf32>
    %629 = vector.multi_reduction <add>, %628, %cst_323 [1] : vector<32x32xf32> to vector<32xf32>
    %630 = vector.shape_cast %629 : vector<32xf32> to vector<32x1xf32>
    %cst_324 = arith.constant 3.200000e+01 : f32
    %631 = vector.broadcast %cst_324 : f32 to vector<32x1xf32>
    %632 = arith.divf %630, %631 : vector<32x1xf32>
    %633 = vector.broadcast %625 : vector<32x1xf32> to vector<32x32xf32>
    %634 = arith.subf %619, %633 : vector<32x32xf32>
    %cst_325 = arith.constant 9.99999974E-6 : f32
    %635 = vector.broadcast %cst_325 : f32 to vector<32x1xf32>
    %636 = arith.addf %632, %635 : vector<32x1xf32>
    %637 = math.rsqrt %636 : vector<32x1xf32>
    %638 = vector.broadcast %637 : vector<32x1xf32> to vector<32x32xf32>
    %639 = arith.mulf %634, %638 : vector<32x32xf32>
    %640 = vector.broadcast %620 : vector<1x32xf32> to vector<32x32xf32>
    %641 = arith.mulf %639, %640 : vector<32x32xf32>
    %642 = vector.broadcast %621 : vector<1x32xf32> to vector<32x32xf32>
    %643 = arith.addf %641, %642 : vector<32x32xf32>
    %c0_326 = arith.constant 0 : index
    %c0_327 = arith.constant 0 : index
    %644 = vector.load %arg40[%c0_326, %c0_327] : memref<32x64xf32, #tpu.memory_space<vmem>>, vector<32x64xf32>
    %645 = arith.truncf %643 : vector<32x32xf32> to vector<32x32xbf16>
    %646 = arith.truncf %644 : vector<32x64xf32> to vector<32x64xbf16>
    %cst_328 = arith.constant dense<0.000000e+00> : vector<32x64xf32>
    %647 = tpu.matmul %645, %646, %cst_328 {dimension_numbers = #tpu.dot_dimension_numbers<[1], [0], [0], [1], [0, 0, 1, 1], [], []>} : vector<32x32xbf16>, vector<32x64xbf16>, vector<32x64xf32> -> vector<32x64xf32>
    %c0_329 = arith.constant 0 : index
    %c0_330 = arith.constant 0 : index
    %648 = vector.load %arg41[%c0_329, %c0_330] : memref<1x64xf32, #tpu.memory_space<vmem>>, vector<1x64xf32>
    %649 = vector.broadcast %648 : vector<1x64xf32> to vector<32x64xf32>
    %650 = arith.addf %647, %649 : vector<32x64xf32>
    %651 = arith.mulf %650, %650 : vector<32x64xf32>
    %652 = arith.mulf %650, %651 : vector<32x64xf32>
    %cst_331 = arith.constant 4.471500e-02 : f32
    %653 = vector.broadcast %cst_331 : f32 to vector<32x64xf32>
    %654 = arith.mulf %653, %652 : vector<32x64xf32>
    %655 = arith.addf %650, %654 : vector<32x64xf32>
    %cst_332 = arith.constant 0.797884583 : f32
    %656 = vector.broadcast %cst_332 : f32 to vector<32x64xf32>
    %657 = arith.mulf %656, %655 : vector<32x64xf32>
    %658 = math.tanh %657 : vector<32x64xf32>
    %cst_333 = arith.constant 1.000000e+00 : f32
    %659 = vector.broadcast %cst_333 : f32 to vector<32x64xf32>
    %660 = arith.addf %659, %658 : vector<32x64xf32>
    %cst_334 = arith.constant 5.000000e-01 : f32
    %661 = vector.broadcast %cst_334 : f32 to vector<32x64xf32>
    %662 = arith.mulf %661, %660 : vector<32x64xf32>
    %663 = arith.mulf %650, %662 : vector<32x64xf32>
    %c0_335 = arith.constant 0 : index
    %c0_336 = arith.constant 0 : index
    %664 = vector.load %arg42[%c0_335, %c0_336] : memref<64x32xf32, #tpu.memory_space<vmem>>, vector<64x32xf32>
    %665 = arith.truncf %663 : vector<32x64xf32> to vector<32x64xbf16>
    %666 = arith.truncf %664 : vector<64x32xf32> to vector<64x32xbf16>
    %cst_337 = arith.constant dense<0.000000e+00> : vector<32x32xf32>
    %667 = tpu.matmul %665, %666, %cst_337 {dimension_numbers = #tpu.dot_dimension_numbers<[1], [0], [0], [1], [0, 0, 1, 1], [], []>} : vector<32x64xbf16>, vector<64x32xbf16>, vector<32x32xf32> -> vector<32x32xf32>
    %668 = arith.addf %619, %667 : vector<32x32xf32>
    %c0_338 = arith.constant 0 : index
    %c0_339 = arith.constant 0 : index
    %669 = vector.load %arg43[%c0_338, %c0_339] : memref<1x32xf32, #tpu.memory_space<vmem>>, vector<1x32xf32>
    %670 = vector.broadcast %669 : vector<1x32xf32> to vector<32x32xf32>
    %671 = arith.addf %668, %670 : vector<32x32xf32>
    %c0_340 = arith.constant 0 : index
    %c0_341 = arith.constant 0 : index
    %672 = vector.load %arg44[%c0_340, %c0_341] : memref<1x32xf32, #tpu.memory_space<vmem>>, vector<1x32xf32>
    %c0_342 = arith.constant 0 : index
    %c0_343 = arith.constant 0 : index
    %673 = vector.load %arg45[%c0_342, %c0_343] : memref<1x32xf32, #tpu.memory_space<vmem>>, vector<1x32xf32>
    %cst_344 = arith.constant dense<0.000000e+00> : vector<32xf32>
    %674 = vector.multi_reduction <add>, %671, %cst_344 [1] : vector<32x32xf32> to vector<32xf32>
    %675 = vector.shape_cast %674 : vector<32xf32> to vector<32x1xf32>
    %cst_345 = arith.constant 3.200000e+01 : f32
    %676 = vector.broadcast %cst_345 : f32 to vector<32x1xf32>
    %677 = arith.divf %675, %676 : vector<32x1xf32>
    %678 = vector.broadcast %677 : vector<32x1xf32> to vector<32x32xf32>
    %679 = arith.subf %671, %678 : vector<32x32xf32>
    %680 = arith.mulf %679, %679 : vector<32x32xf32>
    %cst_346 = arith.constant dense<0.000000e+00> : vector<32xf32>
    %681 = vector.multi_reduction <add>, %680, %cst_346 [1] : vector<32x32xf32> to vector<32xf32>
    %682 = vector.shape_cast %681 : vector<32xf32> to vector<32x1xf32>
    %cst_347 = arith.constant 3.200000e+01 : f32
    %683 = vector.broadcast %cst_347 : f32 to vector<32x1xf32>
    %684 = arith.divf %682, %683 : vector<32x1xf32>
    %685 = vector.broadcast %677 : vector<32x1xf32> to vector<32x32xf32>
    %686 = arith.subf %671, %685 : vector<32x32xf32>
    %cst_348 = arith.constant 9.99999974E-6 : f32
    %687 = vector.broadcast %cst_348 : f32 to vector<32x1xf32>
    %688 = arith.addf %684, %687 : vector<32x1xf32>
    %689 = math.rsqrt %688 : vector<32x1xf32>
    %690 = vector.broadcast %689 : vector<32x1xf32> to vector<32x32xf32>
    %691 = arith.mulf %686, %690 : vector<32x32xf32>
    %692 = vector.broadcast %672 : vector<1x32xf32> to vector<32x32xf32>
    %693 = arith.mulf %691, %692 : vector<32x32xf32>
    %694 = vector.broadcast %673 : vector<1x32xf32> to vector<32x32xf32>
    %695 = arith.addf %693, %694 : vector<32x32xf32>
    %c0_349 = arith.constant 0 : index
    %c0_350 = arith.constant 0 : index
    %696 = vector.load %arg46[%c0_349, %c0_350] : memref<32x16xf32, #tpu.memory_space<vmem>>, vector<32x16xf32>
    %697 = arith.truncf %695 : vector<32x32xf32> to vector<32x32xbf16>
    %698 = arith.truncf %696 : vector<32x16xf32> to vector<32x16xbf16>
    %cst_351 = arith.constant dense<0.000000e+00> : vector<32x16xf32>
    %699 = tpu.matmul %697, %698, %cst_351 {dimension_numbers = #tpu.dot_dimension_numbers<[1], [0], [0], [1], [0, 0, 1, 1], [], []>} : vector<32x32xbf16>, vector<32x16xbf16>, vector<32x16xf32> -> vector<32x16xf32>
    %c0_352 = arith.constant 0 : index
    %c0_353 = arith.constant 0 : index
    %700 = vector.load %arg47[%c0_352, %c0_353] : memref<1x16xf32, #tpu.memory_space<vmem>>, vector<1x16xf32>
    %701 = vector.broadcast %700 : vector<1x16xf32> to vector<32x16xf32>
    %702 = arith.addf %699, %701 : vector<32x16xf32>
    %703 = arith.negf %702 : vector<32x16xf32>
    %704 = math.exp %703 : vector<32x16xf32>
    %cst_354 = arith.constant 1.000000e+00 : f32
    %705 = vector.broadcast %cst_354 : f32 to vector<32x16xf32>
    %706 = arith.addf %705, %704 : vector<32x16xf32>
    %707 = arith.divf %705, %706 : vector<32x16xf32>
    %708 = vector.shape_cast %707 : vector<32x16xf32> to vector<2x16x16xf32>
    %c0_355 = arith.constant 0 : index
    %c0_356 = arith.constant 0 : index
    %c0_357 = arith.constant 0 : index
    %709 = vector.load %arg48[%c0_355, %c0_356, %c0_357] : memref<2x16x16xf32, #tpu.memory_space<vmem>>, vector<2x16x16xf32>
    tpu.vector_store %arg48[%c0_355, %c0_356, %c0_357], %708 {strides = array<i32>} : memref<2x16x16xf32, #tpu.memory_space<vmem>>, vector<2x16x16xf32>,
    %c0_358 = arith.constant 0 : index
    %c0_359 = arith.constant 0 : index
    %710 = vector.load %arg49[%c0_358, %c0_359] : memref<2x32xf32, #tpu.memory_space<vmem>>, vector<2x32xf32>
    tpu.vector_store %arg49[%c0_358, %c0_359], %349 {strides = array<i32>} : memref<2x32xf32, #tpu.memory_space<vmem>>, vector<2x32xf32>,
    %c0_360 = arith.constant 0 : index
    %c0_361 = arith.constant 0 : index
    %711 = vector.load %arg50[%c0_360, %c0_361] : memref<2x32xf32, #tpu.memory_space<vmem>>, vector<2x32xf32>
    tpu.vector_store %arg50[%c0_360, %c0_361], %356 {strides = array<i32>} : memref<2x32xf32, #tpu.memory_space<vmem>>, vector<2x32xf32>,
    return
  }
}

</mosaic_0001>

<bundles_post_ra>
// kernel: forward.1
= control target key start
LH: loop header
LB: loop body
LE: loop exit
PB: predicated region body
PF: predicated region fallthrough
CT: control target
= control target key end

     0   :  { %s6799_s6 = smov 1   ;;  %s6800_s10 = smov 2   ;;  %s7970_s0 = inlined_call_operand.smem [shape: u32[51], index: -1, kind: input, shape index: {}] }
   0x1   :  { %s6862_s5 = sld [smem:[%s7970_s0]]   ;;  %s6801_s14 = smov 3  }
   0x2   :  { %s6867_s9 = sld [smem:[%s7970_s0 + %s6799_s6]]   ;;  %s6802_s18 = smov 4  }
   0x3   :  { %s6872_s13 = sld [smem:[%s7970_s0 + %s6800_s10]]   ;;  %s6803_s22 = smov 5  }
   0x4   :  { %s6877_s17 = sld [smem:[%s7970_s0 + %s6801_s14]]   ;;  %s6804_s26 = smov 6  }
   0x5   :  { %s6882_s21 = sld [smem:[%s7970_s0 + %s6802_s18]]   ;;  %s6805_s30 = smov 7  }
   0x6   :  { %s6887_s25 = sld [smem:[%s7970_s0 + %s6803_s22]]   ;;  %s6806_s4 = smov 8  }
   0x7   :  { %s6892_s29 = sld [smem:[%s7970_s0 + %s6804_s26]]   ;;  %s6807_s10 = smov 9  }
   0x8   :  { %s6897_s3 = sld [smem:[%s7970_s0 + %s6805_s30]]   ;;  %s6808_s15 = smov 10  }
   0x9   :  { %7986 = sst [smem:[#allocation8_spill]] %s6872_s13  ;;  %s6809_s20 = smov 11  }
   0xa   :  { %s6902_s8 = sld [smem:[%s7970_s0 + %s6806_s4]]   ;;  %s6810_s26 = smov 12  }
   0xb   :  { %s6907_s14 = sld [smem:[%s7970_s0 + %s6807_s10]]   ;;  %s6811_s1 = smov 13  }
   0xc   :  { %s6912_s19 = sld [smem:[%s7970_s0 + %s6808_s15]]   ;;  %s6812_s7 = smov 14  }
   0xd   :  { %s6917_s24 = sld [smem:[%s7970_s0 + %s6809_s20]]   ;;  %s6813_s15 = smov 15  }
   0xe   :  { %s6922_s30 = sld [smem:[%s7970_s0 + %s6810_s26]]   ;;  %s6814_s22 = smov 16  }
   0xf   :  { %s6927_s6 = sld [smem:[%s7970_s0 + %s6811_s1]]   ;;  %s6815_s28 = smov 17  }
  0x10   :  { %s6932_s12 = sld [smem:[%s7970_s0 + %s6812_s7]]   ;;  %s6816_s7 = smov 18  }
  0x11   :  { %s6937_s20 = sld [smem:[%s7970_s0 + %s6813_s15]]   ;;  %s6817_s15 = smov 19  }
  0x12   :  { %s6942_s27 = sld [smem:[%s7970_s0 + %s6814_s22]]   ;;  %s6818_s22 = smov 20  }
  0x13   :  { %s6947_s4 = sld [smem:[%s7970_s0 + %s6815_s28]]   ;;  %s6819_s28 = smov 21  }
  0x14   :  { %s6952_s13 = sld [smem:[%s7970_s0 + %s6816_s7]]   ;;  %s6820_s7 = smov 22  }
  0x17   :  { %7987 = sst [smem:[#allocation9_spill]] %s6937_s20 }
  0x18   :  { %7988 = sst [smem:[#allocation10_spill]] %s6942_s27 }
  0x19   :  { %7989 = sst [smem:[#allocation11_spill]] %s6947_s4 }
  0x1a   :  { %7990 = sst [smem:[#allocation12_spill]] %s6952_s13 }
  0x1b   :  { %s6957_s20 = sld [smem:[%s7970_s0 + %s6817_s15]]   ;;  %s6821_s15 = smov 23  }
  0x1c   :  { %s6962_s27 = sld [smem:[%s7970_s0 + %s6818_s22]]   ;;  %s6822_s22 = smov 24  }
  0x1d   :  { %s6967_s4 = sld [smem:[%s7970_s0 + %s6819_s28]]   ;;  %s6823_s28 = smov 25  }
  0x1e   :  { %s6972_s13 = sld [smem:[%s7970_s0 + %s6820_s7]]   ;;  %s6824_s7 = smov 26  }
  0x21   :  { %7991 = sst [smem:[#allocation13_spill]] %s6957_s20 }
  0x22   :  { %7992 = sst [smem:[#allocation14_spill]] %s6962_s27 }
  0x23   :  { %7993 = sst [smem:[#allocation15_spill]] %s6967_s4 }
  0x24   :  { %7994 = sst [smem:[#allocation16_spill]] %s6972_s13 }
  0x25   :  { %s6977_s20 = sld [smem:[%s7970_s0 + %s6821_s15]]   ;;  %s6825_s15 = smov 27  }
  0x26   :  { %s6982_s27 = sld [smem:[%s7970_s0 + %s6822_s22]]   ;;  %s6826_s22 = smov 28  }
  0x27   :  { %s6987_s4 = sld [smem:[%s7970_s0 + %s6823_s28]]   ;;  %s6827_s28 = smov 29  }
  0x28   :  { %s6992_s13 = sld [smem:[%s7970_s0 + %s6824_s7]]   ;;  %s6828_s7 = smov 30  }
  0x2b   :  { %7995 = sst [smem:[#allocation17_spill]] %s6977_s20 }
  0x2c   :  { %7996 = sst [smem:[#allocation18_spill]] %s6982_s27 }
  0x2d   :  { %7997 = sst [smem:[#allocation19_spill]] %s6987_s4 }
  0x2e   :  { %7998 = sst [smem:[#allocation20_spill]] %s6992_s13 }
  0x2f   :  { %s6997_s20 = sld [smem:[%s7970_s0 + %s6825_s15]]   ;;  %s6829_s15 = smov 31  }
  0x30   :  { %s7002_s27 = sld [smem:[%s7970_s0 + %s6826_s22]]   ;;  %s6830_s22 = smov 32  }
  0x31   :  { %s7007_s4 = sld [smem:[%s7970_s0 + %s6827_s28]]   ;;  %s6831_s28 = smov 33  }
  0x32   :  { %s7012_s13 = sld [smem:[%s7970_s0 + %s6828_s7]]   ;;  %s6832_s7 = smov 34  }
  0x35   :  { %7999 = sst [smem:[#allocation21_spill]] %s6997_s20 }
  0x36   :  { %8000 = sst [smem:[#allocation22_spill]] %s7002_s27 }
  0x37   :  { %8001 = sst [smem:[#allocation23_spill]] %s7007_s4 }
  0x38   :  { %8002 = sst [smem:[#allocation24_spill]] %s7012_s13 }
  0x39   :  { %s7017_s20 = sld [smem:[%s7970_s0 + %s6829_s15]]   ;;  %s6833_s15 = smov 35  }
  0x3a   :  { %s7022_s27 = sld [smem:[%s7970_s0 + %s6830_s22]]   ;;  %s6834_s22 = smov 36  }
  0x3b   :  { %s7027_s4 = sld [smem:[%s7970_s0 + %s6831_s28]]   ;;  %s6835_s28 = smov 37  }
  0x3c   :  { %s7032_s13 = sld [smem:[%s7970_s0 + %s6832_s7]]   ;;  %s6836_s7 = smov 38  }
  0x3f   :  { %8003 = sst [smem:[#allocation25_spill]] %s7017_s20 }
  0x40   :  { %8004 = sst [smem:[#allocation26_spill]] %s7022_s27 }
  0x41   :  { %8005 = sst [smem:[#allocation27_spill]] %s7027_s4 }
  0x42   :  { %8006 = sst [smem:[#allocation28_spill]] %s7032_s13 }
  0x43   :  { %s7037_s20 = sld [smem:[%s7970_s0 + %s6833_s15]]   ;;  %s6837_s15 = smov 39  }
  0x44   :  { %s7042_s27 = sld [smem:[%s7970_s0 + %s6834_s22]]   ;;  %s6838_s22 = smov 40  }
  0x45   :  { %s7047_s4 = sld [smem:[%s7970_s0 + %s6835_s28]]   ;;  %s6839_s28 = smov 41  }
  0x46   :  { %s7052_s13 = sld [smem:[%s7970_s0 + %s6836_s7]]   ;;  %s6840_s7 = smov 42  }
  0x49   :  { %8007 = sst [smem:[#allocation29_spill]] %s7037_s20 }
  0x4a   :  { %8008 = sst [smem:[#allocation30_spill]] %s7042_s27 }
  0x4b   :  { %8009 = sst [smem:[#allocation31_spill]] %s7047_s4 }
  0x4c   :  { %8010 = sst [smem:[#allocation32_spill]] %s7052_s13 }
  0x4d   :  { %s7057_s20 = sld [smem:[%s7970_s0 + %s6837_s15]]   ;;  %s6841_s15 = smov 43  }
  0x4e   :  { %s7062_s27 = sld [smem:[%s7970_s0 + %s6838_s22]]   ;;  %s6842_s22 = smov 44  }
  0x4f   :  { %s7067_s4 = sld [smem:[%s7970_s0 + %s6839_s28]]   ;;  %s6843_s28 = smov 45  }
  0x50   :  { %s7072_s13 = sld [smem:[%s7970_s0 + %s6840_s7]]   ;;  %s6844_s7 = smov 46  }
  0x53   :  { %8011 = sst [smem:[#allocation33_spill]] %s7057_s20 }
  0x54   :  { %8012 = sst [smem:[#allocation34_spill]] %s7062_s27 }
  0x55   :  { %8013 = sst [smem:[#allocation35_spill]] %s7067_s4 }
  0x56   :  { %8014 = sst [smem:[#allocation36_spill]] %s7072_s13 }
  0x57   :  { %s7077_s20 = sld [smem:[%s7970_s0 + %s6841_s15]]   ;;  %s6845_s15 = smov 47  }
  0x58   :  { %s7082_s27 = sld [smem:[%s7970_s0 + %s6842_s22]]   ;;  %s6846_s22 = smov 48  }
  0x59   :  { %s7087_s4 = sld [smem:[%s7970_s0 + %s6843_s28]]   ;;  %s6847_s28 = smov 49  }
  0x5a   :  { %s7092_s13 = sld [smem:[%s7970_s0 + %s6844_s7]]   ;;  %s6848_s7 = smov 50  }
  0x5d   :  { %8015 = sst [smem:[#allocation37_spill]] %s7077_s20 }
  0x5e   :  { %8016 = sst [smem:[#allocation38_spill]] %s7082_s27 }
  0x5f   :  { %8017 = sst [smem:[#allocation39_spill]] %s7087_s4 }
  0x60   :  { %8018 = sst [smem:[#allocation40_spill]] %s7092_s13 }
  0x61   :  { %s7097_s20 = sld [smem:[%s7970_s0 + %s6845_s15]]  }
  0x62   :  { %s7102_s27 = sld [smem:[%s7970_s0 + %s6846_s22]]  }
  0x63   :  { %s7107_s4 = sld [smem:[%s7970_s0 + %s6847_s28]]  }
  0x64   :  { %s7112_s13 = sld [smem:[%s7970_s0 + %s6848_s7]]  }
  0x65   :  { %107 = vsyncpa [#allocation3], 0  ;;  %v211_v0 = vld [vmem:[%s6877_s17] sm:$0xff]  ;;  %v212_v1 = vld [vmem:[%s6877_s17 + $0x8] sm:$0xff]  ;;  %vm223_vm0 = vcmask 130048  }
  0x66   :  { %v207_v2 = vld [vmem:[%s6862_s5] sm:$0xff]  ;;  %v215_v3 = vpack.c.bf16 %v212_v1, %v211_v0  ;;  %v208_v4 = vld [vmem:[%s6862_s5 + $0x8] sm:$0xff]  ;;  %v209_v5 = vld [vmem:[%s6862_s5 + $0x10] sm:$0xff] }
  0x67   :  { %v210_v6 = vld [vmem:[%s6862_s5 + $0x18] sm:$0xff]  ;;  %v213_v7 = vpack.c.bf16 %v208_v4, %v207_v2 }
  0x68   :  { %108 = vsyncpa [#allocation5], 0  ;;  %5978 = vmatprep.subr.bf16.mxu0 %v215_v3  ;;  %v214_v8 = vpack.c.bf16 %v210_v6, %v209_v5  ;;  %v6849_v9 = vmov 1966171168   ;;  %v283_v11 = vlaneseq  ;;  %v5505_v20 = vld [vmem:[%s6882_s21] ss:$0 sm:$0xff] }
  0x69   :  { %5979 = vmatpush3.bf16.msra.mxu0 %v215_v3  ;;  %5980 = vmatprep.mubr.msk.bf16.mxu0 %vm223_vm0, %v213_v7  ;;  %v281_v10 = vunpack.c.l.s4 %v6849_v9  ;;  %v6754_v15 = vld.sshfl [vmem:[%s6867_s9] sm:$0x11 pattern:$0x75316420]  ;;  %vm318_vm1 = vcmask 261120   ;;  %v394_v59 = vld [vmem:[%s6897_s3 + $0x10] sm:$0xff] }
  0x6a   :  { %v284_v13 = vshrl.u32 %v283_v11, 7  ;;  %v287_v16 = vcombine.high %v6754_v15, %v6754_v15  ;;  %v395_v60 = vld [vmem:[%s6897_s3 + $0x18] sm:$0xff]  ;;  %v464_v61 = vld [vmem:[%s6907_s14 + $0x10] sm:$0xff]  ;;  %v392_v1 = vld [vmem:[%s6897_s3] sm:$0xff]  ;;  %vm6851_vm2 = vmmov 0   ;;  %vm590_vm3 = vcmask 64512  }
  0x6b   :  { %v282_v12 = vunpack.c.0.s8 %v281_v10  ;;  %v399_v62 = vpack.c.bf16 %v395_v60, %v394_v59  ;;  %v465_v63 = vld [vmem:[%s6907_s14 + $0x18] sm:$0xff]  ;;  %v393_v2 = vld [vmem:[%s6897_s3 + $0x8] sm:$0xff]  ;;  %v462_v3 = vld [vmem:[%s6907_s14] sm:$0xff]  ;;  %vm1270_vm4 = vcmask 1043456   ;;  %s8019_s0 = sld [smem:[#allocation11_spill]]  ;;  %vm2584_vm5 = vcmask 523264  }
  0x6c   :  { %5981 = vmatmul.mubr.msk.bf16.vlgmr.msra.gmra.mxu0 %vm223_vm0, %v214_v8  ;;  %v7126_v18 = vsub.s32 0, %v284_v13  ;;  %v467_v0 = vpack.c.bf16 %v465_v63, %v464_v61  ;;  %v398_v4 = vpack.c.bf16 %v393_v2, %v392_v1  ;;  %v463_v5 = vld [vmem:[%s6907_s14 + $0x8] sm:$0xff]  ;;  %v526_v7 = vld [vmem:[%s6917_s24 + $0x10] sm:$0xff]  ;;  %v527_v8 = vld [vmem:[%s6917_s24 + $0x18] sm:$0xff]  ;;  %s8020_s5 = sld [smem:[#allocation9_spill]]  ;;  %vm2769_vm6 = vcmask 1041409  }
  0x6d   :  { %v7122_v14 = vsub.s32 %v282_v12, %v284_v13  ;;  %5984 = vmatprep.subr.bf16.mxu1 %v399_v62  ;;  %v466_v6 = vpack.c.bf16 %v463_v5, %v462_v3  ;;  %v529_v9 = vpack.c.bf16 %v527_v8, %v526_v7  ;;  %v5510_v5 = vld [vmem:[%s6902_s8] ss:$0 sm:$0xff]  ;;  %s8021_s17 = sld [smem:[#allocation10_spill]]  ;;  %vm5420_vm7 = vcmask 254976  }
  0x6e   :  { %5992 = vmatprep.subr.bf16.mxu0 %v467_v0  ;;  %5985 = vmatpush3.bf16.msra.mxu1 %v399_v62  ;;  %s8022_s21 = sld [smem:[#allocation13_spill]] }
  0x6f   :  { %v301_v17 = vrot.slane %v287_v16, %v7122_v14  ;;  %v294_v19 = vrot.slane %v6754_v15, %v7122_v14  ;;  %5993 = vmatpush3.bf16.msra.mxu0 %v467_v0  ;;  %5986 = vmatprep.subr.bf16.mxu1 %v398_v4  ;;  %s8034_s15 = sld [smem:[#allocation26_spill]] }
  0x70   :  { %5994 = vmatprep.subr.bf16.mxu0 %v466_v6  ;;  %s8035_s16 = sld [smem:[#allocation28_spill]] }
  0x71   :  { %v309_v21 = vrot.slane %v301_v17, %v7126_v18  ;;  %v305_v24 = vrot.slane %v294_v19, %v7126_v18  ;;  %s8036_s18 = sld [smem:[#allocation22_spill]] }
  0x72   :  { %5987 = vmatpush3.bf16.msra.mxu1 %v398_v4  ;;  %s8037_s22 = sld [smem:[#allocation23_spill]] }
  0x73   :  { %5995 = vmatpush3.bf16.msra.mxu0 %v466_v6  ;;  %6000 = vmatprep.subr.bf16.mxu1 %v529_v9  ;;  %v5516_v6 = vld [vmem:[%s6922_s30] ss:$0 sm:$0xff]  ;;  %s8038_s23 = sld [smem:[#allocation27_spill]] }
  0x74   :  { %s8039_s26 = sld [smem:[#allocation25_spill]] }
  0x75   :  { %s8040_s28 = sld [smem:[#allocation29_spill]] }
  0x76   :  { %s8041_s1 = sld [smem:[#allocation30_spill]] }
  0x77   :  { %s8042_s2 = sld [smem:[#allocation31_spill]] }
  0x78   :  { %s8043_s7 = sld [smem:[#allocation34_spill]] }
  0x79   :  { %s8044_s10 = sld [smem:[#allocation32_spill]] }
  0x7a   :  { %s8045_s11 = sld [smem:[#allocation33_spill]] }
 0x12c   :  { %v5982_v22 = vpop.f32.mrf.mxu0 }
 0x12d   :  { %v273_v23 = vadd.f32 %v5982_v22, %v5505_v20 }
 0x12e   :  { %v264_v25 = vpop.f32.mrf.mxu0 }
 0x12f   :  { %v7132_v26 = vadd.f32 %v309_v21, %v273_v23  ;;  %v265_v27 = vadd.f32 %v5505_v20, %v264_v25 }
 0x130   :  { %v5983_v28 = vpop.f32.mrf.mxu0 }
 0x131   :  { %v7134_v29 = vadd.f32 %v305_v24, %v265_v27  ;;  %v276_v30 = vadd.f32 %v5983_v28, %v5505_v20  ;;  %v325_v31 = vsel %vm318_vm1, %v7132_v26, 0.0  ;;  %v5508_v27 = vld [vmem:[%s6887_s25] ss:$0 sm:$0xff]  ;;  %s8023_s25 = sld [smem:[#allocation12_spill]] }
 0x132   :  { %v267_v32 = vpop.f32.mrf.mxu0  ;;  %326 = vadd.xlane.f32.xlu1 %v325_v31 }
 0x133   :  { %v7138_v33 = vadd.f32 %v309_v21, %v276_v30  ;;  %v268_v34 = vadd.f32 %v5505_v20, %v267_v32  ;;  %v319_v35 = vsel %vm318_vm1, %v7134_v29, 0.0 }
 0x134   :  { %320 = vadd.xlane.f32.xlu0 %v319_v35  ;;  %v5509_v35 = vld [vmem:[%s6892_s29] ss:$0 sm:$0xff]  ;;  %s8024_s29 = sld [smem:[#allocation14_spill]] }
 0x135   :  { %v7142_v36 = vadd.f32 %v305_v24, %v268_v34  ;;  %v328_v37 = vsel %vm318_vm1, %v7138_v33, 0.0 }
 0x136   :  { %329 = vadd.xlane.f32.xlu1 %v328_v37 }
 0x137   :  { %v322_v38 = vsel %vm318_vm1, %v7142_v36, 0.0 }
 0x138   :  { %323 = vadd.xlane.f32.xlu0 %v322_v38 }
 0x1bb   :  { %v327_v39 = vpop.xlane.xlu1 %326 }
 0x1bc   :  { %v334_v40 = vmul.f32 0.03125, %v327_v39 }
 0x1bd   :  { %v321_v41 = vpop.xlane.xlu0 %320 }
 0x1be   :  { %v332_v42 = vmul.f32 0.03125, %v321_v41  ;;  %v7149_v44 = vsub.f32 %v7132_v26, %v334_v40 }
 0x1bf   :  { %v330_v43 = vpop.xlane.xlu1 %329 }
 0x1c0   :  { %v336_v45 = vsub.f32 %v7134_v29, %v332_v42  ;;  %v335_v46 = vmul.f32 0.03125, %v330_v43  ;;  %v342_v53 = vmul.f32 %v7149_v44, %v7149_v44 }
 0x1c1   :  { %v324_v47 = vpop.xlane.xlu0 %323 }
 0x1c2   :  { %v333_v48 = vmul.f32 0.03125, %v324_v47  ;;  %v340_v49 = vmul.f32 %v336_v45, %v336_v45  ;;  %v7153_v50 = vsub.f32 %v7138_v33, %v335_v46  ;;  %v350_v56 = vsel %vm318_vm1, %v342_v53, 0.0  ;;  %v525_v47 = vld [vmem:[%s6917_s24 + $0x8] sm:$0xff] }
 0x1c4   :  { %v337_v51 = vsub.f32 %v7142_v36, %v333_v48  ;;  %v344_v52 = vsel %vm318_vm1, %v340_v49, 0.0  ;;  %v343_v57 = vmul.f32 %v7153_v50, %v7153_v50 }
 0x1c5   :  { %345 = vadd.xlane.f32.xlu0 %v344_v52 }
 0x1c6   :  { %v341_v54 = vmul.f32 %v337_v51, %v337_v51  ;;  %v353_v58 = vsel %vm318_vm1, %v343_v57, 0.0 }
 0x1c8   :  { %v347_v55 = vsel %vm318_vm1, %v341_v54, 0.0  ;;  %v5513_v54 = vld [vmem:[%s6912_s19] ss:$0 sm:$0xff] }
 0x1c9   :  { %348 = vadd.xlane.f32.xlu1 %v347_v55  ;;  %351 = vadd.xlane.f32.xlu0 %v350_v56 }
 0x1cd   :  { %354 = vadd.xlane.f32.xlu1 %v353_v58 }
 0x24e   :  { %v346_v10 = vpop.xlane.xlu0 %345 }
 0x24f   :  { %v356_v11 = vmul.f32 0.03125, %v346_v10 }
 0x251   :  { %v360_v12 = vadd.f32 1e-05, %v356_v11 }
 0x252   :  { %v352_v13 = vpop.xlane.xlu0 %351  ;;  %v349_v15 = vpop.xlane.xlu1 %348 }
 0x253   :  { %6543 = vrsqrt.f32 %v360_v12  ;;  %v358_v16 = vmul.f32 0.03125, %v352_v13  ;;  %v357_v17 = vmul.f32 0.03125, %v349_v15 }
 0x255   :  { %v362_v19 = vadd.f32 1e-05, %v358_v16  ;;  %v361_v20 = vadd.f32 1e-05, %v357_v17 }
 0x256   :  { %v355_v21 = vpop.xlane.xlu1 %354 }
 0x257   :  { %6545 = vrsqrt.f32 %v362_v19  ;;  %v359_v22 = vmul.f32 0.03125, %v355_v21 }
 0x258   :  { %6547 = vrsqrt.f32 %v361_v20 }
 0x259   :  { %v363_v23 = vadd.f32 1e-05, %v359_v22 }
 0x25b   :  { %6549 = vrsqrt.f32 %v363_v23 }
 0x260   :  { %v6544_v24 = vpop.eup %6543 }
 0x261   :  { %v368_v25 = vmul.f32 %v6544_v24, %v336_v45  ;;  %v524_v45 = vld [vmem:[%s6917_s24] sm:$0xff] }
 0x263   :  { %v378_v32 = vmul.f32 %v5508_v27, %v368_v25 }
 0x264   :  { %v6546_v28 = vpop.eup %6545 }
 0x265   :  { %v6548_v30 = vpop.eup %6547  ;;  %v370_v31 = vmul.f32 %v6546_v28, %v7149_v44  ;;  %v388_v41 = vadd.f32 %v5509_v35, %v378_v32 }
 0x266   :  { %v369_v34 = vmul.f32 %v6548_v30, %v337_v51  ;;  %v528_v51 = vpack.c.bf16 %v525_v47, %v524_v45 }
 0x267   :  { %v380_v39 = vmul.f32 %v5508_v27, %v370_v31 }
 0x268   :  { %v6550_v37 = vpop.eup %6549  ;;  %v379_v38 = vmul.f32 %v5508_v27, %v369_v34 }
 0x269   :  { %v371_v40 = vmul.f32 %v6550_v37, %v7153_v50  ;;  %v390_v48 = vadd.f32 %v5509_v35, %v380_v39  ;;  %v6850_v50 = vmov 0.0  }
 0x26a   :  { %v389_v42 = vadd.f32 %v5509_v35, %v379_v38  ;;  %6008 = vmatprep.subr.bf16.mxu0 %v6850_v50 }
 0x26b   :  { %v381_v43 = vmul.f32 %v5508_v27, %v371_v40 }
 0x26c   :  { %v7178_v46 = vpack.c.bf16 %v389_v42, %v388_v41 }
 0x26d   :  { %v391_v49 = vadd.f32 %v5509_v35, %v381_v43 }
 0x26e   :  { %5988 = vmatprep.mubr.msk.bf16.mxu1 %vm318_vm1, %v7178_v46  ;;  %5996 = vmatprep.mubr.msk.bf16.mxu0 %vm318_vm1, %v7178_v46 }
 0x26f   :  { %v7186_v44 = vpack.c.bf16 %v391_v49, %v390_v48 }
 0x271   :  { %5989 = vmatmul.mubr.msk.bf16.vlgmr.msra.gmra.mxu1 %vm318_vm1, %v7186_v44  ;;  %5997 = vmatmul.mubr.msk.bf16.vlgmr.msra.gmra.mxu0 %vm318_vm1, %v7186_v44 }
 0x272   :  { %6001 = vmatpush3.bf16.msra.mxu1 %v529_v9  ;;  %6004 = vmatprep.mubr.msk.bf16.mxu1 %vm318_vm1, %v7178_v46 }
 0x273   :  { %6002 = vmatprep.subr.bf16.mxu1 %v528_v51  ;;  %6010 = vmatprep.mubr.msk.bf16.mxu0 %vm6851_vm2, %v6850_v50 }
 0x276   :  { %6003 = vmatpush3.bf16.msra.mxu1 %v528_v51 }
 0x277   :  { %6014 = vmatprep.subr.bf16.mxu1 %v6850_v50 }
 0x279   :  { %6005 = vmatmul.mubr.msk.bf16.vlgmr.msra.gmra.mxu1 %vm318_vm1, %v7186_v44 }
 0x27a   :  { %6016 = vmatprep.mubr.msk.bf16.mxu1 %vm6851_vm2, %v6850_v50 }
 0x331   :  { %v5990_v52 = vpop.f32.mrf.mxu1  ;;  %v5998_v53 = vpop.f32.mrf.mxu0 }
 0x332   :  { %v518_v59 = vadd.f32 %v5998_v53, %v5513_v54  ;;  %v456_v11 = vadd.f32 %v5990_v52, %v5510_v5 }
 0x333   :  { %v447_v55 = vpop.f32.mrf.mxu1  ;;  %v509_v56 = vpop.f32.mrf.mxu0 }
 0x334   :  { %v510_v63 = vadd.f32 %v5513_v54, %v509_v56  ;;  %v448_v16 = vadd.f32 %v5510_v5, %v447_v55 }
 0x335   :  { %v5991_v57 = vpop.f32.mrf.mxu1  ;;  %v5999_v58 = vpop.f32.mrf.mxu0 }
 0x336   :  { %v521_v60 = vadd.f32 %v5999_v58, %v5513_v54  ;;  %v459_v8 = vadd.f32 %v5991_v57, %v5510_v5 }
 0x337   :  { %v450_v61 = vpop.f32.mrf.mxu1  ;;  %v512_v62 = vpop.f32.mrf.mxu0 }
 0x338   :  { %v589_v0 = vpack.c.bf16 %v521_v60, %v518_v59  ;;  %v513_v1 = vadd.f32 %v5513_v54, %v512_v62  ;;  %v451_v12 = vadd.f32 %v5510_v5, %v450_v61  ;;  %v587_v19 = vpack.c.bf16 %v459_v8, %v456_v11  ;;  %v5534_v5 = vld [vmem:[%s6907_s14 + $0x38] sm:$0xff] }
 0x339   :  { %v6006_v2 = vpop.f32.mrf.mxu1  ;;  %v5526_v8 = vld [vmem:[%s6897_s3 + $0x38] sm:$0xff] }
 0x33a   :  { %v588_v3 = vpack.c.bf16 %v513_v1, %v510_v63  ;;  %v642_v4 = vsel %vm590_vm3, %v589_v0, 0  ;;  %v580_v13 = vadd.f32 %v6006_v2, %v5516_v6  ;;  %v586_v23 = vpack.c.bf16 %v451_v12, %v448_v16 }
 0x33b   :  { %v571_v7 = vpop.f32.mrf.mxu1  ;;  %6015 = vmatpush3.bf16.xpose.msra.mxu1 %v642_v4  ;;  %v5533_v4 = vld [vmem:[%s6907_s14 + $0x30] sm:$0xff] }
 0x33c   :  { %v595_v9 = vsel %vm590_vm3, %v588_v3, 0  ;;  %6026 = vmatprep.subr.bf16.mxu1 %v6850_v50  ;;  %v572_v20 = vadd.f32 %v5516_v6, %v571_v7  ;;  %v5525_v7 = vld [vmem:[%s6897_s3 + $0x30] sm:$0xff] }
 0x33d   :  { %v6007_v10 = vpop.f32.mrf.mxu1  ;;  %6009 = vmatpush3.bf16.xpose.msra.mxu0 %v595_v9  ;;  %v835_v9 = vpack.c.bf16 %v5526_v8, %v5525_v7  ;;  %v5528_v7 = vld [vmem:[%s6902_s8 + $0x1] ss:$0 sm:$0xff] }
 0x33e   :  { %v583_v15 = vadd.f32 %v6007_v10, %v5516_v6  ;;  %6020 = vmatprep.subr.bf16.mxu0 %v6850_v50 }
 0x33f   :  { %v574_v17 = vpop.f32.mrf.mxu1 }
 0x340   :  { %v736_v21 = vpack.c.bf16 %v583_v15, %v580_v13  ;;  %v575_v22 = vadd.f32 %v5516_v6, %v574_v17  ;;  %v899_v6 = vpack.c.bf16 %v5534_v5, %v5533_v4  ;;  %v5531_v17 = vld [vmem:[%s6907_s14 + $0x20] sm:$0xff] }
 0x342   :  { %v735_v24 = vpack.c.bf16 %v575_v22, %v572_v20  ;;  %6017 = vmatmul.mubr.msk.bf16.vlgmr.msra.gmra.mxu1 %vm590_vm3, %v587_v19  ;;  %v5532_v19 = vld [vmem:[%s6907_s14 + $0x28] sm:$0xff] }
 0x343   :  { %6027 = vmatpush3.bf16.msra.mxu1 %v736_v21  ;;  %6028 = vmatprep.mubr.msk.bf16.mxu1 %vm6851_vm2, %v6850_v50 }
 0x344   :  { %6011 = vmatmul.mubr.msk.bf16.vlgmr.msra.gmra.mxu0 %vm590_vm3, %v586_v23  ;;  %6040 = vmatprep.subr.bf16.mxu1 %v899_v6 }
 0x345   :  { %6021 = vmatpush3.bf16.msra.mxu0 %v735_v24  ;;  %6022 = vmatprep.mubr.msk.bf16.mxu0 %vm6851_vm2, %v6850_v50  ;;  %v898_v24 = vpack.c.bf16 %v5532_v19, %v5531_v17 }
 0x346   :  { %6032 = vmatprep.subr.bf16.mxu0 %v835_v9 }
 0x402   :  { %v678_v25 = vpop.f32.mrf.mxu1 }
 0x403   :  { %v687_v27 = vmul.f32 0.35355338, %v678_v25 }
 0x404   :  { %v631_v28 = vpop.f32.mrf.mxu0  ;;  %v6018_v30 = vpop.f32.mrf.mxu1 }
 0x405   :  { %v685_v31 = vmul.f32 0.35355338, %v631_v28  ;;  %v695_v32 = vsel %vm223_vm0, %v687_v27, -inf  ;;  %v5524_v28 = vld [vmem:[%s6897_s3 + $0x28] sm:$0xff] }
 0x406   :  { %696 = vmax.xlane.f32.xlu0 %v695_v32  ;;  %v6012_v34 = vpop.f32.mrf.mxu0  ;;  %v681_v35 = vpop.f32.mrf.mxu1 }
 0x407   :  { %v688_v37 = vmul.f32 0.35355338, %v681_v35  ;;  %v689_v42 = vsel %vm223_vm0, %v685_v31, -inf  ;;  %v5541_v35 = vld [vmem:[%s6917_s24 + $0x30] sm:$0xff] }
 0x408   :  { %v634_v38 = vpop.f32.mrf.mxu0  ;;  %v6019_v39 = vpop.f32.mrf.mxu1 }
 0x409   :  { %v686_v40 = vmul.f32 0.35355338, %v634_v38  ;;  %v698_v41 = vsel %vm223_vm0, %v688_v37, -inf  ;;  %v5539_v39 = vld [vmem:[%s6917_s24 + $0x20] sm:$0xff] }
 0x40a   :  { %699 = vmax.xlane.f32.xlu1 %v698_v41  ;;  %690 = vmax.xlane.f32.xlu0 %v689_v42  ;;  %v6013_v43 = vpop.f32.mrf.mxu0 }
 0x40b   :  { %v692_v45 = vsel %vm223_vm0, %v686_v40, -inf }
 0x40e   :  { %693 = vmax.xlane.f32.xlu1 %v692_v45 }
 0x48f   :  { %v697_v47 = vpop.xlane.xlu0 %696 }
 0x490   :  { %v703_v48 = vsub.f32 %v687_v27, %v697_v47  ;;  %v5523_v27 = vld [vmem:[%s6897_s3 + $0x20] sm:$0xff] }
 0x491   :  { %v834_v34 = vpack.c.bf16 %v5524_v28, %v5523_v27 }
 0x492   :  { %v709_v49 = vmul.f32 1.442695, %v703_v48 }
 0x493   :  { %v700_v51 = vpop.xlane.xlu1 %699  ;;  %v691_v52 = vpop.xlane.xlu0 %690 }
 0x494   :  { %6551 = vpow2.f32 %v709_v49  ;;  %v704_v53 = vsub.f32 %v688_v37, %v700_v51  ;;  %v701_v54 = vsub.f32 %v685_v31, %v691_v52  ;;  %v5542_v37 = vld [vmem:[%s6917_s24 + $0x38] sm:$0xff] }
 0x495   :  { %v963_v38 = vpack.c.bf16 %v5542_v37, %v5541_v35 }
 0x496   :  { %v711_v55 = vmul.f32 1.442695, %v704_v53  ;;  %v705_v56 = vmul.f32 1.442695, %v701_v54 }
 0x497   :  { %v694_v57 = vpop.xlane.xlu1 %693 }
 0x498   :  { %6553 = vpow2.f32 %v711_v55  ;;  %v702_v58 = vsub.f32 %v686_v40, %v694_v57  ;;  %v5540_v40 = vld [vmem:[%s6917_s24 + $0x28] sm:$0xff] }
 0x499   :  { %6555 = vpow2.f32 %v705_v56  ;;  %v962_v41 = vpack.c.bf16 %v5540_v40, %v5539_v39  ;;  %v5536_v56 = vld [vmem:[%s6912_s19 + $0x1] ss:$0 sm:$0xff] }
 0x49a   :  { %v707_v59 = vmul.f32 1.442695, %v702_v58 }
 0x49c   :  { %6557 = vpow2.f32 %v707_v59 }
 0x4a1   :  { %v6552_v60 = vpop.eup %6551 }
 0x4a2   :  { %v719_v61 = vsel %vm223_vm0, %v6552_v60, 0.0 }
 0x4a3   :  { %720 = vadd.xlane.f32.xlu0 %v719_v61 }
 0x4a5   :  { %v6554_v62 = vpop.eup %6553 }
 0x4a6   :  { %v6556_v63 = vpop.eup %6555  ;;  %v722_v0 = vsel %vm223_vm0, %v6554_v62, 0.0 }
 0x4a7   :  { %v713_v1 = vsel %vm223_vm0, %v6556_v63, 0.0  ;;  %723 = vadd.xlane.f32.xlu1 %v722_v0 }
 0x4a8   :  { %714 = vadd.xlane.f32.xlu0 %v713_v1 }
 0x4a9   :  { %v6558_v2 = vpop.eup %6557 }
 0x4aa   :  { %v716_v3 = vsel %vm223_vm0, %v6558_v2, 0.0 }
 0x4ab   :  { %717 = vadd.xlane.f32.xlu1 %v716_v3 }
 0x52c   :  { %v721_v10 = vpop.xlane.xlu0 %720 }
 0x52d   :  { %6559 = vrcp.f32 %v721_v10 }
 0x530   :  { %v724_v11 = vpop.xlane.xlu1 %723 }
 0x531   :  { %v715_v12 = vpop.xlane.xlu0 %714  ;;  %6561 = vrcp.f32 %v724_v11 }
 0x532   :  { %6563 = vrcp.f32 %v715_v12 }
 0x534   :  { %v718_v13 = vpop.xlane.xlu1 %717 }
 0x535   :  { %6565 = vrcp.f32 %v718_v13  ;;  %v5544_v13 = vld [vmem:[%s6922_s30 + $0x1] ss:$0 sm:$0xff] }
 0x53a   :  { %v6560_v15 = vpop.eup %6559 }
 0x53b   :  { %v731_v20 = vmul.f32 %v6560_v15, %v6552_v60 }
 0x53e   :  { %v6562_v16 = vpop.eup %6561 }
 0x53f   :  { %v732_v21 = vmul.f32 %v6562_v16, %v6554_v62  ;;  %v6564_v22 = vpop.eup %6563 }
 0x540   :  { %v729_v30 = vmul.f32 %v6564_v22, %v6556_v63 }
 0x541   :  { %v734_v23 = vpack.c.bf16 %v732_v21, %v731_v20 }
 0x542   :  { %v6566_v25 = vpop.eup %6565 }
 0x543   :  { %6029 = vmatmul.mubr.msk.bf16.vlgmr.msra.gmra.mxu1 %vm223_vm0, %v734_v23  ;;  %v730_v31 = vmul.f32 %v6566_v25, %v6558_v2 }
 0x544   :  { %6041 = vmatpush3.bf16.msra.mxu1 %v899_v6  ;;  %6044 = vmatprep.mubr.msk.bf16.mxu1 %vm318_vm1, %v7178_v46 }
 0x545   :  { %v733_v32 = vpack.c.bf16 %v730_v31, %v729_v30  ;;  %6042 = vmatprep.subr.bf16.mxu1 %v898_v24 }
 0x547   :  { %6023 = vmatmul.mubr.msk.bf16.vlgmr.msra.gmra.mxu0 %vm223_vm0, %v733_v32 }
 0x548   :  { %6033 = vmatpush3.bf16.msra.mxu0 %v835_v9  ;;  %6036 = vmatprep.mubr.msk.bf16.mxu0 %vm318_vm1, %v7178_v46 }
 0x549   :  { %6043 = vmatpush3.bf16.msra.mxu1 %v898_v24  ;;  %6034 = vmatprep.subr.bf16.mxu0 %v834_v34 }
 0x54a   :  { %6056 = vmatprep.subr.bf16.mxu1 %v6850_v50 }
 0x54c   :  { %6045 = vmatmul.mubr.msk.bf16.vlgmr.msra.gmra.mxu1 %vm318_vm1, %v7186_v44  ;;  %6035 = vmatpush3.bf16.msra.mxu0 %v834_v34 }
 0x54d   :  { %6048 = vmatprep.subr.bf16.mxu0 %v963_v38  ;;  %6058 = vmatprep.mubr.msk.bf16.mxu1 %vm6851_vm2, %v6850_v50 }
 0x54f   :  { %6037 = vmatmul.mubr.msk.bf16.vlgmr.msra.gmra.mxu0 %vm318_vm1, %v7186_v44 }
 0x550   :  { %6049 = vmatpush3.bf16.msra.mxu0 %v963_v38  ;;  %6052 = vmatprep.mubr.msk.bf16.mxu0 %vm318_vm1, %v7178_v46 }
 0x551   :  { %6050 = vmatprep.subr.bf16.mxu0 %v962_v41 }
 0x554   :  { %6051 = vmatpush3.bf16.msra.mxu0 %v962_v41 }
 0x555   :  { %6062 = vmatprep.subr.bf16.mxu0 %v6850_v50 }
 0x557   :  { %6053 = vmatmul.mubr.msk.bf16.vlgmr.msra.gmra.mxu0 %vm318_vm1, %v7186_v44 }
 0x558   :  { %6064 = vmatprep.mubr.msk.bf16.mxu0 %vm6851_vm2, %v6850_v50 }
 0x603   :  { %v7255_v42 = vpop.f32.mrf.mxu1 }
 0x605   :  { %v6030_v43 = vpop.f32.mrf.mxu1 }
 0x607   :  { %v7257_v45 = vpop.f32.mrf.mxu0  ;;  %v7259_v47 = vpop.f32.mrf.mxu1 }
 0x608   :  { %v827_v48 = vpack.c.bf16 %v7259_v47, %v7255_v42  ;;  %v5558_v47 = vld [vmem:[%s6897_s3 + $0x50] sm:$0xff] }
 0x609   :  { %v6024_v49 = vpop.f32.mrf.mxu0  ;;  %v6031_v51 = vpop.f32.mrf.mxu1 }
 0x60b   :  { %v7263_v52 = vpop.f32.mrf.mxu0 }
 0x60c   :  { %v826_v53 = vpack.c.bf16 %v7263_v52, %v7257_v45  ;;  %v6046_v54 = vpop.f32.mrf.mxu1  ;;  %v5551_v45 = vld [vmem:[%s6927_s6 + $0x8] sm:$0xff] }
 0x60d   :  { %v6025_v55 = vpop.f32.mrf.mxu0  ;;  %v951_v60 = vadd.f32 %v6046_v54, %v5536_v56  ;;  %v1263_v52 = vpack.c.bf16 %v5551_v45, %v5551_v45 }
 0x60e   :  { %v942_v57 = vpop.f32.mrf.mxu1 }
 0x60f   :  { %v6038_v58 = vpop.f32.mrf.mxu0  ;;  %v943_v0 = vadd.f32 %v5536_v56, %v942_v57  ;;  %v1272_v42 = vsel %vm1270_vm4, %v1263_v52, 0 }
 0x610   :  { %v6047_v59 = vpop.f32.mrf.mxu1  ;;  %v887_v11 = vadd.f32 %v6038_v58, %v5528_v7 }
 0x611   :  { %v954_v61 = vadd.f32 %v6047_v59, %v5536_v56  ;;  %v878_v62 = vpop.f32.mrf.mxu0 }
 0x612   :  { %v945_v63 = vpop.f32.mrf.mxu1  ;;  %v879_v16 = vadd.f32 %v5528_v7, %v878_v62 }
 0x613   :  { %v1024_v1 = vpack.c.bf16 %v954_v61, %v951_v60  ;;  %v946_v2 = vadd.f32 %v5536_v56, %v945_v63  ;;  %v6039_v3 = vpop.f32.mrf.mxu0 }
 0x614   :  { %v890_v8 = vadd.f32 %v6039_v3, %v5528_v7 }
 0x615   :  { %v1023_v4 = vpack.c.bf16 %v946_v2, %v943_v0  ;;  %v881_v5 = vpop.f32.mrf.mxu0  ;;  %v1076_v6 = vsel %vm590_vm3, %v1024_v1, 0 }
 0x616   :  { %6063 = vmatpush3.bf16.xpose.msra.mxu0 %v1076_v6  ;;  %v882_v12 = vadd.f32 %v5528_v7, %v881_v5  ;;  %v1022_v17 = vpack.c.bf16 %v890_v8, %v887_v11 }
 0x617   :  { %v6054_v9 = vpop.f32.mrf.mxu0  ;;  %v1029_v10 = vsel %vm590_vm3, %v1023_v4, 0  ;;  %6074 = vmatprep.subr.bf16.mxu0 %v6850_v50 }
 0x618   :  { %6057 = vmatpush3.bf16.xpose.msra.mxu1 %v1029_v10  ;;  %v1015_v20 = vadd.f32 %v6054_v9, %v5544_v13  ;;  %v1021_v22 = vpack.c.bf16 %v882_v12, %v879_v16 }
 0x619   :  { %v1006_v15 = vpop.f32.mrf.mxu0  ;;  %6068 = vmatprep.subr.bf16.mxu1 %v6850_v50 }
 0x61a   :  { %v1007_v24 = vadd.f32 %v5544_v13, %v1006_v15 }
 0x61b   :  { %v6055_v19 = vpop.f32.mrf.mxu0 }
 0x61c   :  { %v1018_v21 = vadd.f32 %v6055_v19, %v5544_v13 }
 0x61d   :  { %6065 = vmatmul.mubr.msk.bf16.vlgmr.msra.gmra.mxu0 %vm590_vm3, %v1022_v17  ;;  %v1009_v23 = vpop.f32.mrf.mxu0 }
 0x61e   :  { %v1170_v25 = vpack.c.bf16 %v1018_v21, %v1015_v20  ;;  %v1010_v27 = vadd.f32 %v5544_v13, %v1009_v23  ;;  %6076 = vmatprep.mubr.msk.bf16.mxu0 %vm6851_vm2, %v6850_v50  ;;  %v825_v13 = vld [vmem:[%s6927_s6] sm:$0xff] }
 0x61f   :  { %6059 = vmatmul.mubr.msk.bf16.vlgmr.msra.gmra.mxu1 %vm590_vm3, %v1021_v22  ;;  %v828_v15 = vpack.c.bf16 %v825_v13, %v825_v13 }
 0x620   :  { %v1169_v28 = vpack.c.bf16 %v1010_v27, %v1007_v24  ;;  %6075 = vmatpush3.bf16.msra.mxu0 %v1170_v25  ;;  %6070 = vmatprep.mubr.msk.bf16.mxu1 %vm6851_vm2, %v6850_v50 }
 0x621   :  { %6481 = vmatprep.subr.msk.bf16.mxu0 %vm1270_vm4, %v828_v15 }
 0x622   :  { %6069 = vmatpush3.bf16.msra.mxu1 %v1169_v28 }
 0x623   :  { %6480 = vmatprep.subr.msk.bf16.mxu1 %vm1270_vm4, %v1263_v52 }
 0x6dd   :  { %v1112_v30 = vpop.f32.mrf.mxu0 }
 0x6de   :  { %v1121_v38 = vmul.f32 0.35355338, %v1112_v30  ;;  %v5566_v30 = vld [vmem:[%s6907_s14 + $0x50] sm:$0xff] }
 0x6df   :  { %v1065_v31 = vpop.f32.mrf.mxu1  ;;  %v6066_v32 = vpop.f32.mrf.mxu0 }
 0x6e0   :  { %v1119_v34 = vmul.f32 0.35355338, %v1065_v31  ;;  %v1129_v54 = vsel %vm223_vm0, %v1121_v38, -inf  ;;  %v5567_v31 = vld [vmem:[%s6907_s14 + $0x58] sm:$0xff] }
 0x6e1   :  { %v6060_v35 = vpop.f32.mrf.mxu1  ;;  %v1115_v37 = vpop.f32.mrf.mxu0 }
 0x6e2   :  { %v1123_v39 = vsel %vm223_vm0, %v1119_v34, -inf  ;;  %v1122_v51 = vmul.f32 0.35355338, %v1115_v37  ;;  %v1330_v37 = vsel %vm1270_vm4, %v828_v15, 0 }
 0x6e3   :  { %v6067_v40 = vpop.f32.mrf.mxu0  ;;  %1124 = vmax.xlane.f32.xlu0 %v1123_v39  ;;  %v1068_v41 = vpop.f32.mrf.mxu1  ;;  %v5564_v39 = vld [vmem:[%s6907_s14 + $0x40] sm:$0xff] }
 0x6e4   :  { %v1120_v43 = vmul.f32 0.35355338, %v1068_v41  ;;  %v1132_v56 = vsel %vm223_vm0, %v1122_v51, -inf  ;;  %v5565_v40 = vld [vmem:[%s6907_s14 + $0x48] sm:$0xff] }
 0x6e5   :  { %v6061_v49 = vpop.f32.mrf.mxu1  ;;  %v1450_v41 = vpack.c.bf16 %v5565_v40, %v5564_v39 }
 0x6e6   :  { %v1126_v55 = vsel %vm223_vm0, %v1120_v43, -inf }
 0x6e7   :  { %1130 = vmax.xlane.f32.xlu0 %v1129_v54  ;;  %1127 = vmax.xlane.f32.xlu1 %v1126_v55 }
 0x6eb   :  { %1133 = vmax.xlane.f32.xlu1 %v1132_v56 }
 0x76c   :  { %v1125_v57 = vpop.xlane.xlu0 %1124 }
 0x76d   :  { %v1135_v58 = vsub.f32 %v1119_v34, %v1125_v57 }
 0x76f   :  { %v1139_v59 = vmul.f32 1.442695, %v1135_v58  ;;  %v5556_v58 = vld [vmem:[%s6897_s3 + $0x40] sm:$0xff] }
 0x770   :  { %v1131_v60 = vpop.xlane.xlu0 %1130  ;;  %v1128_v61 = vpop.xlane.xlu1 %1127 }
 0x771   :  { %6567 = vpow2.f32 %v1139_v59  ;;  %v1137_v62 = vsub.f32 %v1121_v38, %v1131_v60  ;;  %v1136_v63 = vsub.f32 %v1120_v43, %v1128_v61  ;;  %v1451_v38 = vpack.c.bf16 %v5567_v31, %v5566_v30  ;;  %v5557_v59 = vld [vmem:[%s6897_s3 + $0x48] sm:$0xff] }
 0x773   :  { %v1143_v0 = vmul.f32 1.442695, %v1137_v62  ;;  %v1141_v1 = vmul.f32 1.442695, %v1136_v63  ;;  %v1386_v62 = vpack.c.bf16 %v5557_v59, %v5556_v58 }
 0x774   :  { %v1134_v2 = vpop.xlane.xlu1 %1133 }
 0x775   :  { %6569 = vpow2.f32 %v1143_v0  ;;  %v1138_v3 = vsub.f32 %v1122_v51, %v1134_v2  ;;  %v5574_v0 = vld [vmem:[%s6917_s24 + $0x50] sm:$0xff] }
 0x776   :  { %6571 = vpow2.f32 %v1141_v1  ;;  %v5575_v1 = vld [vmem:[%s6917_s24 + $0x58] sm:$0xff] }
 0x777   :  { %v1145_v4 = vmul.f32 1.442695, %v1138_v3  ;;  %v1515_v3 = vpack.c.bf16 %v5575_v1, %v5574_v0 }
 0x779   :  { %6573 = vpow2.f32 %v1145_v4 }
 0x77e   :  { %v6568_v5 = vpop.eup %6567 }
 0x77f   :  { %v1147_v6 = vsel %vm223_vm0, %v6568_v5, 0.0 }
 0x780   :  { %1148 = vadd.xlane.f32.xlu0 %v1147_v6  ;;  %v5573_v6 = vld [vmem:[%s6917_s24 + $0x48] sm:$0xff] }
 0x782   :  { %v6570_v7 = vpop.eup %6569 }
 0x783   :  { %v6572_v8 = vpop.eup %6571  ;;  %v1153_v9 = vsel %vm223_vm0, %v6570_v7, 0.0 }
 0x784   :  { %1154 = vadd.xlane.f32.xlu0 %v1153_v9  ;;  %v1150_v10 = vsel %vm223_vm0, %v6572_v8, 0.0 }
 0x785   :  { %1151 = vadd.xlane.f32.xlu1 %v1150_v10 }
 0x786   :  { %v6574_v11 = vpop.eup %6573 }
 0x787   :  { %v1156_v12 = vsel %vm223_vm0, %v6574_v11, 0.0 }
 0x789   :  { %1157 = vadd.xlane.f32.xlu1 %v1156_v12 }
 0x809   :  { %v1149_v16 = vpop.xlane.xlu0 %1148 }
 0x80a   :  { %6575 = vrcp.f32 %v1149_v16 }
 0x80d   :  { %v1155_v17 = vpop.xlane.xlu0 %1154 }
 0x80e   :  { %v1152_v19 = vpop.xlane.xlu1 %1151 }
 0x80f   :  { %6577 = vrcp.f32 %v1152_v19 }
 0x810   :  { %6579 = vrcp.f32 %v1155_v17 }
 0x812   :  { %v1158_v20 = vpop.xlane.xlu1 %1157 }
 0x813   :  { %6581 = vrcp.f32 %v1158_v20 }
 0x817   :  { %v6576_v21 = vpop.eup %6575 }
 0x818   :  { %v1163_v23 = vmul.f32 %v6576_v21, %v6568_v5  ;;  %v5572_v5 = vld [vmem:[%s6917_s24 + $0x40] sm:$0xff] }
 0x81c   :  { %v6578_v22 = vpop.eup %6577 }
 0x81d   :  { %v1164_v24 = vmul.f32 %v6578_v22, %v6572_v8  ;;  %v6580_v25 = vpop.eup %6579  ;;  %v1514_v8 = vpack.c.bf16 %v5573_v6, %v5572_v5 }
 0x81e   :  { %v1165_v32 = vmul.f32 %v6580_v25, %v6570_v7 }
 0x81f   :  { %v1167_v27 = vpack.c.bf16 %v1164_v24, %v1163_v23 }
 0x820   :  { %v6582_v28 = vpop.eup %6581 }
 0x821   :  { %6071 = vmatmul.mubr.msk.bf16.vlgmr.msra.gmra.mxu1 %vm223_vm0, %v1167_v27  ;;  %v1166_v34 = vmul.f32 %v6582_v28, %v6574_v11  ;;  %v5569_v11 = vld [vmem:[%s6912_s19 + $0x2] ss:$0 sm:$0xff] }
 0x822   :  { %6081 = vmatpush3.bf16.msra.mxu1 %v1272_v42 }
 0x823   :  { %v1168_v35 = vpack.c.bf16 %v1166_v34, %v1165_v32  ;;  %v5561_v32 = vld [vmem:[%s6902_s8 + $0x2] ss:$0 sm:$0xff] }
 0x825   :  { %6077 = vmatmul.mubr.msk.bf16.vlgmr.msra.gmra.mxu0 %vm223_vm0, %v1168_v35 }
 0x826   :  { %6088 = vmatprep.mubr.msk.bf16.mxu0 %vm590_vm3, %v826_v53  ;;  %6087 = vmatpush3.bf16.msra.mxu0 %v1330_v37 }
 0x827   :  { %6100 = vmatprep.subr.bf16.mxu0 %v1451_v38 }
 0x82d   :  { %6089 = vmatmul.mubr.msk.bf16.vlgmr.msra.gmra.mxu0 %vm590_vm3, %v827_v48  ;;  %v5559_v48 = vld [vmem:[%s6897_s3 + $0x58] sm:$0xff] }
 0x82e   :  { %6101 = vmatpush3.bf16.msra.mxu0 %v1451_v38  ;;  %6104 = vmatprep.mubr.msk.bf16.mxu0 %vm318_vm1, %v7178_v46  ;;  %v1387_v53 = vpack.c.bf16 %v5559_v48, %v5558_v47  ;;  %v5577_v47 = vld [vmem:[%s6922_s30 + $0x2] ss:$0 sm:$0xff] }
 0x82f   :  { %6102 = vmatprep.subr.bf16.mxu0 %v1450_v41 }
 0x830   :  { %6092 = vmatprep.subr.bf16.mxu1 %v1387_v53 }
 0x832   :  { %6103 = vmatpush3.bf16.msra.mxu0 %v1450_v41 }
 0x833   :  { %6116 = vmatprep.subr.bf16.mxu0 %v6850_v50 }
 0x835   :  { %6105 = vmatmul.mubr.msk.bf16.vlgmr.msra.gmra.mxu0 %vm318_vm1, %v7186_v44 }
 0x836   :  { %6118 = vmatprep.mubr.msk.bf16.mxu0 %vm6851_vm2, %v6850_v50 }
 0x8e1   :  { %v1208_v43 = vpop.f32.mrf.mxu1 }
 0x8e3   :  { %v6072_v49 = vpop.f32.mrf.mxu1 }
 0x8e5   :  { %v1211_v51 = vpop.f32.mrf.mxu1  ;;  %v1252_v54 = vpop.f32.mrf.mxu0 }
 0x8e6   :  { %v1261_v55 = vpack.c.bf16 %v1211_v51, %v1208_v43 }
 0x8e7   :  { %v6073_v56 = vpop.f32.mrf.mxu1  ;;  %v6078_v57 = vpop.f32.mrf.mxu0 }
 0x8e8   :  { %6082 = vmatprep.mubr.msk.bf16.mxu1 %vm590_vm3, %v1261_v55 }
 0x8e9   :  { %v1255_v60 = vpop.f32.mrf.mxu0 }
 0x8ea   :  { %v1262_v61 = vpack.c.bf16 %v1255_v60, %v1252_v54 }
 0x8eb   :  { %v6079_v63 = vpop.f32.mrf.mxu0 }
 0x8ec   :  { %6083 = vmatmul.mubr.msk.bf16.vlgmr.msra.gmra.mxu1 %vm590_vm3, %v1262_v61 }
 0x8ed   :  { %v7323_v2 = vpop.f32.mrf.mxu0  ;;  %6093 = vmatpush3.bf16.msra.mxu1 %v1387_v53  ;;  %6096 = vmatprep.mubr.msk.bf16.mxu1 %vm318_vm1, %v7178_v46 }
 0x8ee   :  { %6094 = vmatprep.subr.bf16.mxu1 %v1386_v62 }
 0x8ef   :  { %v7327_v4 = vpop.f32.mrf.mxu0 }
 0x8f1   :  { %v7331_v7 = vpop.f32.mrf.mxu0  ;;  %6095 = vmatpush3.bf16.msra.mxu1 %v1386_v62 }
 0x8f2   :  { %6108 = vmatprep.subr.bf16.mxu1 %v1515_v3 }
 0x8f3   :  { %v7333_v9 = vpop.f32.mrf.mxu0 }
 0x8f4   :  { %6097 = vmatmul.mubr.msk.bf16.vlgmr.msra.gmra.mxu1 %vm318_vm1, %v7186_v44 }
 0x8f5   :  { %v6106_v10 = vpop.f32.mrf.mxu0  ;;  %6109 = vmatpush3.bf16.msra.mxu1 %v1515_v3  ;;  %6112 = vmatprep.mubr.msk.bf16.mxu1 %vm318_vm1, %v7178_v46 }
 0x8f6   :  { %6110 = vmatprep.subr.bf16.mxu1 %v1514_v8  ;;  %v1503_v15 = vadd.f32 %v6106_v10, %v5569_v11 }
 0x8f7   :  { %v1494_v12 = vpop.f32.mrf.mxu0 }
 0x8f8   :  { %v1495_v19 = vadd.f32 %v5569_v11, %v1494_v12 }
 0x8f9   :  { %v6107_v13 = vpop.f32.mrf.mxu0  ;;  %6111 = vmatpush3.bf16.msra.mxu1 %v1514_v8 }
 0x8fa   :  { %v1506_v16 = vadd.f32 %v6107_v13, %v5569_v11  ;;  %6122 = vmatprep.subr.bf16.mxu1 %v6850_v50 }
 0x8fb   :  { %v1497_v17 = vpop.f32.mrf.mxu0 }
 0x8fc   :  { %v1576_v20 = vpack.c.bf16 %v1506_v16, %v1503_v15  ;;  %v1498_v21 = vadd.f32 %v5569_v11, %v1497_v17  ;;  %6113 = vmatmul.mubr.msk.bf16.vlgmr.msra.gmra.mxu1 %vm318_vm1, %v7186_v44 }
 0x8fd   :  { %6124 = vmatprep.mubr.msk.bf16.mxu1 %vm6851_vm2, %v6850_v50 }
 0x8fe   :  { %v1575_v22 = vpack.c.bf16 %v1498_v21, %v1495_v19  ;;  %v1628_v23 = vsel %vm590_vm3, %v1576_v20, 0 }
 0x8ff   :  { %6123 = vmatpush3.bf16.xpose.msra.mxu1 %v1628_v23 }
 0x900   :  { %v1581_v24 = vsel %vm590_vm3, %v1575_v22, 0  ;;  %6134 = vmatprep.subr.bf16.mxu1 %v6850_v50 }
 0x901   :  { %6117 = vmatpush3.bf16.xpose.msra.mxu0 %v1581_v24 }
 0x902   :  { %6128 = vmatprep.subr.bf16.mxu0 %v6850_v50 }
 0x9ac   :  { %v7349_v25 = vpop.f32.mrf.mxu1 }
 0x9ae   :  { %v7351_v27 = vpop.f32.mrf.mxu1 }
 0x9b0   :  { %v7353_v28 = vpop.f32.mrf.mxu1 }
 0x9b2   :  { %v7355_v30 = vpop.f32.mrf.mxu1 }
 0x9b4   :  { %v6098_v31 = vpop.f32.mrf.mxu1 }
 0x9b5   :  { %v1439_v37 = vadd.f32 %v6098_v31, %v5561_v32 }
 0x9b6   :  { %v1430_v34 = vpop.f32.mrf.mxu1 }
 0x9b7   :  { %v1431_v40 = vadd.f32 %v5561_v32, %v1430_v34 }
 0x9b8   :  { %v6099_v35 = vpop.f32.mrf.mxu1 }
 0x9b9   :  { %v1442_v38 = vadd.f32 %v6099_v35, %v5561_v32 }
 0x9ba   :  { %v1433_v39 = vpop.f32.mrf.mxu1 }
 0x9bb   :  { %v1574_v41 = vpack.c.bf16 %v1442_v38, %v1439_v37  ;;  %v1434_v45 = vadd.f32 %v5561_v32, %v1433_v39 }
 0x9bc   :  { %v6114_v52 = vpop.f32.mrf.mxu1 }
 0x9bd   :  { %v1573_v42 = vpack.c.bf16 %v1434_v45, %v1431_v40  ;;  %6125 = vmatmul.mubr.msk.bf16.vlgmr.msra.gmra.mxu1 %vm590_vm3, %v1574_v41  ;;  %v1567_v43 = vadd.f32 %v6114_v52, %v5577_v47 }
 0x9be   :  { %v1558_v48 = vpop.f32.mrf.mxu1  ;;  %6136 = vmatprep.mubr.msk.bf16.mxu1 %vm6851_vm2, %v6850_v50 }
 0x9bf   :  { %6119 = vmatmul.mubr.msk.bf16.vlgmr.msra.gmra.mxu0 %vm590_vm3, %v1573_v42  ;;  %v1559_v54 = vadd.f32 %v5577_v47, %v1558_v48  ;;  %v5589_v42 = vld [vmem:[%s6897_s3 + $0x70] sm:$0xff] }
 0x9c0   :  { %v6115_v53 = vpop.f32.mrf.mxu1  ;;  %6130 = vmatprep.mubr.msk.bf16.mxu0 %vm6851_vm2, %v6850_v50 }
 0x9c1   :  { %v1570_v49 = vadd.f32 %v6115_v53, %v5577_v47 }
 0x9c2   :  { %v1561_v51 = vpop.f32.mrf.mxu1 }
 0x9c3   :  { %v1722_v55 = vpack.c.bf16 %v1570_v49, %v1567_v43  ;;  %v1562_v56 = vadd.f32 %v5577_v47, %v1561_v51  ;;  %v5590_v47 = vld [vmem:[%s6897_s3 + $0x78] sm:$0xff] }
 0x9c4   :  { %v1884_v48 = vpack.c.bf16 %v5590_v47, %v5589_v42  ;;  %v1375_v42 = vadd.f32 %v7323_v2, %v7349_v25 }
 0x9c5   :  { %v1721_v57 = vpack.c.bf16 %v1562_v56, %v1559_v54  ;;  %6135 = vmatpush3.bf16.msra.mxu1 %v1722_v55 }
 0x9c6   :  { %6146 = vmatprep.subr.bf16.mxu1 %v1884_v48 }
 0x9c7   :  { %6129 = vmatpush3.bf16.msra.mxu0 %v1721_v57 }
 0xa7d   :  { %v1664_v58 = vpop.f32.mrf.mxu1 }
 0xa7e   :  { %v1673_v0 = vmul.f32 0.35355338, %v1664_v58 }
 0xa7f   :  { %v1617_v59 = vpop.f32.mrf.mxu0  ;;  %v6126_v60 = vpop.f32.mrf.mxu1 }
 0xa80   :  { %v1671_v61 = vmul.f32 0.35355338, %v1617_v59  ;;  %v1681_v11 = vsel %vm223_vm0, %v1673_v0, -inf }
 0xa81   :  { %v6120_v62 = vpop.f32.mrf.mxu0  ;;  %v1667_v63 = vpop.f32.mrf.mxu1 }
 0xa82   :  { %v1675_v1 = vsel %vm223_vm0, %v1671_v61, -inf  ;;  %v1674_v10 = vmul.f32 0.35355338, %v1667_v63  ;;  %v5588_v62 = vld [vmem:[%s6897_s3 + $0x68] sm:$0xff] }
 0xa83   :  { %v6127_v3 = vpop.f32.mrf.mxu1  ;;  %1676 = vmax.xlane.f32.xlu0 %v1675_v1  ;;  %v1620_v5 = vpop.f32.mrf.mxu0 }
 0xa84   :  { %v1672_v6 = vmul.f32 0.35355338, %v1620_v5  ;;  %v1684_v13 = vsel %vm223_vm0, %v1674_v10, -inf  ;;  %v5605_v5 = vld [vmem:[%s6917_s24 + $0x70] sm:$0xff] }
 0xa85   :  { %v6121_v8 = vpop.f32.mrf.mxu0 }
 0xa86   :  { %v1678_v12 = vsel %vm223_vm0, %v1672_v6, -inf }
 0xa87   :  { %1682 = vmax.xlane.f32.xlu0 %v1681_v11  ;;  %1679 = vmax.xlane.f32.xlu1 %v1678_v12  ;;  %v5604_v11 = vld [vmem:[%s6917_s24 + $0x68] sm:$0xff] }
 0xa8b   :  { %1685 = vmax.xlane.f32.xlu1 %v1684_v13  ;;  %v5584_v13 = vld [vmem:[%s6927_s6 + $0x10] sm:$0xff] }
 0xb0c   :  { %v1677_v15 = vpop.xlane.xlu0 %1676 }
 0xb0d   :  { %v1687_v16 = vsub.f32 %v1671_v61, %v1677_v15  ;;  %v5587_v61 = vld [vmem:[%s6897_s3 + $0x60] sm:$0xff]  ;;  %v1815_v15 = vpack.c.bf16 %v5584_v13, %v5584_v13  ;;  %s8025_s3 = sld [smem:[#allocation17_spill]] }
 0xb0e   :  { %v1883_v3 = vpack.c.bf16 %v5588_v62, %v5587_v61 }
 0xb0f   :  { %v1691_v17 = vmul.f32 1.442695, %v1687_v16  ;;  %6482 = vmatprep.subr.msk.bf16.mxu0 %vm1270_vm4, %v1815_v15  ;;  %v1823_v16 = vsel %vm1270_vm4, %v1815_v15, 0 }
 0xb10   :  { %v1683_v19 = vpop.xlane.xlu0 %1682  ;;  %v1680_v20 = vpop.xlane.xlu1 %1679 }
 0xb11   :  { %6583 = vpow2.f32 %v1691_v17  ;;  %v1689_v21 = vsub.f32 %v1673_v0, %v1683_v19  ;;  %v1688_v22 = vsub.f32 %v1672_v6, %v1680_v20  ;;  %v5606_v6 = vld [vmem:[%s6917_s24 + $0x78] sm:$0xff]  ;;  %v5597_v17 = vld [vmem:[%s6907_s14 + $0x70] sm:$0xff] }
 0xb12   :  { %v2012_v8 = vpack.c.bf16 %v5606_v6, %v5605_v5  ;;  %v5598_v19 = vld [vmem:[%s6907_s14 + $0x78] sm:$0xff]  ;;  %v5608_v6 = vld [vmem:[%s6922_s30 + $0x3] ss:$0 sm:$0xff]  ;;  %s8030_s30 = sld [smem:[#allocation20_spill]] }
 0xb13   :  { %v1695_v23 = vmul.f32 1.442695, %v1689_v21  ;;  %v1693_v24 = vmul.f32 1.442695, %v1688_v22  ;;  %v1948_v20 = vpack.c.bf16 %v5598_v19, %v5597_v17 }
 0xb14   :  { %v1686_v31 = vpop.xlane.xlu1 %1685 }
 0xb15   :  { %6585 = vpow2.f32 %v1695_v23  ;;  %v1690_v32 = vsub.f32 %v1674_v10, %v1686_v31  ;;  %v5603_v10 = vld [vmem:[%s6917_s24 + $0x60] sm:$0xff]  ;;  %s8029_s24 = sld [smem:[#allocation18_spill]] }
 0xb16   :  { %6587 = vpow2.f32 %v1693_v24  ;;  %v2011_v12 = vpack.c.bf16 %v5604_v11, %v5603_v10 }
 0xb17   :  { %v1697_v34 = vmul.f32 1.442695, %v1690_v32 }
 0xb19   :  { %6589 = vpow2.f32 %v1697_v34 }
 0xb1e   :  { %v6584_v35 = vpop.eup %6583 }
 0xb1f   :  { %v1699_v37 = vsel %vm223_vm0, %v6584_v35, 0.0 }
 0xb20   :  { %1700 = vadd.xlane.f32.xlu0 %v1699_v37  ;;  %v5596_v37 = vld [vmem:[%s6907_s14 + $0x68] sm:$0xff] }
 0xb22   :  { %v6586_v38 = vpop.eup %6585 }
 0xb23   :  { %v6588_v39 = vpop.eup %6587  ;;  %v1705_v40 = vsel %vm223_vm0, %v6586_v38, 0.0 }
 0xb24   :  { %1706 = vadd.xlane.f32.xlu0 %v1705_v40  ;;  %v1702_v41 = vsel %vm223_vm0, %v6588_v39, 0.0 }
 0xb25   :  { %1703 = vadd.xlane.f32.xlu1 %v1702_v41 }
 0xb26   :  { %v6590_v45 = vpop.eup %6589 }
 0xb27   :  { %v1708_v52 = vsel %vm223_vm0, %v6590_v45, 0.0 }
 0xb29   :  { %1709 = vadd.xlane.f32.xlu1 %v1708_v52 }
 0xba9   :  { %v1701_v53 = vpop.xlane.xlu0 %1700 }
 0xbaa   :  { %6591 = vrcp.f32 %v1701_v53 }
 0xbad   :  { %v1707_v43 = vpop.xlane.xlu0 %1706 }
 0xbae   :  { %v1704_v49 = vpop.xlane.xlu1 %1703 }
 0xbaf   :  { %6593 = vrcp.f32 %v1704_v49 }
 0xbb0   :  { %6595 = vrcp.f32 %v1707_v43 }
 0xbb2   :  { %v1710_v51 = vpop.xlane.xlu1 %1709 }
 0xbb3   :  { %6597 = vrcp.f32 %v1710_v51 }
 0xbb7   :  { %v6592_v54 = vpop.eup %6591 }
 0xbb8   :  { %v1715_v56 = vmul.f32 %v6592_v54, %v6584_v35  ;;  %v5595_v35 = vld [vmem:[%s6907_s14 + $0x60] sm:$0xff]  ;;  %s8027_s14 = sld [smem:[#allocation16_spill]] }
 0xbb9   :  { %v1947_v40 = vpack.c.bf16 %v5596_v37, %v5595_v35 }
 0xbbc   :  { %v6594_v55 = vpop.eup %6593 }
 0xbbd   :  { %v1716_v57 = vmul.f32 %v6594_v55, %v6588_v39  ;;  %v6596_v58 = vpop.eup %6595 }
 0xbbe   :  { %v1717_v63 = vmul.f32 %v6596_v58, %v6586_v38 }
 0xbbf   :  { %v1719_v59 = vpack.c.bf16 %v1716_v57, %v1715_v56  ;;  %v5600_v57 = vld [vmem:[%s6912_s19 + $0x3] ss:$0 sm:$0xff]  ;;  %s8028_s19 = sld [smem:[#allocation19_spill]] }
 0xbc0   :  { %v6598_v60 = vpop.eup %6597 }
 0xbc1   :  { %6131 = vmatmul.mubr.msk.bf16.vlgmr.msra.gmra.mxu0 %vm223_vm0, %v1719_v59  ;;  %v1718_v0 = vmul.f32 %v6598_v60, %v6590_v45 }
 0xbc2   :  { %6141 = vmatpush3.bf16.msra.mxu0 %v1823_v16 }
 0xbc3   :  { %v1720_v1 = vpack.c.bf16 %v1718_v0, %v1717_v63  ;;  %6154 = vmatprep.subr.bf16.mxu0 %v1948_v20 }
 0xbc5   :  { %6137 = vmatmul.mubr.msk.bf16.vlgmr.msra.gmra.mxu1 %vm223_vm0, %v1720_v1 }
 0xbc6   :  { %6147 = vmatpush3.bf16.msra.mxu1 %v1884_v48  ;;  %6150 = vmatprep.mubr.msk.bf16.mxu1 %vm318_vm1, %v7178_v46 }
 0xbc7   :  { %6148 = vmatprep.subr.bf16.mxu1 %v1883_v3 }
 0xbca   :  { %6149 = vmatpush3.bf16.msra.mxu1 %v1883_v3  ;;  %v5592_v3 = vld [vmem:[%s6902_s8 + $0x3] ss:$0 sm:$0xff]  ;;  %s8026_s8 = sld [smem:[#allocation15_spill]] }
 0xbcb   :  { %6162 = vmatprep.subr.bf16.mxu1 %v2012_v8 }
 0xbcd   :  { %6151 = vmatmul.mubr.msk.bf16.vlgmr.msra.gmra.mxu1 %vm318_vm1, %v7186_v44 }
 0xbce   :  { %6163 = vmatpush3.bf16.msra.mxu1 %v2012_v8  ;;  %6166 = vmatprep.mubr.msk.bf16.mxu1 %vm318_vm1, %v7178_v46 }
 0xbcf   :  { %6164 = vmatprep.subr.bf16.mxu1 %v2011_v12 }
 0xbd2   :  { %6165 = vmatpush3.bf16.msra.mxu1 %v2011_v12 }
 0xbd3   :  { %6176 = vmatprep.subr.bf16.mxu1 %v6850_v50 }
 0xbd5   :  { %6167 = vmatmul.mubr.msk.bf16.vlgmr.msra.gmra.mxu1 %vm318_vm1, %v7186_v44 }
 0xbd6   :  { %6178 = vmatprep.mubr.msk.bf16.mxu1 %vm6851_vm2, %v6850_v50 }
 0xc81   :  { %v1760_v21 = vpop.f32.mrf.mxu0 }
 0xc83   :  { %v6132_v22 = vpop.f32.mrf.mxu0 }
 0xc85   :  { %v1763_v23 = vpop.f32.mrf.mxu0  ;;  %v1804_v24 = vpop.f32.mrf.mxu1 }
 0xc86   :  { %v1813_v31 = vpack.c.bf16 %v1763_v23, %v1760_v21 }
 0xc87   :  { %v6133_v32 = vpop.f32.mrf.mxu0  ;;  %v6138_v34 = vpop.f32.mrf.mxu1 }
 0xc88   :  { %6142 = vmatprep.mubr.msk.bf16.mxu0 %vm590_vm3, %v1813_v31 }
 0xc89   :  { %v1807_v38 = vpop.f32.mrf.mxu1 }
 0xc8a   :  { %v1814_v39 = vpack.c.bf16 %v1807_v38, %v1804_v24 }
 0xc8b   :  { %v6139_v41 = vpop.f32.mrf.mxu1 }
 0xc8c   :  { %6143 = vmatmul.mubr.msk.bf16.vlgmr.msra.gmra.mxu0 %vm590_vm3, %v1814_v39 }
 0xc8d   :  { %6155 = vmatpush3.bf16.msra.mxu0 %v1948_v20  ;;  %6158 = vmatprep.mubr.msk.bf16.mxu0 %vm318_vm1, %v7178_v46  ;;  %v6152_v45 = vpop.f32.mrf.mxu1  ;;  %v1367_v46 = vadd.f32 %v7327_v4, %v7351_v27 }
 0xc8e   :  { %6156 = vmatprep.subr.bf16.mxu0 %v1947_v40  ;;  %v1936_v12 = vadd.f32 %v6152_v45, %v5592_v3 }
 0xc8f   :  { %v1927_v52 = vpop.f32.mrf.mxu1 }
 0xc90   :  { %v1928_v17 = vadd.f32 %v5592_v3, %v1927_v52 }
 0xc91   :  { %6157 = vmatpush3.bf16.msra.mxu0 %v1947_v40  ;;  %v6153_v47 = vpop.f32.mrf.mxu1 }
 0xc92   :  { %6170 = vmatprep.subr.bf16.mxu0 %v6850_v50  ;;  %v1939_v5 = vadd.f32 %v6153_v47, %v5592_v3 }
 0xc93   :  { %v1930_v49 = vpop.f32.mrf.mxu1 }
 0xc94   :  { %6159 = vmatmul.mubr.msk.bf16.vlgmr.msra.gmra.mxu0 %vm318_vm1, %v7186_v44  ;;  %v1378_v44 = vadd.f32 %v7331_v7, %v7353_v28  ;;  %v1931_v13 = vadd.f32 %v5592_v3, %v1930_v49  ;;  %v2071_v19 = vpack.c.bf16 %v1939_v5, %v1936_v12 }
 0xc95   :  { %6172 = vmatprep.mubr.msk.bf16.mxu0 %vm6851_vm2, %v6850_v50  ;;  %v6168_v2 = vpop.f32.mrf.mxu1 }
 0xc96   :  { %v2064_v15 = vadd.f32 %v6168_v2, %v5608_v6  ;;  %v2070_v22 = vpack.c.bf16 %v1931_v13, %v1928_v17 }
 0xc97   :  { %v2055_v27 = vpop.f32.mrf.mxu1 }
 0xc98   :  { %v2056_v20 = vadd.f32 %v5608_v6, %v2055_v27 }
 0xc99   :  { %v6169_v7 = vpop.f32.mrf.mxu1 }
 0xc9a   :  { %v2067_v11 = vadd.f32 %v6169_v7, %v5608_v6 }
 0xc9b   :  { %v2058_v8 = vpop.f32.mrf.mxu1 }
 0xc9c   :  { %v2059_v16 = vadd.f32 %v5608_v6, %v2058_v8  ;;  %v2219_v21 = vpack.c.bf16 %v2067_v11, %v2064_v15 }
 0xc9e   :  { %v2218_v23 = vpack.c.bf16 %v2059_v16, %v2056_v20 }
 0xd4c   :  { %v6144_v48 = vpop.f32.mrf.mxu0 }
 0xd4d   :  { %v7414_v53 = vadd.f32 %v6144_v48, %v1375_v42 }
 0xd4e   :  { %v1859_v43 = vpop.f32.mrf.mxu0 }
 0xd4f   :  { %v7418_v51 = vadd.f32 %v1859_v43, %v1367_v46 }
 0xd50   :  { %v6145_v54 = vpop.f32.mrf.mxu0 }
 0xd51   :  { %v7420_v55 = vadd.f32 %v6145_v54, %v1378_v44 }
 0xd52   :  { %v7422_v56 = vpop.f32.mrf.mxu0 }
 0xd54   :  { %v6160_v25 = vpop.f32.mrf.mxu0 }
 0xd55   :  { %v2000_v59 = vadd.f32 %v6160_v25, %v5600_v57 }
 0xd56   :  { %v1991_v4 = vpop.f32.mrf.mxu0 }
 0xd57   :  { %v1992_v28 = vadd.f32 %v5600_v57, %v1991_v4 }
 0xd58   :  { %v6161_v58 = vpop.f32.mrf.mxu0 }
 0xd59   :  { %v2003_v60 = vadd.f32 %v6161_v58, %v5600_v57 }
 0xd5a   :  { %v1994_v61 = vpop.f32.mrf.mxu0 }
 0xd5b   :  { %v2073_v62 = vpack.c.bf16 %v2003_v60, %v2000_v59  ;;  %v1995_v63 = vadd.f32 %v5600_v57, %v1994_v61 }
 0xd5d   :  { %v2072_v0 = vpack.c.bf16 %v1995_v63, %v1992_v28  ;;  %v2125_v1 = vsel %vm590_vm3, %v2073_v62, 0 }
 0xd5e   :  { %6177 = vmatpush3.bf16.xpose.msra.mxu1 %v2125_v1 }
 0xd5f   :  { %v2078_v10 = vsel %vm590_vm3, %v2072_v0, 0  ;;  %6188 = vmatprep.subr.bf16.mxu1 %v6850_v50 }
 0xd60   :  { %6171 = vmatpush3.bf16.xpose.msra.mxu0 %v2078_v10 }
 0xd61   :  { %6182 = vmatprep.subr.bf16.mxu0 %v6850_v50 }
 0xd65   :  { %6179 = vmatmul.mubr.msk.bf16.vlgmr.msra.gmra.mxu1 %vm590_vm3, %v2071_v19 }
 0xd66   :  { %6189 = vmatpush3.bf16.msra.mxu1 %v2219_v21  ;;  %6190 = vmatprep.mubr.msk.bf16.mxu1 %vm6851_vm2, %v6850_v50 }
 0xd67   :  { %6173 = vmatmul.mubr.msk.bf16.vlgmr.msra.gmra.mxu0 %vm590_vm3, %v2070_v22 }
 0xd68   :  { %6183 = vmatpush3.bf16.msra.mxu0 %v2218_v23  ;;  %6184 = vmatprep.mubr.msk.bf16.mxu0 %vm6851_vm2, %v6850_v50  ;;  %v5615_v23 = vld [vmem:[%s6927_s6 + $0x18] sm:$0xff]  ;;  %s8031_s6 = sld [smem:[#allocation8_spill]] }
 0xe25   :  { %v2161_v24 = vpop.f32.mrf.mxu1 }
 0xe26   :  { %v2170_v38 = vmul.f32 0.35355338, %v2161_v24  ;;  %v2312_v24 = vpack.c.bf16 %v5615_v23, %v5615_v23 }
 0xe27   :  { %v2114_v31 = vpop.f32.mrf.mxu0  ;;  %v6180_v32 = vpop.f32.mrf.mxu1 }
 0xe28   :  { %v2168_v34 = vmul.f32 0.35355338, %v2114_v31  ;;  %v2178_v47 = vsel %vm223_vm0, %v2170_v38, -inf  ;;  %6483 = vmatprep.subr.msk.bf16.mxu0 %vm1270_vm4, %v2312_v24  ;;  %v2320_v31 = vsel %vm1270_vm4, %v2312_v24, 0 }
 0xe29   :  { %v6174_v35 = vpop.f32.mrf.mxu0  ;;  %v2164_v37 = vpop.f32.mrf.mxu1 }
 0xe2a   :  { %v2172_v39 = vsel %vm223_vm0, %v2168_v34, -inf  ;;  %v2171_v42 = vmul.f32 0.35355338, %v2164_v37 }
 0xe2b   :  { %v6181_v40 = vpop.f32.mrf.mxu1  ;;  %2173 = vmax.xlane.f32.xlu0 %v2172_v39  ;;  %v2117_v41 = vpop.f32.mrf.mxu0 }
 0xe2c   :  { %v2169_v45 = vmul.f32 0.35355338, %v2117_v41  ;;  %v2181_v46 = vsel %vm223_vm0, %v2171_v42, -inf }
 0xe2d   :  { %v6175_v52 = vpop.f32.mrf.mxu0 }
 0xe2e   :  { %v2175_v48 = vsel %vm223_vm0, %v2169_v45, -inf }
 0xe2f   :  { %2179 = vmax.xlane.f32.xlu0 %v2178_v47  ;;  %2176 = vmax.xlane.f32.xlu1 %v2175_v48 }
 0xe33   :  { %2182 = vmax.xlane.f32.xlu1 %v2181_v46  ;;  %v1370_v46 = vadd.f32 %v7333_v9, %v7355_v30 }
 0xeb4   :  { %v2174_v43 = vpop.xlane.xlu0 %2173 }
 0xeb5   :  { %v2184_v44 = vsub.f32 %v2168_v34, %v2174_v43 }
 0xeb7   :  { %v2188_v49 = vmul.f32 1.442695, %v2184_v44 }
 0xeb8   :  { %v2180_v54 = vpop.xlane.xlu0 %2179  ;;  %v2177_v2 = vpop.xlane.xlu1 %2176 }
 0xeb9   :  { %6599 = vpow2.f32 %v2188_v49  ;;  %v2186_v25 = vsub.f32 %v2170_v38, %v2180_v54  ;;  %v2185_v57 = vsub.f32 %v2169_v45, %v2177_v2  ;;  %v1875_v49 = vadd.f32 %v7422_v56, %v1370_v46 }
 0xebb   :  { %v2192_v4 = vmul.f32 1.442695, %v2186_v25  ;;  %v2190_v27 = vmul.f32 1.442695, %v2185_v57  ;;  %v5618_v57 = vld [vmem:[%s6932_s12] ss:$0 sm:$0xff] }
 0xebc   :  { %v2183_v58 = vpop.xlane.xlu1 %2182  ;;  %s8032_s12 = sld [smem:[#allocation21_spill]] }
 0xebd   :  { %6601 = vpow2.f32 %v2192_v4  ;;  %v2187_v59 = vsub.f32 %v2171_v42, %v2183_v58 }
 0xebe   :  { %6603 = vpow2.f32 %v2190_v27 }
 0xebf   :  { %v2194_v60 = vmul.f32 1.442695, %v2187_v59 }
 0xec1   :  { %6605 = vpow2.f32 %v2194_v60 }
 0xec6   :  { %v6600_v61 = vpop.eup %6599 }
 0xec7   :  { %v2196_v7 = vsel %vm223_vm0, %v6600_v61, 0.0 }
 0xec8   :  { %2197 = vadd.xlane.f32.xlu0 %v2196_v7 }
 0xeca   :  { %v6602_v28 = vpop.eup %6601 }
 0xecb   :  { %v6604_v62 = vpop.eup %6603  ;;  %v2202_v63 = vsel %vm223_vm0, %v6602_v28, 0.0 }
 0xecc   :  { %2203 = vadd.xlane.f32.xlu0 %v2202_v63  ;;  %v2199_v0 = vsel %vm223_vm0, %v6604_v62, 0.0 }
 0xecd   :  { %2200 = vadd.xlane.f32.xlu1 %v2199_v0 }
 0xece   :  { %v6606_v1 = vpop.eup %6605 }
 0xecf   :  { %v2205_v3 = vsel %vm223_vm0, %v6606_v1, 0.0 }
 0xed1   :  { %2206 = vadd.xlane.f32.xlu1 %v2205_v3 }
 0xf51   :  { %v2198_v5 = vpop.xlane.xlu0 %2197 }
 0xf52   :  { %6607 = vrcp.f32 %v2198_v5 }
 0xf55   :  { %v2204_v6 = vpop.xlane.xlu0 %2203 }
 0xf56   :  { %v2201_v8 = vpop.xlane.xlu1 %2200 }
 0xf57   :  { %6609 = vrcp.f32 %v2201_v8 }
 0xf58   :  { %6611 = vrcp.f32 %v2204_v6 }
 0xf5a   :  { %v2207_v10 = vpop.xlane.xlu1 %2206 }
 0xf5b   :  { %6613 = vrcp.f32 %v2207_v10 }
 0xf5f   :  { %v6608_v11 = vpop.eup %6607 }
 0xf60   :  { %v2212_v13 = vmul.f32 %v6608_v11, %v6600_v61 }
 0xf64   :  { %v6610_v12 = vpop.eup %6609 }
 0xf65   :  { %v2213_v15 = vmul.f32 %v6610_v12, %v6604_v62  ;;  %v6612_v16 = vpop.eup %6611 }
 0xf66   :  { %v2214_v20 = vmul.f32 %v6612_v16, %v6602_v28 }
 0xf67   :  { %v2216_v17 = vpack.c.bf16 %v2213_v15, %v2212_v13 }
 0xf68   :  { %v6614_v19 = vpop.eup %6613 }
 0xf69   :  { %6185 = vmatmul.mubr.msk.bf16.vlgmr.msra.gmra.mxu0 %vm223_vm0, %v2216_v17  ;;  %v2215_v21 = vmul.f32 %v6614_v19, %v6606_v1  ;;  %v2466_v17 = vld [vmem:[%s8019_s0 + $0x10] sm:$0xff]  ;;  %v2467_v19 = vld [vmem:[%s8019_s0 + $0x18] sm:$0xff] }
 0xf6a   :  { %6195 = vmatpush3.bf16.msra.mxu0 %v2320_v31 }
 0xf6b   :  { %v2217_v22 = vpack.c.bf16 %v2215_v21, %v2214_v20  ;;  %v2471_v20 = vpack.c.bf16 %v2467_v19, %v2466_v17  ;;  %v2464_v21 = vld [vmem:[%s8019_s0] sm:$0xff] }
 0xf6d   :  { %6191 = vmatmul.mubr.msk.bf16.vlgmr.msra.gmra.mxu1 %vm223_vm0, %v2217_v22  ;;  %v2465_v22 = vld [vmem:[%s8019_s0 + $0x8] sm:$0xff]  ;;  %6200 = vmatprep.subr.bf16.mxu1 %v2471_v20  ;;  %s8046_s0 = sld [smem:[#allocation36_spill]] }
 0xf6e   :  { %v2470_v23 = vpack.c.bf16 %v2465_v22, %v2464_v21  ;;  %6201 = vmatpush3.bf16.msra.mxu1 %v2471_v20 }
 0xf70   :  { %6202 = vmatprep.subr.bf16.mxu1 %v2470_v23 }
 0xf72   :  { %6203 = vmatpush3.bf16.msra.mxu1 %v2470_v23 }
 0xf73   :  { %6220 = vmatprep.subr.bf16.mxu1 %v6850_v50 }
0x1029   :  { %v2257_v32 = vpop.f32.mrf.mxu0 }
0x102b   :  { %v6186_v34 = vpop.f32.mrf.mxu0 }
0x102d   :  { %v2260_v35 = vpop.f32.mrf.mxu0  ;;  %v2301_v37 = vpop.f32.mrf.mxu1 }
0x102e   :  { %v2310_v38 = vpack.c.bf16 %v2260_v35, %v2257_v32 }
0x102f   :  { %v6187_v39 = vpop.f32.mrf.mxu0  ;;  %v6192_v40 = vpop.f32.mrf.mxu1 }
0x1030   :  { %6196 = vmatprep.mubr.msk.bf16.mxu0 %vm590_vm3, %v2310_v38 }
0x1031   :  { %v2304_v41 = vpop.f32.mrf.mxu1 }
0x1032   :  { %v2311_v45 = vpack.c.bf16 %v2304_v41, %v2301_v37 }
0x1033   :  { %v6193_v52 = vpop.f32.mrf.mxu1 }
0x1034   :  { %6197 = vmatmul.mubr.msk.bf16.vlgmr.msra.gmra.mxu0 %vm590_vm3, %v2311_v45 }
0x10f4   :  { %v6198_v42 = vpop.f32.mrf.mxu0 }
0x10f5   :  { %v2373_v47 = vadd.f32 %v6198_v42, %v7414_v53 }
0x10f6   :  { %v2356_v48 = vpop.f32.mrf.mxu0 }
0x10f7   :  { %v2371_v43 = vadd.f32 %v2356_v48, %v7418_v51  ;;  %v2377_v54 = vadd.f32 %v2373_v47, %v7132_v26  ;;  %v5619_v48 = vld [vmem:[%s8020_s5] ss:$0 sm:$0xff]  ;;  %s8047_s5 = sld [smem:[#allocation35_spill]] }
0x10f8   :  { %v6199_v44 = vpop.f32.mrf.mxu0 }
0x10f9   :  { %v2375_v2 = vadd.f32 %v2371_v43, %v7134_v29  ;;  %v2374_v25 = vadd.f32 %v6199_v44, %v7420_v55  ;;  %v7463_v58 = vadd.f32 %v5618_v57, %v2377_v54 }
0x10fa   :  { %v2359_v4 = vpop.f32.mrf.mxu0 }
0x10fb   :  { %v7461_v27 = vadd.f32 %v5618_v57, %v2375_v2  ;;  %v2372_v53 = vadd.f32 %v2359_v4, %v1875_v49  ;;  %v2378_v9 = vadd.f32 %v2374_v25, %v7138_v33  ;;  %v2398_v55 = vsel %vm318_vm1, %v7463_v58, 0.0  ;;  %v5620_v2 = vld [vmem:[%s8021_s17] ss:$0 sm:$0xff]  ;;  %s8048_s17 = sld [smem:[#allocation37_spill]] }
0x10fd   :  { %v2376_v30 = vadd.f32 %v2372_v53, %v7142_v36  ;;  %v2392_v51 = vsel %vm318_vm1, %v7461_v27, 0.0  ;;  %v7471_v29 = vadd.f32 %v5618_v57, %v2378_v9 }
0x10fe   :  { %2393 = vadd.xlane.f32.xlu0 %v2392_v51 }
0x10ff   :  { %v7469_v26 = vadd.f32 %v5618_v57, %v2376_v30  ;;  %v2401_v33 = vsel %vm318_vm1, %v7471_v29, 0.0 }
0x1101   :  { %v2395_v56 = vsel %vm318_vm1, %v7469_v26, 0.0 }
0x1102   :  { %2399 = vadd.xlane.f32.xlu0 %v2398_v55  ;;  %2396 = vadd.xlane.f32.xlu1 %v2395_v56 }
0x1106   :  { %2402 = vadd.xlane.f32.xlu1 %v2401_v33 }
0x1187   :  { %v2394_v36 = vpop.xlane.xlu0 %2393 }
0x1188   :  { %v2404_v59 = vmul.f32 0.03125, %v2394_v36 }
0x118a   :  { %v2408_v60 = vsub.f32 %v7461_v27, %v2404_v59  ;;  %v2576_v59 = vld [vmem:[%s8022_s21 + $0x30] sm:$0xff] }
0x118b   :  { %v2400_v61 = vpop.xlane.xlu0 %2399  ;;  %v2397_v7 = vpop.xlane.xlu1 %2396 }
0x118c   :  { %v2406_v28 = vmul.f32 0.03125, %v2400_v61  ;;  %v2405_v62 = vmul.f32 0.03125, %v2397_v7  ;;  %v2412_v63 = vmul.f32 %v2408_v60, %v2408_v60  ;;  %v2574_v7 = vld [vmem:[%s8022_s21 + $0x20] sm:$0xff] }
0x118e   :  { %v2410_v0 = vsub.f32 %v7463_v58, %v2406_v28  ;;  %v2409_v1 = vsub.f32 %v7469_v26, %v2405_v62  ;;  %v2416_v3 = vsel %vm318_vm1, %v2412_v63, 0.0  ;;  %v2575_v28 = vld [vmem:[%s8022_s21 + $0x28] sm:$0xff]  ;;  %v2572_v63 = vld [vmem:[%s8022_s21 + $0x10] sm:$0xff] }
0x118f   :  { %2417 = vadd.xlane.f32.xlu0 %v2416_v3  ;;  %v2403_v5 = vpop.xlane.xlu1 %2402  ;;  %v2582_v62 = vpack.c.bf16 %v2575_v28, %v2574_v7  ;;  %v2570_v3 = vld [vmem:[%s8022_s21] sm:$0xff] }
0x1190   :  { %v2407_v6 = vmul.f32 0.03125, %v2403_v5  ;;  %v2414_v8 = vmul.f32 %v2410_v0, %v2410_v0  ;;  %v2413_v10 = vmul.f32 %v2409_v1, %v2409_v1  ;;  %v2571_v5 = vld [vmem:[%s8022_s21 + $0x8] sm:$0xff] }
0x1192   :  { %v2411_v11 = vsub.f32 %v7471_v29, %v2407_v6  ;;  %v2422_v12 = vsel %vm318_vm1, %v2414_v8, 0.0  ;;  %v2419_v13 = vsel %vm318_vm1, %v2413_v10, 0.0  ;;  %v2580_v6 = vpack.c.bf16 %v2571_v5, %v2570_v3  ;;  %v5621_v8 = vld [vmem:[%s8023_s25] ss:$0 sm:$0xff]  ;;  %s8050_s25 = sld [smem:[#allocation38_spill]] }
0x1193   :  { %2423 = vadd.xlane.f32.xlu0 %v2422_v12  ;;  %2420 = vadd.xlane.f32.xlu1 %v2419_v13 }
0x1194   :  { %v2415_v15 = vmul.f32 %v2411_v11, %v2411_v11 }
0x1196   :  { %v2425_v16 = vsel %vm318_vm1, %v2415_v15, 0.0 }
0x1197   :  { %2426 = vadd.xlane.f32.xlu1 %v2425_v16 }
0x1218   :  { %v2418_v24 = vpop.xlane.xlu0 %2417 }
0x1219   :  { %v2428_v31 = vmul.f32 0.03125, %v2418_v24 }
0x121b   :  { %v2432_v32 = vadd.f32 1e-05, %v2428_v31 }
0x121c   :  { %v2424_v34 = vpop.xlane.xlu0 %2423  ;;  %v2421_v35 = vpop.xlane.xlu1 %2420 }
0x121d   :  { %6615 = vrsqrt.f32 %v2432_v32  ;;  %v2430_v37 = vmul.f32 0.03125, %v2424_v34  ;;  %v2429_v38 = vmul.f32 0.03125, %v2421_v35 }
0x121f   :  { %v2434_v39 = vadd.f32 1e-05, %v2430_v37  ;;  %v2433_v40 = vadd.f32 1e-05, %v2429_v38 }
0x1220   :  { %v2427_v41 = vpop.xlane.xlu1 %2426 }
0x1221   :  { %6617 = vrsqrt.f32 %v2434_v39  ;;  %v2431_v45 = vmul.f32 0.03125, %v2427_v41 }
0x1222   :  { %6619 = vrsqrt.f32 %v2433_v40 }
0x1223   :  { %v2435_v52 = vadd.f32 1e-05, %v2431_v45 }
0x1225   :  { %6621 = vrsqrt.f32 %v2435_v52 }
0x122a   :  { %v6616_v42 = vpop.eup %6615 }
0x122b   :  { %v2440_v47 = vmul.f32 %v6616_v42, %v2408_v60  ;;  %v2577_v60 = vld [vmem:[%s8022_s21 + $0x38] sm:$0xff] }
0x122c   :  { %v2583_v61 = vpack.c.bf16 %v2577_v60, %v2576_v59 }
0x122d   :  { %v2450_v54 = vmul.f32 %v5619_v48, %v2440_v47 }
0x122e   :  { %v6618_v46 = vpop.eup %6617  ;;  %6208 = vmatprep.subr.bf16.mxu0 %v2583_v61 }
0x122f   :  { %v6620_v43 = vpop.eup %6619  ;;  %v2442_v44 = vmul.f32 %v6618_v46, %v2410_v0  ;;  %v2460_v9 = vadd.f32 %v5620_v2, %v2450_v54  ;;  %6209 = vmatpush3.bf16.msra.mxu0 %v2583_v61  ;;  %v2573_v0 = vld [vmem:[%s8022_s21 + $0x18] sm:$0xff]  ;;  %s8049_s21 = sld [smem:[#allocation40_spill]] }
0x1230   :  { %v2441_v49 = vmul.f32 %v6620_v43, %v2409_v1  ;;  %6210 = vmatprep.subr.bf16.mxu0 %v2582_v62  ;;  %v2581_v1 = vpack.c.bf16 %v2573_v0, %v2572_v63  ;;  %v5626_v0 = vld [vmem:[%s8024_s29] ss:$0 sm:$0xff]  ;;  %s8051_s29 = sld [smem:[#allocation39_spill]] }
0x1231   :  { %v2452_v53 = vmul.f32 %v5619_v48, %v2442_v44 }
0x1232   :  { %v6622_v25 = vpop.eup %6621  ;;  %v2451_v57 = vmul.f32 %v5619_v48, %v2441_v49 }
0x1233   :  { %v2443_v4 = vmul.f32 %v6622_v25, %v2411_v11  ;;  %v2462_v56 = vadd.f32 %v5620_v2, %v2452_v53  ;;  %6211 = vmatpush3.bf16.msra.mxu0 %v2582_v62 }
0x1234   :  { %v2461_v30 = vadd.f32 %v5620_v2, %v2451_v57  ;;  %6212 = vmatprep.subr.bf16.mxu0 %v2581_v1 }
0x1235   :  { %v2453_v51 = vmul.f32 %v5619_v48, %v2443_v4 }
0x1236   :  { %v2468_v55 = vpack.c.bf16 %v2461_v30, %v2460_v9 }
0x1237   :  { %v2463_v33 = vadd.f32 %v5620_v2, %v2453_v51  ;;  %6213 = vmatpush3.bf16.msra.mxu0 %v2581_v1 }
0x1238   :  { %6204 = vmatprep.mubr.msk.bf16.mxu1 %vm318_vm1, %v2468_v55  ;;  %6214 = vmatprep.subr.bf16.mxu0 %v2580_v6 }
0x1239   :  { %v2469_v36 = vpack.c.bf16 %v2463_v33, %v2462_v56 }
0x123b   :  { %6205 = vmatmul.mubr.msk.bf16.vlgmr.msra.gmra.mxu1 %vm318_vm1, %v2469_v36  ;;  %6215 = vmatpush3.bf16.msra.mxu0 %v2580_v6 }
0x123c   :  { %6224 = vmatprep.mubr.msk.bf16.mxu1 %vm6851_vm2, %v6850_v50 }
0x12fb   :  { %v6206_v10 = vpop.f32.mrf.mxu1 }
0x12fc   :  { %v2528_v11 = vadd.f32 %v6206_v10, %v5621_v8 }
0x12fd   :  { %v2519_v12 = vpop.f32.mrf.mxu1 }
0x12fe   :  { %v2536_v13 = vmul.f32 %v2528_v11, %v2528_v11  ;;  %v2520_v15 = vadd.f32 %v5621_v8, %v2519_v12 }
0x12ff   :  { %v6207_v16 = vpop.f32.mrf.mxu1 }
0x1300   :  { %v2540_v17 = vmul.f32 %v2536_v13, %v2528_v11  ;;  %v2534_v19 = vmul.f32 %v2520_v15, %v2520_v15  ;;  %v2531_v20 = vadd.f32 %v6207_v16, %v5621_v8 }
0x1301   :  { %v2522_v21 = vpop.f32.mrf.mxu1 }
0x1302   :  { %v2544_v22 = vmul.f32 0.044715, %v2540_v17  ;;  %v2538_v23 = vmul.f32 %v2534_v19, %v2520_v15  ;;  %v2537_v24 = vmul.f32 %v2531_v20, %v2531_v20  ;;  %v2523_v31 = vadd.f32 %v5621_v8, %v2522_v21 }
0x1304   :  { %v2548_v32 = vadd.f32 %v2544_v22, %v2528_v11  ;;  %v2542_v34 = vmul.f32 0.044715, %v2538_v23  ;;  %v2541_v35 = vmul.f32 %v2537_v24, %v2531_v20  ;;  %v2535_v37 = vmul.f32 %v2523_v31, %v2523_v31 }
0x1306   :  { %v2552_v38 = vmul.f32 0.7978846, %v2548_v32  ;;  %v2546_v39 = vadd.f32 %v2542_v34, %v2520_v15  ;;  %v2545_v40 = vmul.f32 0.044715, %v2541_v35  ;;  %v2539_v41 = vmul.f32 %v2535_v37, %v2523_v31 }
0x1308   :  { %v2550_v45 = vmul.f32 0.7978846, %v2546_v39  ;;  %v2549_v52 = vadd.f32 %v2545_v40, %v2531_v20  ;;  %v2543_v42 = vmul.f32 0.044715, %v2539_v41  ;;  %6623 = vtanh.f32 %v2552_v38 }
0x130a   :  { %6625 = vtanh.f32 %v2550_v45  ;;  %v2553_v47 = vmul.f32 0.7978846, %v2549_v52  ;;  %v2547_v48 = vadd.f32 %v2543_v42, %v2523_v31  ;;  %v2752_v45 = vld [vmem:[%s8025_s3 + $0x10] sm:$0xff]  ;;  %v2753_v52 = vld [vmem:[%s8025_s3 + $0x18] sm:$0xff]  ;;  %v2750_v42 = vld [vmem:[%s8025_s3] sm:$0xff] }
0x130c   :  { %6627 = vtanh.f32 %v2553_v47  ;;  %v2551_v46 = vmul.f32 0.7978846, %v2547_v48  ;;  %v2757_v47 = vpack.c.bf16 %v2753_v52, %v2752_v45  ;;  %v2751_v48 = vld [vmem:[%s8025_s3 + $0x8] sm:$0xff]  ;;  %s6852_s3 = smov [#allocation2]  }
0x130e   :  { %6629 = vtanh.f32 %v2551_v46  ;;  %6221 = vmatpush3.bf16.msra.mxu1 %v2757_v47  ;;  %v2756_v46 = vpack.c.bf16 %v2751_v48, %v2750_v42  ;;  %v2815_v48 = vld [vmem:[%s8028_s19] sm:$0xff] }
0x130f   :  { %6222 = vmatprep.subr.bf16.mxu1 %v6850_v50 }
0x1312   :  { %6223 = vmatpush3.bf16.msra.mxu1 %v2756_v46  ;;  %v2816_v46 = vld [vmem:[%s8028_s19 + $0x8] sm:$0xff] }
0x1313   :  { %6228 = vmatprep.subr.bf16.mxu1 %v6850_v50 }
0x1315   :  { %v6624_v43 = vpop.eup %6623 }
0x1316   :  { %v2560_v2 = vadd.f32 1.0, %v6624_v43 }
0x1317   :  { %v6626_v44 = vpop.eup %6625 }
0x1318   :  { %v2558_v49 = vadd.f32 1.0, %v6626_v44  ;;  %v2564_v30 = vmul.f32 0.5, %v2560_v2 }
0x1319   :  { %v6628_v54 = vpop.eup %6627 }
0x131a   :  { %v2561_v25 = vadd.f32 1.0, %v6628_v54  ;;  %v2562_v4 = vmul.f32 0.5, %v2558_v49  ;;  %v2568_v36 = vmul.f32 %v2564_v30, %v2528_v11 }
0x131b   :  { %v6630_v57 = vpop.eup %6629 }
0x131c   :  { %v2565_v53 = vmul.f32 0.5, %v2561_v25  ;;  %v2559_v9 = vadd.f32 1.0, %v6630_v57  ;;  %v2566_v56 = vmul.f32 %v2562_v4, %v2520_v15 }
0x131e   :  { %v2563_v51 = vmul.f32 0.5, %v2559_v9  ;;  %v2569_v55 = vmul.f32 %v2565_v53, %v2531_v20 }
0x1320   :  { %v2567_v33 = vmul.f32 %v2563_v51, %v2523_v31  ;;  %v2579_v60 = vpack.c.bf16 %v2569_v55, %v2568_v36 }
0x1322   :  { %v2578_v59 = vpack.c.bf16 %v2567_v33, %v2566_v56  ;;  %v5627_v56 = vld [vmem:[%s8026_s8] ss:$0 sm:$0xff]  ;;  %s5431_s8 = sshll.u32 %s6852_s3, 4  ;;  %s5432_s8 = int_to_ptr.vmem [resolvable:$true] %s5431_s8 }
0x1323   :  { %p6760_p1 = scmp.lt.s32.totalorder %s5432_s8, %s5432_s8 }
0x1324   :  { %6216 = vmatprep.mubr.msk.bf16.mxu0 %vm2584_vm5, %v2578_v59 }
0x1325   :  { %6217 = vmatmul.mubr.msk.bf16.vlgmr.msra.gmra.mxu0 %vm2584_vm5, %v2579_v60 }
0x13e5   :  { %v6218_v61 = vpop.f32.mrf.mxu0 }
0x13e6   :  { %v2642_v28 = vadd.f32 %v6218_v61, %v7463_v58  ;;  %v5628_v61 = vld [vmem:[%s8027_s14] ss:$0 sm:$0xff]  ;;  %s6853_s14 = smov [#allocation4]  }
0x13e7   :  { %v2625_v7 = vpop.f32.mrf.mxu0 }
0x13e8   :  { %v2640_v62 = vadd.f32 %v2625_v7, %v7461_v27  ;;  %v2653_v10 = vadd.f32 %v5626_v0, %v2642_v28 }
0x13e9   :  { %v6219_v63 = vpop.f32.mrf.mxu0 }
0x13ea   :  { %v2651_v1 = vadd.f32 %v5626_v0, %v2640_v62  ;;  %v2643_v5 = vadd.f32 %v6219_v63, %v7471_v29  ;;  %v2663_v12 = vsel %vm318_vm1, %v2653_v10, 0.0 }
0x13eb   :  { %v2628_v3 = vpop.f32.mrf.mxu0 }
0x13ec   :  { %v2641_v6 = vadd.f32 %v2628_v3, %v7469_v26  ;;  %v2657_v8 = vsel %vm318_vm1, %v2651_v1, 0.0  ;;  %v2654_v58 = vadd.f32 %v5626_v0, %v2643_v5 }
0x13ed   :  { %2658 = vadd.xlane.f32.xlu0 %v2657_v8 }
0x13ee   :  { %v2652_v11 = vadd.f32 %v5626_v0, %v2641_v6  ;;  %v2666_v27 = vsel %vm318_vm1, %v2654_v58, 0.0 }
0x13f0   :  { %v2660_v13 = vsel %vm318_vm1, %v2652_v11, 0.0 }
0x13f1   :  { %2664 = vadd.xlane.f32.xlu0 %v2663_v12  ;;  %2661 = vadd.xlane.f32.xlu1 %v2660_v13 }
0x13f5   :  { %2667 = vadd.xlane.f32.xlu1 %v2666_v27 }
0x1476   :  { %v2659_v15 = vpop.xlane.xlu0 %2658 }
0x1477   :  { %v2669_v16 = vmul.f32 0.03125, %v2659_v15 }
0x1479   :  { %v2673_v29 = vsub.f32 %v2651_v1, %v2669_v16 }
0x147a   :  { %v2665_v17 = vpop.xlane.xlu0 %2664  ;;  %v2662_v26 = vpop.xlane.xlu1 %2661 }
0x147b   :  { %v2671_v19 = vmul.f32 0.03125, %v2665_v17  ;;  %v2670_v20 = vmul.f32 0.03125, %v2662_v26  ;;  %v2677_v21 = vmul.f32 %v2673_v29, %v2673_v29 }
0x147d   :  { %v2675_v22 = vsub.f32 %v2653_v10, %v2671_v19  ;;  %v2674_v23 = vsub.f32 %v2652_v11, %v2670_v20  ;;  %v2681_v24 = vsel %vm318_vm1, %v2677_v21, 0.0 }
0x147e   :  { %2682 = vadd.xlane.f32.xlu0 %v2681_v24  ;;  %v2668_v31 = vpop.xlane.xlu1 %2667 }
0x147f   :  { %v2672_v32 = vmul.f32 0.03125, %v2668_v31  ;;  %v2679_v34 = vmul.f32 %v2675_v22, %v2675_v22  ;;  %v2678_v35 = vmul.f32 %v2674_v23, %v2674_v23 }
0x1481   :  { %v2676_v37 = vsub.f32 %v2654_v58, %v2672_v32  ;;  %v2687_v38 = vsel %vm318_vm1, %v2679_v34, 0.0  ;;  %v2684_v39 = vsel %vm318_vm1, %v2678_v35, 0.0 }
0x1482   :  { %2688 = vadd.xlane.f32.xlu0 %v2687_v38  ;;  %2685 = vadd.xlane.f32.xlu1 %v2684_v39  ;;  %v2817_v39 = vld [vmem:[%s8028_s19 + $0x10] sm:$0xff] }
0x1483   :  { %v2680_v40 = vmul.f32 %v2676_v37, %v2676_v37 }
0x1485   :  { %v2690_v41 = vsel %vm318_vm1, %v2680_v40, 0.0  ;;  %v2818_v40 = vld [vmem:[%s8028_s19 + $0x18] sm:$0xff]  ;;  %s5441_s19 = sshll.u32 %s6853_s14, 4  ;;  %s5442_s19 = int_to_ptr.vmem [resolvable:$true] %s5441_s19 }
0x1486   :  { %2691 = vadd.xlane.f32.xlu1 %v2690_v41  ;;  %v2820_v42 = vpack.c.bf16 %v2818_v40, %v2817_v39 }
0x1507   :  { %v2683_v43 = vpop.xlane.xlu0 %2682 }
0x1508   :  { %v2693_v44 = vmul.f32 0.03125, %v2683_v43  ;;  %v2819_v43 = vpack.c.bf16 %v2816_v46, %v2815_v48  ;;  %v3061_v48 = vld [vmem:[%s8034_s15 + $0x18] sm:$0xff] }
0x150a   :  { %v2697_v49 = vadd.f32 1e-05, %v2693_v44  ;;  %v5629_v44 = vld [vmem:[%s8029_s24] ss:$0 sm:$0xff]  ;;  %s6755_s24 = scalar_lea.vmem %s5432_s8, 32 }
0x150b   :  { %v2689_v54 = vpop.xlane.xlu0 %2688  ;;  %v2686_v2 = vpop.xlane.xlu1 %2685  ;;  %p6756_p0 = scmp.ne.s32.totalorder %s5432_s8, %s6755_s24  ;;  %p6761_p2 = scmp.lt.s32.totalorder %s6755_s24, %s6755_s24 }
0x150c   :  { %6631 = vrsqrt.f32 %v2697_v49  ;;  %v2695_v25 = vmul.f32 0.03125, %v2689_v54  ;;  %v2694_v57 = vmul.f32 0.03125, %v2686_v2 }
0x150d   :  { %p6762_p3 = por %p6761_p2, %p6760_p1 }
0x150e   :  { %v2699_v4 = vadd.f32 1e-05, %v2695_v25  ;;  %v2698_v53 = vadd.f32 1e-05, %v2694_v57 }
0x150f   :  { %v2692_v9 = vpop.xlane.xlu1 %2691  ;;  %p6763_p4 = pnand %p6762_p3, %p6756_p0 }
0x1510   :  { %6633 = vrsqrt.f32 %v2699_v4  ;;  %v2696_v30 = vmul.f32 0.03125, %v2692_v9  ;;  %v5631_v4 = vld [vmem:[%s8030_s30] ss:$0 sm:$0xff] }
0x1511   :  { %6635 = vrsqrt.f32 %v2698_v53 }
0x1512   :  { %v2700_v51 = vadd.f32 1e-05, %v2696_v30 }
0x1514   :  { %6637 = vrsqrt.f32 %v2700_v51 }
0x1519   :  { %v6632_v55 = vpop.eup %6631 }
0x151a   :  { %v2705_v33 = vmul.f32 %v6632_v55, %v2673_v29 }
0x151c   :  { %v2715_v59 = vmul.f32 %v5627_v56, %v2705_v33 }
0x151d   :  { %v6634_v36 = vpop.eup %6633 }
0x151e   :  { %v6636_v60 = vpop.eup %6635  ;;  %v2707_v7 = vmul.f32 %v6634_v36, %v2675_v22  ;;  %v2725_v0 = vadd.f32 %v5628_v61, %v2715_v59  ;;  %v2868_v36 = vld [vmem:[%s8031_s6] sm:$0x3] }
0x151f   :  { %v2706_v28 = vmul.f32 %v6636_v60, %v2674_v23 }
0x1520   :  { %v2717_v62 = vmul.f32 %v5627_v56, %v2707_v7  ;;  %v2729_v10 = vsel %vm318_vm1, %v2725_v0, 0.0  ;;  %v6753_v7 = vld [vmem:[%s6867_s9] sm:$0x3]  ;;  %s8033_s9 = sld [smem:[#allocation24_spill]] }
0x1521   :  { %v6638_v63 = vpop.eup %6637  ;;  %v2716_v1 = vmul.f32 %v5627_v56, %v2706_v28 }
0x1522   :  { %v2708_v3 = vmul.f32 %v6638_v63, %v2676_v37  ;;  %v2727_v6 = vadd.f32 %v5628_v61, %v2717_v62 }
0x1523   :  { %v2726_v5 = vadd.f32 %v5628_v61, %v2716_v1  ;;  %v2899_v1 = vld [vmem:[%s8032_s12 + $0x8] sm:$0xff] }
0x1524   :  { %v2718_v8 = vmul.f32 %v5627_v56, %v2708_v3  ;;  %v2738_v58 = vsel %vm318_vm1, %v2727_v6, 0.0  ;;  %v2898_v3 = vld [vmem:[%s8032_s12] sm:$0xff] }
0x1525   :  { %v2730_v11 = vsel %vm318_vm1, %v2726_v5, 0.0 }
0x1526   :  { %v2731_v12 = vadd.f32 %v2730_v11, %v2729_v10  ;;  %v2728_v13 = vadd.f32 %v5628_v61, %v2718_v8 }
0x1528   :  { %v2739_v27 = vsel %vm318_vm1, %v2728_v13, 0.0  ;;  %v2732_v15 = vrot.slane %v2731_v12, 4 }
0x1529   :  { %v2740_v16 = vadd.f32 %v2739_v27, %v2738_v58 }
0x152a   :  { %v2733_v29 = vadd.f32 %v2732_v15, %v2731_v12 }
0x152b   :  { %v2741_v17 = vrot.slane %v2740_v16, 4 }
0x152c   :  { %v2734_v26 = vrot.slane %v2733_v29, 2 }
0x152d   :  { %v2742_v19 = vadd.f32 %v2741_v17, %v2740_v16 }
0x152e   :  { %v2735_v20 = vadd.f32 %v2734_v26, %v2733_v29 }
0x152f   :  { %v2743_v21 = vrot.slane %v2742_v19, 2 }
0x1530   :  { %v2736_v22 = vrot.slane %v2735_v20, 1 }
0x1531   :  { %v2744_v23 = vadd.f32 %v2743_v21, %v2742_v19 }
0x1532   :  { %v2737_v24 = vadd.f32 %v2736_v22, %v2735_v20 }
0x1533   :  { %v2745_v31 = vrot.slane %v2744_v23, 1 }
0x1534   :  { %v2748_v32 = vmul.f32 0.0625, %v2737_v24 }
0x1535   :  { %v2746_v34 = vadd.f32 %v2745_v31, %v2744_v23 }
0x1536   :  { %v2754_v37 = vpack.c.bf16 %v2748_v32, %v2748_v32 }
0x1537   :  { %v2749_v35 = vmul.f32 0.0625, %v2746_v34 }
0x1538   :  { %v2767_v41 = vunpack.c.l.b16 %v2754_v37 }
0x1539   :  { %v2755_v38 = vpack.c.bf16 %v2749_v35, %v2749_v35 }
0x153b   :  { %v2768_v45 = vunpack.c.l.b16 %v2755_v38 }
0x153d   :  { %v2770_v52 = vsel %vm2769_vm6, %v2768_v45, %v2767_v41  ;;  %v2990_v45 = vld [vmem:[%s8033_s9 + $0x10] sm:$0xff] }
0x153e   :  { %v2771_v47 = vpack.c.b16 %v2770_v52, %v2770_v52  ;;  %v2991_v52 = vld [vmem:[%s8033_s9 + $0x18] sm:$0xff] }
0x1540   :  { %6225 = vmatmul.mubr.msk.bf16.vlgmr.msra.gmra.mxu1 %vm318_vm1, %v2771_v47 }
0x1541   :  { %6229 = vmatpush3.bf16.msra.mxu1 %v2820_v42  ;;  %6232 = vmatprep.mubr.msk.bf16.mxu1 %vm6851_vm2, %v6850_v50  ;;  %v3060_v42 = vld [vmem:[%s8034_s15 + $0x10] sm:$0xff] }
0x1542   :  { %6230 = vmatprep.subr.bf16.mxu1 %v6850_v50  ;;  %v3063_v46 = vpack.c.bf16 %v3061_v48, %v3060_v42 }
0x1545   :  { %6231 = vmatpush3.bf16.msra.mxu1 %v2819_v43  ;;  %v2988_v43 = vld [vmem:[%s8033_s9] sm:$0xff] }
0x1546   :  { %6244 = vmatprep.subr.bf16.mxu1 %v3063_v46 }
0x1548   :  { %6233 = vmatmul.mubr.msk.bf16.vlgmr.msra.gmra.mxu1 %vm318_vm1, %v2771_v47  ;;  %v2995_v47 = vpack.c.bf16 %v2991_v52, %v2990_v45 }
0x1549   :  { %6245 = vmatpush3.bf16.msra.mxu1 %v3063_v46 }
0x154a   :  { %6236 = vmatprep.subr.bf16.mxu0 %v2995_v47 }
0x154b   :  { %6237 = vmatpush3.bf16.msra.mxu0 %v2995_v47 }
0x1600   :  { %v2809_v49 = vpop.f32.mrf.mxu1 }
0x1601   :  { %v2810_v54 = vadd.f32 %v5629_v44, %v2809_v49  ;;  %v2989_v44 = vld [vmem:[%s8033_s9 + $0x8] sm:$0xff]  ;;  %v3058_v49 = vld [vmem:[%s8034_s15] sm:$0xff] }
0x1602   :  { %v6226_v2 = vpop.f32.mrf.mxu1 }
0x1603   :  { %5421 = vst.msk [vmem:[#allocation2] sm:$0x3] %vm5420_vm7, %v2810_v54  ;;  %v3059_v2 = vld [vmem:[%s8034_s15 + $0x8] sm:$0xff] }
0x1604   :  { %v2812_v25 = vpop.f32.mrf.mxu1 }
0x1605   :  { %v3062_v25 = vpack.c.bf16 %v3059_v2, %v3058_v49  ;;  %v5635_v49 = vld [vmem:[%s8039_s26] ss:$0 sm:$0xff] }
0x1606   :  { %v6227_v57 = vpop.f32.mrf.mxu1 }
0x1607   :  { %6246 = vmatprep.subr.bf16.mxu1 %v3062_v25  ;;  %v3122_v57 = vld [vmem:[%s8035_s16 + $0x10] sm:$0xff] }
0x1608   :  { %v2862_v53 = vpop.f32.mrf.mxu1  ;;  %6247 = vmatpush3.bf16.msra.mxu1 %v3062_v25 }
0x1609   :  { %v2863_v9 = vadd.f32 %v5631_v4, %v2862_v53  ;;  %v3123_v4 = vld [vmem:[%s8035_s16 + $0x18] sm:$0xff]  ;;  %6260 = vmatprep.subr.bf16.mxu1 %v6850_v50 }
0x160a   :  { %v6234_v30 = vpop.f32.mrf.mxu1  ;;  %v3125_v53 = vpack.c.bf16 %v3123_v4, %v3122_v57 }
0x160b   :  { %v2869_v51 = vmul.f32 0.5, %v2863_v9  ;;  %5422 = vst.msk [vmem:[#allocation4] sm:$0x3] %vm5420_vm7, %v2863_v9 }
0x160c   :  { %v2865_v55 = vpop.f32.mrf.mxu1 }
0x160d   :  { %v2870_v56 = vmul.f32 1.442695, %v2869_v51 }
0x160e   :  { %v6235_v33 = vpop.f32.mrf.mxu1 }
0x160f   :  { %6639 = vpow2.f32 %v2870_v56 }
0x161c   :  { %v6640_v59 = vpop.eup %6639 }
0x161d   :  { %v2872_v60 = vmul.f32 %v6640_v59, %v2868_v36 }
0x161f   :  { %v2873_v61 = vadd.f32 %v2872_v60, %v2810_v54  ;;  %v2994_v54 = vpack.c.bf16 %v2989_v44, %v2988_v43 }
0x1621   :  { %v2874_v28 = vadd.f32 %v6753_v7, %v2873_v61  ;;  %6238 = vmatprep.subr.bf16.mxu0 %v2994_v54 }
0x1622   :  { %6239 = vmatpush3.bf16.msra.mxu0 %v2994_v54  ;;  %v5641_v54 = vld [vmem:[%s8040_s28] ss:$0 sm:$0xff] }
0x1623   :  { %v2882_v62 = vrot.slane %v2874_v28, %v7122_v14  ;;  %6252 = vmatprep.subr.bf16.mxu0 %v3125_v53 }
0x1625   :  { %v2890_v63 = vrot.slane %v2882_v62, %v7122_v14  ;;  %v2883_v0 = vcombine.high %v2882_v62, %v2882_v62 }
0x1627   :  { %v2903_v5 = vrot.slane %v2890_v63, %v7126_v18  ;;  %v2897_v6 = vrot.slane %v2883_v0, %v7122_v14  ;;  %v5633_v63 = vld [vmem:[%s8036_s18] ss:$0 sm:$0xff] }
0x1629   :  { %v7553_v8 = vadd.f32 %v2903_v5, %v2899_v1  ;;  %v7555_v10 = vadd.f32 %v2903_v5, %v2898_v3  ;;  %v2907_v11 = vrot.slane %v2897_v6, %v7126_v18 }
0x162b   :  { %v2919_v12 = vsel %vm318_vm1, %v7553_v8, 0.0  ;;  %v2916_v13 = vsel %vm318_vm1, %v7555_v10, 0.0  ;;  %v7562_v58 = vadd.f32 %v2907_v11, %v2899_v1  ;;  %v7564_v27 = vadd.f32 %v2907_v11, %v2898_v3  ;;  %v5634_v3 = vld [vmem:[%s8037_s22] ss:$0 sm:$0xff] }
0x162c   :  { %2920 = vadd.xlane.f32.xlu1 %v2919_v12  ;;  %2917 = vadd.xlane.f32.xlu0 %v2916_v13 }
0x162d   :  { %v2925_v14 = vsel %vm318_vm1, %v7562_v58, 0.0  ;;  %v2922_v15 = vsel %vm318_vm1, %v7564_v27, 0.0 }
0x1630   :  { %2926 = vadd.xlane.f32.xlu1 %v2925_v14  ;;  %2923 = vadd.xlane.f32.xlu0 %v2922_v15 }
0x16b5   :  { %v2921_v18 = vpop.xlane.xlu1 %2920  ;;  %v2918_v16 = vpop.xlane.xlu0 %2917 }
0x16b6   :  { %v2929_v29 = vmul.f32 0.03125, %v2921_v18  ;;  %v2928_v17 = vmul.f32 0.03125, %v2918_v16 }
0x16b8   :  { %v7571_v26 = vsub.f32 %v7553_v8, %v2929_v29  ;;  %v7574_v19 = vsub.f32 %v7555_v10, %v2928_v17 }
0x16b9   :  { %v2927_v20 = vpop.xlane.xlu1 %2926  ;;  %v2924_v21 = vpop.xlane.xlu0 %2923 }
0x16ba   :  { %v2931_v22 = vmul.f32 0.03125, %v2927_v20  ;;  %v2930_v23 = vmul.f32 0.03125, %v2924_v21  ;;  %v2937_v24 = vmul.f32 %v7571_v26, %v7571_v26  ;;  %v2936_v31 = vmul.f32 %v7574_v19, %v7574_v19 }
0x16bc   :  { %v7581_v32 = vsub.f32 %v7562_v58, %v2931_v22  ;;  %v7584_v34 = vsub.f32 %v7564_v27, %v2930_v23  ;;  %v2943_v35 = vsel %vm318_vm1, %v2937_v24, 0.0  ;;  %v2940_v37 = vsel %vm318_vm1, %v2936_v31, 0.0  ;;  %v3121_v22 = vld [vmem:[%s8035_s16 + $0x8] sm:$0xff] }
0x16bd   :  { %2944 = vadd.xlane.f32.xlu1 %v2943_v35  ;;  %2941 = vadd.xlane.f32.xlu0 %v2940_v37 }
0x16be   :  { %v2939_v38 = vmul.f32 %v7581_v32, %v7581_v32  ;;  %v2938_v39 = vmul.f32 %v7584_v34, %v7584_v34 }
0x16c0   :  { %v2949_v40 = vsel %vm318_vm1, %v2939_v38, 0.0  ;;  %v2946_v41 = vsel %vm318_vm1, %v2938_v39, 0.0 }
0x16c1   :  { %2950 = vadd.xlane.f32.xlu1 %v2949_v40  ;;  %2947 = vadd.xlane.f32.xlu0 %v2946_v41 }
0x1746   :  { %v2945_v9 = vpop.xlane.xlu1 %2944  ;;  %v2942_v30 = vpop.xlane.xlu0 %2941 }
0x1747   :  { %v2953_v51 = vmul.f32 0.03125, %v2945_v9  ;;  %v2952_v55 = vmul.f32 0.03125, %v2942_v30 }
0x1749   :  { %v2957_v56 = vadd.f32 1e-05, %v2953_v51  ;;  %v2956_v33 = vadd.f32 1e-05, %v2952_v55 }
0x174a   :  { %v2951_v36 = vpop.xlane.xlu1 %2950  ;;  %v2948_v59 = vpop.xlane.xlu0 %2947 }
0x174b   :  { %6641 = vrsqrt.f32 %v2957_v56  ;;  %v2955_v60 = vmul.f32 0.03125, %v2951_v36  ;;  %v2954_v61 = vmul.f32 0.03125, %v2948_v59 }
0x174c   :  { %6643 = vrsqrt.f32 %v2956_v33 }
0x174d   :  { %v2959_v7 = vadd.f32 1e-05, %v2955_v60  ;;  %v2958_v28 = vadd.f32 1e-05, %v2954_v61 }
0x174f   :  { %6645 = vrsqrt.f32 %v2959_v7 }
0x1750   :  { %6647 = vrsqrt.f32 %v2958_v28 }
0x1758   :  { %v6642_v62 = vpop.eup %6641 }
0x1759   :  { %v6644_v0 = vpop.eup %6643  ;;  %v2965_v1 = vmul.f32 %v6642_v62, %v7571_v26  ;;  %v3120_v26 = vld [vmem:[%s8035_s16] sm:$0xff] }
0x175a   :  { %v2964_v5 = vmul.f32 %v6644_v0, %v7574_v19  ;;  %v3124_v24 = vpack.c.bf16 %v3121_v22, %v3120_v26 }
0x175b   :  { %v2975_v6 = vmul.f32 %v5633_v63, %v2965_v1 }
0x175c   :  { %v6646_v11 = vpop.eup %6645  ;;  %v2974_v12 = vmul.f32 %v5633_v63, %v2964_v5 }
0x175d   :  { %v6648_v13 = vpop.eup %6647  ;;  %v2985_v14 = vadd.f32 %v5634_v3, %v2975_v6  ;;  %v2967_v15 = vmul.f32 %v6646_v11, %v7581_v32 }
0x175e   :  { %v2984_v18 = vadd.f32 %v5634_v3, %v2974_v12  ;;  %v2966_v16 = vmul.f32 %v6648_v13, %v7584_v34  ;;  %v5638_v34 = vld [vmem:[%s8038_s23] ss:$0 sm:$0xff] }
0x175f   :  { %v2977_v29 = vmul.f32 %v5633_v63, %v2967_v15 }
0x1760   :  { %v7611_v17 = vpack.c.bf16 %v2985_v14, %v2984_v18  ;;  %v2976_v20 = vmul.f32 %v5633_v63, %v2966_v16 }
0x1761   :  { %v2987_v21 = vadd.f32 %v5634_v3, %v2977_v29 }
0x1762   :  { %v2986_v23 = vadd.f32 %v5634_v3, %v2976_v20  ;;  %6240 = vmatprep.mubr.msk.bf16.mxu0 %vm318_vm1, %v7611_v17  ;;  %6248 = vmatprep.mubr.msk.bf16.mxu1 %vm318_vm1, %v7611_v17 }
0x1764   :  { %v7619_v19 = vpack.c.bf16 %v2987_v21, %v2986_v23 }
0x1766   :  { %6241 = vmatmul.mubr.msk.bf16.vlgmr.msra.gmra.mxu0 %vm318_vm1, %v7619_v19  ;;  %6249 = vmatmul.mubr.msk.bf16.vlgmr.msra.gmra.mxu1 %vm318_vm1, %v7619_v19 }
0x1767   :  { %6253 = vmatpush3.bf16.msra.mxu0 %v3125_v53  ;;  %6256 = vmatprep.mubr.msk.bf16.mxu0 %vm318_vm1, %v7611_v17 }
0x1768   :  { %6254 = vmatprep.subr.bf16.mxu0 %v3124_v24  ;;  %6262 = vmatprep.mubr.msk.bf16.mxu1 %vm6851_vm2, %v6850_v50 }
0x176b   :  { %6255 = vmatpush3.bf16.msra.mxu0 %v3124_v24 }
0x176c   :  { %6266 = vmatprep.subr.bf16.mxu0 %v6850_v50 }
0x176e   :  { %6257 = vmatmul.mubr.msk.bf16.vlgmr.msra.gmra.mxu0 %vm318_vm1, %v7619_v19 }
0x176f   :  { %6268 = vmatprep.mubr.msk.bf16.mxu0 %vm6851_vm2, %v6850_v50 }
0x1826   :  { %v6242_v31 = vpop.f32.mrf.mxu0  ;;  %v6250_v32 = vpop.f32.mrf.mxu1 }
0x1827   :  { %v3114_v40 = vadd.f32 %v6250_v32, %v5638_v34  ;;  %v3052_v53 = vadd.f32 %v6242_v31, %v5635_v49 }
0x1828   :  { %v3043_v35 = vpop.f32.mrf.mxu0  ;;  %v3105_v37 = vpop.f32.mrf.mxu1 }
0x1829   :  { %v3106_v42 = vadd.f32 %v5638_v34, %v3105_v37  ;;  %v3044_v55 = vadd.f32 %v5635_v49, %v3043_v35 }
0x182a   :  { %v6243_v38 = vpop.f32.mrf.mxu0  ;;  %v6251_v39 = vpop.f32.mrf.mxu1 }
0x182b   :  { %v3117_v41 = vadd.f32 %v6251_v39, %v5638_v34  ;;  %v3055_v25 = vadd.f32 %v6243_v38, %v5635_v49 }
0x182c   :  { %v3046_v45 = vpop.f32.mrf.mxu0  ;;  %v3108_v52 = vpop.f32.mrf.mxu1 }
0x182d   :  { %v3185_v47 = vpack.c.bf16 %v3117_v41, %v3114_v40  ;;  %v3109_v48 = vadd.f32 %v5638_v34, %v3108_v52  ;;  %v3047_v9 = vadd.f32 %v5635_v49, %v3046_v45  ;;  %v3183_v33 = vpack.c.bf16 %v3055_v25, %v3052_v53  ;;  %v5650_v49 = vld [vmem:[%s8033_s9 + $0x30] sm:$0xff] }
0x182e   :  { %v6258_v46 = vpop.f32.mrf.mxu0 }
0x182f   :  { %v3184_v43 = vpack.c.bf16 %v3109_v48, %v3106_v42  ;;  %v3237_v44 = vsel %vm590_vm3, %v3185_v47, 0  ;;  %v3176_v30 = vadd.f32 %v6258_v46, %v5641_v54  ;;  %v3182_v61 = vpack.c.bf16 %v3047_v9, %v3044_v55  ;;  %v5658_v46 = vld [vmem:[%s8034_s15 + $0x30] sm:$0xff]  ;;  %v5657_v55 = vld [vmem:[%s8034_s15 + $0x28] sm:$0xff] }
0x1830   :  { %v3167_v2 = vpop.f32.mrf.mxu0  ;;  %6267 = vmatpush3.bf16.xpose.msra.mxu0 %v3237_v44 }
0x1831   :  { %v3190_v57 = vsel %vm590_vm3, %v3184_v43, 0  ;;  %6278 = vmatprep.subr.bf16.mxu0 %v6850_v50  ;;  %v3168_v36 = vadd.f32 %v5641_v54, %v3167_v2  ;;  %v5659_v43 = vld [vmem:[%s8034_s15 + $0x38] sm:$0xff] }
0x1832   :  { %v6259_v4 = vpop.f32.mrf.mxu0  ;;  %6261 = vmatpush3.bf16.xpose.msra.mxu1 %v3190_v57  ;;  %v3494_v44 = vpack.c.bf16 %v5659_v43, %v5658_v46  ;;  %v5653_v43 = vld [vmem:[%s8039_s26 + $0x1] ss:$0 sm:$0xff] }
0x1833   :  { %v3179_v51 = vadd.f32 %v6259_v4, %v5641_v54  ;;  %6272 = vmatprep.subr.bf16.mxu1 %v6850_v50 }
0x1834   :  { %v3170_v56 = vpop.f32.mrf.mxu0 }
0x1835   :  { %v3331_v59 = vpack.c.bf16 %v3179_v51, %v3176_v30  ;;  %v3171_v60 = vadd.f32 %v5641_v54, %v3170_v56  ;;  %v5651_v54 = vld [vmem:[%s8033_s9 + $0x38] sm:$0xff]  ;;  %v5656_v51 = vld [vmem:[%s8034_s15 + $0x20] sm:$0xff] }
0x1836   :  { %v3430_v2 = vpack.c.bf16 %v5651_v54, %v5650_v49 }
0x1837   :  { %v3330_v7 = vpack.c.bf16 %v3171_v60, %v3168_v36  ;;  %6269 = vmatmul.mubr.msk.bf16.vlgmr.msra.gmra.mxu0 %vm590_vm3, %v3183_v33  ;;  %v3493_v60 = vpack.c.bf16 %v5657_v55, %v5656_v51 }
0x1838   :  { %6279 = vmatpush3.bf16.msra.mxu0 %v3331_v59  ;;  %6280 = vmatprep.mubr.msk.bf16.mxu0 %vm6851_vm2, %v6850_v50 }
0x1839   :  { %6263 = vmatmul.mubr.msk.bf16.vlgmr.msra.gmra.mxu1 %vm590_vm3, %v3182_v61  ;;  %6292 = vmatprep.subr.bf16.mxu0 %v3494_v44 }
0x183a   :  { %6273 = vmatpush3.bf16.msra.mxu1 %v3330_v7  ;;  %6274 = vmatprep.mubr.msk.bf16.mxu1 %vm6851_vm2, %v6850_v50  ;;  %v5648_v7 = vld [vmem:[%s8033_s9 + $0x20] sm:$0xff] }
0x183b   :  { %6284 = vmatprep.subr.bf16.mxu1 %v3430_v2 }
0x18f7   :  { %v3273_v28 = vpop.f32.mrf.mxu0 }
0x18f8   :  { %v3282_v62 = vmul.f32 0.35355338, %v3273_v28  ;;  %v5649_v28 = vld [vmem:[%s8033_s9 + $0x28] sm:$0xff] }
0x18f9   :  { %v3226_v63 = vpop.f32.mrf.mxu1  ;;  %v6270_v0 = vpop.f32.mrf.mxu0 }
0x18fa   :  { %v3280_v1 = vmul.f32 0.35355338, %v3226_v63  ;;  %v3290_v3 = vsel %vm223_vm0, %v3282_v62, -inf }
0x18fb   :  { %3291 = vmax.xlane.f32.xlu0 %v3290_v3  ;;  %v6264_v5 = vpop.f32.mrf.mxu1  ;;  %v3276_v6 = vpop.f32.mrf.mxu0  ;;  %v5666_v3 = vld [vmem:[%s8035_s16 + $0x30] sm:$0xff] }
0x18fc   :  { %v3283_v11 = vmul.f32 0.35355338, %v3276_v6  ;;  %v3284_v18 = vsel %vm223_vm0, %v3280_v1, -inf  ;;  %v5667_v5 = vld [vmem:[%s8035_s16 + $0x38] sm:$0xff] }
0x18fd   :  { %v3229_v12 = vpop.f32.mrf.mxu1  ;;  %v6271_v13 = vpop.f32.mrf.mxu0  ;;  %v3558_v6 = vpack.c.bf16 %v5667_v5, %v5666_v3 }
0x18fe   :  { %v3281_v14 = vmul.f32 0.35355338, %v3229_v12  ;;  %v3293_v15 = vsel %vm223_vm0, %v3283_v11, -inf  ;;  %v5665_v12 = vld [vmem:[%s8035_s16 + $0x28] sm:$0xff] }
0x18ff   :  { %3294 = vmax.xlane.f32.xlu1 %v3293_v15  ;;  %3285 = vmax.xlane.f32.xlu0 %v3284_v18  ;;  %v6265_v16 = vpop.f32.mrf.mxu1 }
0x1900   :  { %v3287_v29 = vsel %vm223_vm0, %v3281_v14, -inf }
0x1903   :  { %3288 = vmax.xlane.f32.xlu1 %v3287_v29 }
0x1984   :  { %v3292_v20 = vpop.xlane.xlu0 %3291 }
0x1985   :  { %v3298_v21 = vsub.f32 %v3282_v62, %v3292_v20 }
0x1987   :  { %v3304_v26 = vmul.f32 1.442695, %v3298_v21 }
0x1988   :  { %v3295_v22 = vpop.xlane.xlu1 %3294  ;;  %v3286_v23 = vpop.xlane.xlu0 %3285 }
0x1989   :  { %6649 = vpow2.f32 %v3304_v26  ;;  %v3299_v24 = vsub.f32 %v3283_v11, %v3295_v22  ;;  %v3296_v31 = vsub.f32 %v3280_v1, %v3286_v23  ;;  %v3429_v1 = vpack.c.bf16 %v5649_v28, %v5648_v7  ;;  %v5664_v11 = vld [vmem:[%s8035_s16 + $0x20] sm:$0xff] }
0x198a   :  { %v3557_v13 = vpack.c.bf16 %v5665_v12, %v5664_v11 }
0x198b   :  { %v3306_v32 = vmul.f32 1.442695, %v3299_v24  ;;  %v3300_v34 = vmul.f32 1.442695, %v3296_v31  ;;  %v5661_v31 = vld [vmem:[%s8038_s23 + $0x1] ss:$0 sm:$0xff] }
0x198c   :  { %v3289_v35 = vpop.xlane.xlu1 %3288 }
0x198d   :  { %6651 = vpow2.f32 %v3306_v32  ;;  %v3297_v37 = vsub.f32 %v3281_v14, %v3289_v35 }
0x198e   :  { %6653 = vpow2.f32 %v3300_v34 }
0x198f   :  { %v3302_v38 = vmul.f32 1.442695, %v3297_v37 }
0x1991   :  { %6655 = vpow2.f32 %v3302_v38 }
0x1996   :  { %v6650_v39 = vpop.eup %6649 }
0x1997   :  { %v3314_v40 = vsel %vm223_vm0, %v6650_v39, 0.0 }
0x1998   :  { %3315 = vadd.xlane.f32.xlu0 %v3314_v40 }
0x199a   :  { %v6652_v41 = vpop.eup %6651 }
0x199b   :  { %v6654_v45 = vpop.eup %6653  ;;  %v3317_v52 = vsel %vm223_vm0, %v6652_v41, 0.0 }
0x199c   :  { %v3308_v42 = vsel %vm223_vm0, %v6654_v45, 0.0  ;;  %3318 = vadd.xlane.f32.xlu1 %v3317_v52 }
0x199d   :  { %3309 = vadd.xlane.f32.xlu0 %v3308_v42 }
0x199e   :  { %v6656_v47 = vpop.eup %6655 }
0x199f   :  { %v3311_v48 = vsel %vm223_vm0, %v6656_v47, 0.0 }
0x19a0   :  { %3312 = vadd.xlane.f32.xlu1 %v3311_v48 }
0x1a21   :  { %v3316_v25 = vpop.xlane.xlu0 %3315 }
0x1a22   :  { %6657 = vrcp.f32 %v3316_v25 }
0x1a25   :  { %v3319_v57 = vpop.xlane.xlu1 %3318 }
0x1a26   :  { %v3310_v4 = vpop.xlane.xlu0 %3309  ;;  %6659 = vrcp.f32 %v3319_v57  ;;  %v5669_v57 = vld [vmem:[%s8040_s28 + $0x1] ss:$0 sm:$0xff] }
0x1a27   :  { %6661 = vrcp.f32 %v3310_v4 }
0x1a29   :  { %v3313_v53 = vpop.xlane.xlu1 %3312 }
0x1a2a   :  { %6663 = vrcp.f32 %v3313_v53 }
0x1a2f   :  { %v6658_v9 = vpop.eup %6657 }
0x1a30   :  { %v3326_v56 = vmul.f32 %v6658_v9, %v6650_v39 }
0x1a33   :  { %v6660_v30 = vpop.eup %6659 }
0x1a34   :  { %v3327_v33 = vmul.f32 %v6660_v30, %v6652_v41  ;;  %v6662_v36 = vpop.eup %6661 }
0x1a35   :  { %v3324_v62 = vmul.f32 %v6662_v36, %v6654_v45 }
0x1a36   :  { %v3329_v59 = vpack.c.bf16 %v3327_v33, %v3326_v56 }
0x1a37   :  { %v6664_v61 = vpop.eup %6663 }
0x1a38   :  { %6281 = vmatmul.mubr.msk.bf16.vlgmr.msra.gmra.mxu0 %vm223_vm0, %v3329_v59  ;;  %v3325_v63 = vmul.f32 %v6664_v61, %v6656_v47 }
0x1a39   :  { %6293 = vmatpush3.bf16.msra.mxu0 %v3494_v44  ;;  %6296 = vmatprep.mubr.msk.bf16.mxu0 %vm318_vm1, %v7611_v17 }
0x1a3a   :  { %v3328_v0 = vpack.c.bf16 %v3325_v63, %v3324_v62  ;;  %6294 = vmatprep.subr.bf16.mxu0 %v3493_v60 }
0x1a3c   :  { %6275 = vmatmul.mubr.msk.bf16.vlgmr.msra.gmra.mxu1 %vm223_vm0, %v3328_v0 }
0x1a3d   :  { %6285 = vmatpush3.bf16.msra.mxu1 %v3430_v2  ;;  %6288 = vmatprep.mubr.msk.bf16.mxu1 %vm318_vm1, %v7611_v17 }
0x1a3e   :  { %6295 = vmatpush3.bf16.msra.mxu0 %v3493_v60  ;;  %6286 = vmatprep.subr.bf16.mxu1 %v3429_v1 }
0x1a3f   :  { %6308 = vmatprep.subr.bf16.mxu0 %v6850_v50 }
0x1a41   :  { %6297 = vmatmul.mubr.msk.bf16.vlgmr.msra.gmra.mxu0 %vm318_vm1, %v7619_v19  ;;  %6287 = vmatpush3.bf16.msra.mxu1 %v3429_v1 }
0x1a42   :  { %6300 = vmatprep.subr.bf16.mxu1 %v3558_v6  ;;  %6310 = vmatprep.mubr.msk.bf16.mxu0 %vm6851_vm2, %v6850_v50 }
0x1a44   :  { %6289 = vmatmul.mubr.msk.bf16.vlgmr.msra.gmra.mxu1 %vm318_vm1, %v7619_v19 }
0x1a45   :  { %6301 = vmatpush3.bf16.msra.mxu1 %v3558_v6  ;;  %6304 = vmatprep.mubr.msk.bf16.mxu1 %vm318_vm1, %v7611_v17 }
0x1a46   :  { %6302 = vmatprep.subr.bf16.mxu1 %v3557_v13 }
0x1a49   :  { %6303 = vmatpush3.bf16.msra.mxu1 %v3557_v13 }
0x1a4a   :  { %6314 = vmatprep.subr.bf16.mxu1 %v6850_v50 }
0x1a4c   :  { %6305 = vmatmul.mubr.msk.bf16.vlgmr.msra.gmra.mxu1 %vm318_vm1, %v7619_v19 }
0x1a4d   :  { %6316 = vmatprep.mubr.msk.bf16.mxu1 %vm6851_vm2, %v6850_v50 }
0x1af8   :  { %v7687_v14 = vpop.f32.mrf.mxu0 }
0x1afa   :  { %v6282_v15 = vpop.f32.mrf.mxu0 }
0x1afc   :  { %v7689_v18 = vpop.f32.mrf.mxu1  ;;  %v7691_v16 = vpop.f32.mrf.mxu0 }
0x1afd   :  { %v3422_v29 = vpack.c.bf16 %v7691_v16, %v7687_v14  ;;  %v5683_v16 = vld [vmem:[%s8033_s9 + $0x50] sm:$0xff] }
0x1afe   :  { %v6276_v20 = vpop.f32.mrf.mxu1  ;;  %v6283_v21 = vpop.f32.mrf.mxu0 }
0x1b00   :  { %v7695_v26 = vpop.f32.mrf.mxu1 }
0x1b01   :  { %v3421_v22 = vpack.c.bf16 %v7695_v26, %v7689_v18  ;;  %v6298_v23 = vpop.f32.mrf.mxu0  ;;  %v5676_v18 = vld [vmem:[%s8041_s1 + $0x8] sm:$0xff] }
0x1b02   :  { %v6277_v24 = vpop.f32.mrf.mxu1  ;;  %v3546_v37 = vadd.f32 %v6298_v23, %v5661_v31  ;;  %v3858_v26 = vpack.c.bf16 %v5676_v18, %v5676_v18 }
0x1b03   :  { %v3537_v32 = vpop.f32.mrf.mxu0 }
0x1b04   :  { %v6290_v34 = vpop.f32.mrf.mxu1  ;;  %v3538_v41 = vadd.f32 %v5661_v31, %v3537_v32  ;;  %v3866_v14 = vsel %vm1270_vm4, %v3858_v26, 0 }
0x1b05   :  { %v6299_v35 = vpop.f32.mrf.mxu0  ;;  %v3482_v2 = vadd.f32 %v6290_v34, %v5653_v43 }
0x1b06   :  { %v3549_v38 = vadd.f32 %v6299_v35, %v5661_v31  ;;  %v3473_v39 = vpop.f32.mrf.mxu1 }
0x1b07   :  { %v3540_v40 = vpop.f32.mrf.mxu0  ;;  %v3474_v53 = vadd.f32 %v5653_v43, %v3473_v39 }
0x1b08   :  { %v3619_v45 = vpack.c.bf16 %v3549_v38, %v3546_v37  ;;  %v3541_v52 = vadd.f32 %v5661_v31, %v3540_v40  ;;  %v6291_v42 = vpop.f32.mrf.mxu1 }
0x1b09   :  { %v3485_v44 = vadd.f32 %v6291_v42, %v5653_v43 }
0x1b0a   :  { %v3618_v47 = vpack.c.bf16 %v3541_v52, %v3538_v41  ;;  %v3476_v48 = vpop.f32.mrf.mxu1  ;;  %v3671_v46 = vsel %vm590_vm3, %v3619_v45, 0 }
0x1b0b   :  { %6315 = vmatpush3.bf16.xpose.msra.mxu1 %v3671_v46  ;;  %v3477_v25 = vadd.f32 %v5653_v43, %v3476_v48  ;;  %v3617_v9 = vpack.c.bf16 %v3485_v44, %v3482_v2  ;;  %v3420_v2 = vld [vmem:[%s8041_s1] sm:$0xff] }
0x1b0c   :  { %v6306_v49 = vpop.f32.mrf.mxu1  ;;  %v3624_v54 = vsel %vm590_vm3, %v3618_v47, 0  ;;  %6326 = vmatprep.subr.bf16.mxu1 %v6850_v50 }
0x1b0d   :  { %6309 = vmatpush3.bf16.xpose.msra.mxu0 %v3624_v54  ;;  %v3610_v51 = vadd.f32 %v6306_v49, %v5669_v57  ;;  %v3616_v56 = vpack.c.bf16 %v3477_v25, %v3474_v53  ;;  %v3423_v25 = vpack.c.bf16 %v3420_v2, %v3420_v2 }
0x1b0e   :  { %v3601_v4 = vpop.f32.mrf.mxu1  ;;  %6320 = vmatprep.subr.bf16.mxu0 %v6850_v50 }
0x1b0f   :  { %v3602_v36 = vadd.f32 %v5669_v57, %v3601_v4 }
0x1b10   :  { %v6307_v30 = vpop.f32.mrf.mxu1 }
0x1b11   :  { %v3613_v55 = vadd.f32 %v6307_v30, %v5669_v57 }
0x1b12   :  { %6317 = vmatmul.mubr.msk.bf16.vlgmr.msra.gmra.mxu1 %vm590_vm3, %v3617_v9  ;;  %v3604_v33 = vpop.f32.mrf.mxu1 }
0x1b13   :  { %v3765_v59 = vpack.c.bf16 %v3613_v55, %v3610_v51  ;;  %v3605_v60 = vadd.f32 %v5669_v57, %v3604_v33  ;;  %6328 = vmatprep.mubr.msk.bf16.mxu1 %vm6851_vm2, %v6850_v50 }
0x1b14   :  { %6311 = vmatmul.mubr.msk.bf16.vlgmr.msra.gmra.mxu0 %vm590_vm3, %v3616_v56 }
0x1b15   :  { %v3764_v61 = vpack.c.bf16 %v3605_v60, %v3602_v36  ;;  %6327 = vmatpush3.bf16.msra.mxu1 %v3765_v59  ;;  %6322 = vmatprep.mubr.msk.bf16.mxu0 %vm6851_vm2, %v6850_v50  ;;  %v5691_v60 = vld [vmem:[%s8034_s15 + $0x50] sm:$0xff] }
0x1b16   :  { %6485 = vmatprep.subr.msk.bf16.mxu1 %vm1270_vm4, %v3423_v25 }
0x1b17   :  { %6321 = vmatpush3.bf16.msra.mxu0 %v3764_v61  ;;  %v5692_v61 = vld [vmem:[%s8034_s15 + $0x58] sm:$0xff] }
0x1b18   :  { %6484 = vmatprep.subr.msk.bf16.mxu0 %vm1270_vm4, %v3858_v26  ;;  %v5702_v26 = vld [vmem:[%s8040_s28 + $0x2] ss:$0 sm:$0xff] }
0x1bd2   :  { %v3707_v7 = vpop.f32.mrf.mxu1 }
0x1bd3   :  { %v3716_v3 = vmul.f32 0.35355338, %v3707_v7 }
0x1bd4   :  { %v3660_v28 = vpop.f32.mrf.mxu0  ;;  %v6318_v62 = vpop.f32.mrf.mxu1 }
0x1bd5   :  { %v3714_v63 = vmul.f32 0.35355338, %v3660_v28  ;;  %v3724_v20 = vsel %vm223_vm0, %v3716_v3, -inf }
0x1bd6   :  { %v6312_v0 = vpop.f32.mrf.mxu0  ;;  %v3710_v1 = vpop.f32.mrf.mxu1 }
0x1bd7   :  { %v3718_v5 = vsel %vm223_vm0, %v3714_v63, -inf  ;;  %v3717_v15 = vmul.f32 0.35355338, %v3710_v1  ;;  %v4045_v0 = vpack.c.bf16 %v5692_v61, %v5691_v60  ;;  %v5689_v1 = vld [vmem:[%s8034_s15 + $0x40] sm:$0xff] }
0x1bd8   :  { %v6319_v6 = vpop.f32.mrf.mxu1  ;;  %3719 = vmax.xlane.f32.xlu0 %v3718_v5  ;;  %v3663_v11 = vpop.f32.mrf.mxu0  ;;  %v5686_v60 = vld [vmem:[%s8039_s26 + $0x2] ss:$0 sm:$0xff] }
0x1bd9   :  { %v3715_v12 = vmul.f32 0.35355338, %v3663_v11  ;;  %v3727_v23 = vsel %vm223_vm0, %v3717_v15, -inf }
0x1bda   :  { %v6313_v13 = vpop.f32.mrf.mxu0 }
0x1bdb   :  { %v3721_v21 = vsel %vm223_vm0, %v3715_v12, -inf }
0x1bdc   :  { %3725 = vmax.xlane.f32.xlu0 %v3724_v20  ;;  %3722 = vmax.xlane.f32.xlu1 %v3721_v21 }
0x1be0   :  { %3728 = vmax.xlane.f32.xlu1 %v3727_v23  ;;  %v5681_v23 = vld [vmem:[%s8033_s9 + $0x40] sm:$0xff] }
0x1c61   :  { %v3720_v24 = vpop.xlane.xlu0 %3719 }
0x1c62   :  { %v3730_v31 = vsub.f32 %v3714_v63, %v3720_v24  ;;  %v3924_v63 = vsel %vm1270_vm4, %v3423_v25, 0  ;;  %v5682_v24 = vld [vmem:[%s8033_s9 + $0x48] sm:$0xff] }
0x1c64   :  { %v3734_v32 = vmul.f32 1.442695, %v3730_v31 }
0x1c65   :  { %v3726_v34 = vpop.xlane.xlu0 %3725  ;;  %v3723_v35 = vpop.xlane.xlu1 %3722 }
0x1c66   :  { %6665 = vpow2.f32 %v3734_v32  ;;  %v3732_v37 = vsub.f32 %v3716_v3, %v3726_v34  ;;  %v3731_v38 = vsub.f32 %v3715_v12, %v3723_v35  ;;  %v5690_v3 = vld [vmem:[%s8034_s15 + $0x48] sm:$0xff]  ;;  %v3980_v34 = vpack.c.bf16 %v5682_v24, %v5681_v23 }
0x1c67   :  { %v4044_v5 = vpack.c.bf16 %v5690_v3, %v5689_v1 }
0x1c68   :  { %v3738_v39 = vmul.f32 1.442695, %v3732_v37  ;;  %v3736_v40 = vmul.f32 1.442695, %v3731_v38  ;;  %v5699_v37 = vld [vmem:[%s8035_s16 + $0x50] sm:$0xff]  ;;  %v5700_v38 = vld [vmem:[%s8035_s16 + $0x58] sm:$0xff] }
0x1c69   :  { %v3729_v41 = vpop.xlane.xlu1 %3728 }
0x1c6a   :  { %6667 = vpow2.f32 %v3738_v39  ;;  %v3733_v45 = vsub.f32 %v3717_v15, %v3729_v41 }
0x1c6b   :  { %6669 = vpow2.f32 %v3736_v40  ;;  %v4109_v40 = vpack.c.bf16 %v5700_v38, %v5699_v37 }
0x1c6c   :  { %v3740_v52 = vmul.f32 1.442695, %v3733_v45  ;;  %v5697_v45 = vld [vmem:[%s8035_s16 + $0x40] sm:$0xff] }
0x1c6e   :  { %6671 = vpow2.f32 %v3740_v52  ;;  %v5698_v52 = vld [vmem:[%s8035_s16 + $0x48] sm:$0xff] }
0x1c73   :  { %v6666_v42 = vpop.eup %6665 }
0x1c74   :  { %v3742_v47 = vsel %vm223_vm0, %v6666_v42, 0.0 }
0x1c75   :  { %3743 = vadd.xlane.f32.xlu0 %v3742_v47  ;;  %v4108_v47 = vpack.c.bf16 %v5698_v52, %v5697_v45 }
0x1c77   :  { %v6668_v48 = vpop.eup %6667 }
0x1c78   :  { %v6670_v46 = vpop.eup %6669  ;;  %v3748_v43 = vsel %vm223_vm0, %v6668_v48, 0.0 }
0x1c79   :  { %3749 = vadd.xlane.f32.xlu0 %v3748_v43  ;;  %v3745_v44 = vsel %vm223_vm0, %v6670_v46, 0.0  ;;  %v5694_v43 = vld [vmem:[%s8038_s23 + $0x2] ss:$0 sm:$0xff] }
0x1c7a   :  { %3746 = vadd.xlane.f32.xlu1 %v3745_v44 }
0x1c7b   :  { %v6672_v49 = vpop.eup %6671 }
0x1c7c   :  { %v3751_v54 = vsel %vm223_vm0, %v6672_v49, 0.0 }
0x1c7e   :  { %3752 = vadd.xlane.f32.xlu1 %v3751_v54 }
0x1cfe   :  { %v3744_v57 = vpop.xlane.xlu0 %3743 }
0x1cff   :  { %6673 = vrcp.f32 %v3744_v57 }
0x1d02   :  { %v3750_v4 = vpop.xlane.xlu0 %3749 }
0x1d03   :  { %v3747_v53 = vpop.xlane.xlu1 %3746 }
0x1d04   :  { %6675 = vrcp.f32 %v3747_v53 }
0x1d05   :  { %6677 = vrcp.f32 %v3750_v4 }
0x1d07   :  { %v3753_v9 = vpop.xlane.xlu1 %3752 }
0x1d08   :  { %6679 = vrcp.f32 %v3753_v9 }
0x1d0c   :  { %v6674_v30 = vpop.eup %6673 }
0x1d0d   :  { %v3758_v55 = vmul.f32 %v6674_v30, %v6666_v42 }
0x1d11   :  { %v6676_v51 = vpop.eup %6675 }
0x1d12   :  { %v3759_v56 = vmul.f32 %v6676_v51, %v6670_v46  ;;  %v6678_v33 = vpop.eup %6677 }
0x1d13   :  { %v3760_v7 = vmul.f32 %v6678_v33, %v6668_v48 }
0x1d14   :  { %v3762_v36 = vpack.c.bf16 %v3759_v56, %v3758_v55 }
0x1d15   :  { %v6680_v59 = vpop.eup %6679 }
0x1d16   :  { %6323 = vmatmul.mubr.msk.bf16.vlgmr.msra.gmra.mxu0 %vm223_vm0, %v3762_v36  ;;  %v3761_v28 = vmul.f32 %v6680_v59, %v6672_v49 }
0x1d17   :  { %6333 = vmatpush3.bf16.msra.mxu0 %v3866_v14 }
0x1d18   :  { %v3763_v62 = vpack.c.bf16 %v3761_v28, %v3760_v7 }
0x1d1a   :  { %6329 = vmatmul.mubr.msk.bf16.vlgmr.msra.gmra.mxu1 %vm223_vm0, %v3763_v62 }
0x1d1b   :  { %6340 = vmatprep.mubr.msk.bf16.mxu1 %vm590_vm3, %v3421_v22  ;;  %6339 = vmatpush3.bf16.msra.mxu1 %v3924_v63 }
0x1d1c   :  { %6352 = vmatprep.subr.bf16.mxu1 %v4045_v0 }
0x1d22   :  { %6341 = vmatmul.mubr.msk.bf16.vlgmr.msra.gmra.mxu1 %vm590_vm3, %v3422_v29  ;;  %v5684_v29 = vld [vmem:[%s8033_s9 + $0x58] sm:$0xff] }
0x1d23   :  { %6353 = vmatpush3.bf16.msra.mxu1 %v4045_v0  ;;  %6356 = vmatprep.mubr.msk.bf16.mxu1 %vm318_vm1, %v7611_v17  ;;  %v3981_v22 = vpack.c.bf16 %v5684_v29, %v5683_v16 }
0x1d24   :  { %6354 = vmatprep.subr.bf16.mxu1 %v4044_v5 }
0x1d25   :  { %6344 = vmatprep.subr.bf16.mxu0 %v3981_v22 }
0x1d27   :  { %6355 = vmatpush3.bf16.msra.mxu1 %v4044_v5 }
0x1d28   :  { %6368 = vmatprep.subr.bf16.mxu1 %v6850_v50 }
0x1d2a   :  { %6357 = vmatmul.mubr.msk.bf16.vlgmr.msra.gmra.mxu1 %vm318_vm1, %v7619_v19 }
0x1d2b   :  { %6370 = vmatprep.mubr.msk.bf16.mxu1 %vm6851_vm2, %v6850_v50 }
0x1dd6   :  { %v3803_v6 = vpop.f32.mrf.mxu0 }
0x1dd8   :  { %v6324_v11 = vpop.f32.mrf.mxu0 }
0x1dda   :  { %v3806_v12 = vpop.f32.mrf.mxu0  ;;  %v3847_v13 = vpop.f32.mrf.mxu1 }
0x1ddb   :  { %v3856_v15 = vpack.c.bf16 %v3806_v12, %v3803_v6 }
0x1ddc   :  { %v6325_v20 = vpop.f32.mrf.mxu0  ;;  %v6330_v21 = vpop.f32.mrf.mxu1 }
0x1ddd   :  { %6334 = vmatprep.mubr.msk.bf16.mxu0 %vm590_vm3, %v3856_v15 }
0x1dde   :  { %v3850_v31 = vpop.f32.mrf.mxu1 }
0x1ddf   :  { %v3857_v32 = vpack.c.bf16 %v3850_v31, %v3847_v13 }
0x1de0   :  { %v6331_v35 = vpop.f32.mrf.mxu1 }
0x1de1   :  { %6335 = vmatmul.mubr.msk.bf16.vlgmr.msra.gmra.mxu0 %vm590_vm3, %v3857_v32 }
0x1de2   :  { %v7755_v39 = vpop.f32.mrf.mxu1  ;;  %6345 = vmatpush3.bf16.msra.mxu0 %v3981_v22  ;;  %6348 = vmatprep.mubr.msk.bf16.mxu0 %vm318_vm1, %v7611_v17 }
0x1de3   :  { %6346 = vmatprep.subr.bf16.mxu0 %v3980_v34 }
0x1de4   :  { %v7759_v41 = vpop.f32.mrf.mxu1 }
0x1de6   :  { %v7763_v42 = vpop.f32.mrf.mxu1  ;;  %6347 = vmatpush3.bf16.msra.mxu0 %v3980_v34 }
0x1de7   :  { %6360 = vmatprep.subr.bf16.mxu0 %v4109_v40 }
0x1de8   :  { %v7765_v48 = vpop.f32.mrf.mxu1 }
0x1de9   :  { %6349 = vmatmul.mubr.msk.bf16.vlgmr.msra.gmra.mxu0 %vm318_vm1, %v7619_v19 }
0x1dea   :  { %v6358_v46 = vpop.f32.mrf.mxu1  ;;  %6361 = vmatpush3.bf16.msra.mxu0 %v4109_v40  ;;  %6364 = vmatprep.mubr.msk.bf16.mxu0 %vm318_vm1, %v7611_v17 }
0x1deb   :  { %6362 = vmatprep.subr.bf16.mxu0 %v4108_v47  ;;  %v4097_v54 = vadd.f32 %v6358_v46, %v5694_v43 }
0x1dec   :  { %v4088_v44 = vpop.f32.mrf.mxu1 }
0x1ded   :  { %v4089_v57 = vadd.f32 %v5694_v43, %v4088_v44 }
0x1dee   :  { %v6359_v49 = vpop.f32.mrf.mxu1  ;;  %6363 = vmatpush3.bf16.msra.mxu0 %v4108_v47 }
0x1def   :  { %v4100_v2 = vadd.f32 %v6359_v49, %v5694_v43  ;;  %6374 = vmatprep.subr.bf16.mxu0 %v6850_v50 }
0x1df0   :  { %v4091_v25 = vpop.f32.mrf.mxu1 }
0x1df1   :  { %v4170_v4 = vpack.c.bf16 %v4100_v2, %v4097_v54  ;;  %v4092_v53 = vadd.f32 %v5694_v43, %v4091_v25  ;;  %6365 = vmatmul.mubr.msk.bf16.vlgmr.msra.gmra.mxu0 %vm318_vm1, %v7619_v19 }
0x1df2   :  { %6376 = vmatprep.mubr.msk.bf16.mxu0 %vm6851_vm2, %v6850_v50 }
0x1df3   :  { %v4169_v9 = vpack.c.bf16 %v4092_v53, %v4089_v57  ;;  %v4222_v30 = vsel %vm590_vm3, %v4170_v4, 0 }
0x1df4   :  { %6375 = vmatpush3.bf16.xpose.msra.mxu0 %v4222_v30 }
0x1df5   :  { %v4175_v51 = vsel %vm590_vm3, %v4169_v9, 0  ;;  %6386 = vmatprep.subr.bf16.mxu0 %v6850_v50 }
0x1df6   :  { %6369 = vmatpush3.bf16.xpose.msra.mxu1 %v4175_v51 }
0x1df7   :  { %6380 = vmatprep.subr.bf16.mxu1 %v6850_v50 }
0x1ea1   :  { %v7781_v55 = vpop.f32.mrf.mxu0 }
0x1ea3   :  { %v7783_v56 = vpop.f32.mrf.mxu0 }
0x1ea5   :  { %v7785_v33 = vpop.f32.mrf.mxu0 }
0x1ea7   :  { %v7787_v36 = vpop.f32.mrf.mxu0 }
0x1ea9   :  { %v6350_v59 = vpop.f32.mrf.mxu0 }
0x1eaa   :  { %v4033_v28 = vadd.f32 %v6350_v59, %v5686_v60 }
0x1eab   :  { %v4024_v61 = vpop.f32.mrf.mxu0 }
0x1eac   :  { %v4025_v0 = vadd.f32 %v5686_v60, %v4024_v61 }
0x1ead   :  { %v6351_v7 = vpop.f32.mrf.mxu0 }
0x1eae   :  { %v4036_v62 = vadd.f32 %v6351_v7, %v5686_v60 }
0x1eaf   :  { %v4027_v63 = vpop.f32.mrf.mxu0 }
0x1eb0   :  { %v4168_v1 = vpack.c.bf16 %v4036_v62, %v4033_v28  ;;  %v4028_v3 = vadd.f32 %v5686_v60, %v4027_v63 }
0x1eb1   :  { %v6366_v5 = vpop.f32.mrf.mxu0 }
0x1eb2   :  { %v4167_v18 = vpack.c.bf16 %v4028_v3, %v4025_v0  ;;  %6377 = vmatmul.mubr.msk.bf16.vlgmr.msra.gmra.mxu0 %vm590_vm3, %v4168_v1  ;;  %v4161_v29 = vadd.f32 %v6366_v5, %v5702_v26  ;;  %v5714_v3 = vld [vmem:[%s8033_s9 + $0x70] sm:$0xff]  ;;  %v5715_v5 = vld [vmem:[%s8033_s9 + $0x78] sm:$0xff] }
0x1eb3   :  { %v4152_v14 = vpop.f32.mrf.mxu0  ;;  %6388 = vmatprep.mubr.msk.bf16.mxu0 %vm6851_vm2, %v6850_v50 }
0x1eb4   :  { %6371 = vmatmul.mubr.msk.bf16.vlgmr.msra.gmra.mxu1 %vm590_vm3, %v4167_v18  ;;  %v4153_v11 = vadd.f32 %v5702_v26, %v4152_v14  ;;  %v4478_v18 = vpack.c.bf16 %v5715_v5, %v5714_v3 }
0x1eb5   :  { %v6367_v16 = vpop.f32.mrf.mxu0  ;;  %6382 = vmatprep.mubr.msk.bf16.mxu1 %vm6851_vm2, %v6850_v50 }
0x1eb6   :  { %v4164_v22 = vadd.f32 %v6367_v16, %v5702_v26 }
0x1eb7   :  { %v4155_v6 = vpop.f32.mrf.mxu0 }
0x1eb8   :  { %v4316_v12 = vpack.c.bf16 %v4164_v22, %v4161_v29  ;;  %v4156_v13 = vadd.f32 %v5702_v26, %v4155_v6 }
0x1eba   :  { %v4315_v15 = vpack.c.bf16 %v4156_v13, %v4153_v11  ;;  %6387 = vmatpush3.bf16.msra.mxu0 %v4316_v12 }
0x1ebb   :  { %6398 = vmatprep.subr.bf16.mxu0 %v4478_v18 }
0x1ebc   :  { %6381 = vmatpush3.bf16.msra.mxu1 %v4315_v15 }
0x1f72   :  { %v4258_v20 = vpop.f32.mrf.mxu0 }
0x1f73   :  { %v4267_v34 = vmul.f32 0.35355338, %v4258_v20 }
0x1f74   :  { %v4211_v21 = vpop.f32.mrf.mxu1  ;;  %v6378_v23 = vpop.f32.mrf.mxu0 }
0x1f75   :  { %v4265_v24 = vmul.f32 0.35355338, %v4211_v21  ;;  %v4275_v47 = vsel %vm223_vm0, %v4267_v34, -inf  ;;  %v5712_v21 = vld [vmem:[%s8033_s9 + $0x60] sm:$0xff]  ;;  %v5713_v23 = vld [vmem:[%s8033_s9 + $0x68] sm:$0xff] }
0x1f76   :  { %v6372_v31 = vpop.f32.mrf.mxu1  ;;  %v4261_v32 = vpop.f32.mrf.mxu0 }
0x1f77   :  { %v4269_v35 = vsel %vm223_vm0, %v4265_v24, -inf  ;;  %v4268_v52 = vmul.f32 0.35355338, %v4261_v32 }
0x1f78   :  { %v6379_v37 = vpop.f32.mrf.mxu0  ;;  %4270 = vmax.xlane.f32.xlu0 %v4269_v35  ;;  %v4214_v38 = vpop.f32.mrf.mxu1  ;;  %v5730_v35 = vld [vmem:[%s8035_s16 + $0x70] sm:$0xff] }
0x1f79   :  { %v4266_v40 = vmul.f32 0.35355338, %v4214_v38  ;;  %v4278_v43 = vsel %vm223_vm0, %v4268_v52, -inf  ;;  %v5731_v37 = vld [vmem:[%s8035_s16 + $0x78] sm:$0xff] }
0x1f7a   :  { %v6373_v45 = vpop.f32.mrf.mxu1  ;;  %v4606_v38 = vpack.c.bf16 %v5731_v37, %v5730_v35 }
0x1f7b   :  { %v4272_v46 = vsel %vm223_vm0, %v4266_v40, -inf  ;;  %v5729_v45 = vld [vmem:[%s8035_s16 + $0x68] sm:$0xff] }
0x1f7c   :  { %4276 = vmax.xlane.f32.xlu0 %v4275_v47  ;;  %4273 = vmax.xlane.f32.xlu1 %v4272_v46  ;;  %v5709_v47 = vld [vmem:[%s8041_s1 + $0x10] sm:$0xff] }
0x1f7d   :  { %v4409_v46 = vpack.c.bf16 %v5709_v47, %v5709_v47 }
0x1f7f   :  { %6486 = vmatprep.subr.msk.bf16.mxu1 %vm1270_vm4, %v4409_v46 }
0x1f80   :  { %4279 = vmax.xlane.f32.xlu1 %v4278_v43  ;;  %v4417_v43 = vsel %vm1270_vm4, %v4409_v46, 0 }
0x2001   :  { %v4271_v44 = vpop.xlane.xlu0 %4270 }
0x2002   :  { %v4281_v49 = vsub.f32 %v4265_v24, %v4271_v44  ;;  %v5722_v44 = vld [vmem:[%s8034_s15 + $0x70] sm:$0xff] }
0x2004   :  { %v4285_v54 = vmul.f32 1.442695, %v4281_v49  ;;  %v5723_v49 = vld [vmem:[%s8034_s15 + $0x78] sm:$0xff] }
0x2005   :  { %v4277_v2 = vpop.xlane.xlu0 %4276  ;;  %v4274_v25 = vpop.xlane.xlu1 %4273 }
0x2006   :  { %6681 = vpow2.f32 %v4285_v54  ;;  %v4283_v57 = vsub.f32 %v4267_v34, %v4277_v2  ;;  %v4282_v4 = vsub.f32 %v4266_v40, %v4274_v25  ;;  %v4477_v34 = vpack.c.bf16 %v5713_v23, %v5712_v21  ;;  %v5728_v40 = vld [vmem:[%s8035_s16 + $0x60] sm:$0xff] }
0x2007   :  { %v4542_v54 = vpack.c.bf16 %v5723_v49, %v5722_v44 }
0x2008   :  { %v4289_v53 = vmul.f32 1.442695, %v4283_v57  ;;  %v4287_v9 = vmul.f32 1.442695, %v4282_v4 }
0x2009   :  { %v4280_v30 = vpop.xlane.xlu1 %4279 }
0x200a   :  { %6683 = vpow2.f32 %v4289_v53  ;;  %v4284_v51 = vsub.f32 %v4268_v52, %v4280_v30  ;;  %v4605_v52 = vpack.c.bf16 %v5729_v45, %v5728_v40 }
0x200b   :  { %6685 = vpow2.f32 %v4287_v9 }
0x200c   :  { %v4291_v59 = vmul.f32 1.442695, %v4284_v51  ;;  %v5720_v51 = vld [vmem:[%s8034_s15 + $0x60] sm:$0xff] }
0x200e   :  { %6687 = vpow2.f32 %v4291_v59  ;;  %v5721_v59 = vld [vmem:[%s8034_s15 + $0x68] sm:$0xff] }
0x2013   :  { %v6682_v60 = vpop.eup %6681 }
0x2014   :  { %v4293_v61 = vsel %vm223_vm0, %v6682_v60, 0.0 }
0x2015   :  { %4294 = vadd.xlane.f32.xlu0 %v4293_v61 }
0x2017   :  { %v6684_v7 = vpop.eup %6683 }
0x2018   :  { %v6686_v28 = vpop.eup %6685  ;;  %v4299_v62 = vsel %vm223_vm0, %v6684_v7, 0.0 }
0x2019   :  { %4300 = vadd.xlane.f32.xlu0 %v4299_v62  ;;  %v4296_v63 = vsel %vm223_vm0, %v6686_v28, 0.0 }
0x201a   :  { %4297 = vadd.xlane.f32.xlu1 %v4296_v63 }
0x201b   :  { %v6688_v0 = vpop.eup %6687 }
0x201c   :  { %v4302_v1 = vsel %vm223_vm0, %v6688_v0, 0.0 }
0x201e   :  { %4303 = vadd.xlane.f32.xlu1 %v4302_v1 }
0x209e   :  { %v4295_v26 = vpop.xlane.xlu0 %4294 }
0x209f   :  { %6689 = vrcp.f32 %v4295_v26 }
0x20a2   :  { %v4301_v14 = vpop.xlane.xlu0 %4300 }
0x20a3   :  { %v4298_v16 = vpop.xlane.xlu1 %4297 }
0x20a4   :  { %6691 = vrcp.f32 %v4298_v16 }
0x20a5   :  { %6693 = vrcp.f32 %v4301_v14 }
0x20a7   :  { %v4304_v29 = vpop.xlane.xlu1 %4303 }
0x20a8   :  { %6695 = vrcp.f32 %v4304_v29  ;;  %v3964_v29 = vadd.f32 %v7765_v48, %v7787_v36 }
0x20ac   :  { %v6690_v22 = vpop.eup %6689 }
0x20ad   :  { %v4309_v11 = vmul.f32 %v6690_v22, %v6682_v60 }
0x20b1   :  { %v6692_v6 = vpop.eup %6691 }
0x20b2   :  { %v4310_v12 = vmul.f32 %v6692_v6, %v6686_v28  ;;  %v6694_v13 = vpop.eup %6693 }
0x20b3   :  { %v4311_v24 = vmul.f32 %v6694_v13, %v6684_v7  ;;  %v4541_v7 = vpack.c.bf16 %v5721_v59, %v5720_v51 }
0x20b4   :  { %v4313_v15 = vpack.c.bf16 %v4310_v12, %v4309_v11 }
0x20b5   :  { %v6696_v20 = vpop.eup %6695 }
0x20b6   :  { %v4312_v31 = vmul.f32 %v6696_v20, %v6688_v0  ;;  %6383 = vmatmul.mubr.msk.bf16.vlgmr.msra.gmra.mxu1 %vm223_vm0, %v4313_v15  ;;  %v3969_v0 = vadd.f32 %v7755_v39, %v7781_v55 }
0x20b7   :  { %6393 = vmatpush3.bf16.msra.mxu1 %v4417_v43 }
0x20b8   :  { %v4314_v32 = vpack.c.bf16 %v4312_v31, %v4311_v24  ;;  %6406 = vmatprep.subr.bf16.mxu1 %v4542_v54  ;;  %v5717_v31 = vld [vmem:[%s8039_s26 + $0x3] ss:$0 sm:$0xff] }
0x20ba   :  { %6389 = vmatmul.mubr.msk.bf16.vlgmr.msra.gmra.mxu0 %vm223_vm0, %v4314_v32 }
0x20bb   :  { %6399 = vmatpush3.bf16.msra.mxu0 %v4478_v18  ;;  %6402 = vmatprep.mubr.msk.bf16.mxu0 %vm318_vm1, %v7611_v17 }
0x20bc   :  { %6400 = vmatprep.subr.bf16.mxu0 %v4477_v34 }
0x20bf   :  { %6401 = vmatpush3.bf16.msra.mxu0 %v4477_v34  ;;  %v5733_v34 = vld [vmem:[%s8040_s28 + $0x3] ss:$0 sm:$0xff] }
0x20c0   :  { %6414 = vmatprep.subr.bf16.mxu0 %v4606_v38 }
0x20c2   :  { %6403 = vmatmul.mubr.msk.bf16.vlgmr.msra.gmra.mxu0 %vm318_vm1, %v7619_v19 }
0x20c3   :  { %6415 = vmatpush3.bf16.msra.mxu0 %v4606_v38  ;;  %6418 = vmatprep.mubr.msk.bf16.mxu0 %vm318_vm1, %v7611_v17 }
0x20c4   :  { %6416 = vmatprep.subr.bf16.mxu0 %v4605_v52 }
0x20c7   :  { %6417 = vmatpush3.bf16.msra.mxu0 %v4605_v52 }
0x20c8   :  { %6428 = vmatprep.subr.bf16.mxu0 %v6850_v50 }
0x20ca   :  { %6419 = vmatmul.mubr.msk.bf16.vlgmr.msra.gmra.mxu0 %vm318_vm1, %v7619_v19 }
0x20cb   :  { %6430 = vmatprep.mubr.msk.bf16.mxu0 %vm6851_vm2, %v6850_v50 }
0x2176   :  { %v4354_v2 = vpop.f32.mrf.mxu1 }
0x2178   :  { %v6384_v25 = vpop.f32.mrf.mxu1 }
0x217a   :  { %v4357_v57 = vpop.f32.mrf.mxu1  ;;  %v4398_v4 = vpop.f32.mrf.mxu0 }
0x217b   :  { %v4407_v53 = vpack.c.bf16 %v4357_v57, %v4354_v2 }
0x217c   :  { %v6385_v9 = vpop.f32.mrf.mxu1  ;;  %v6390_v30 = vpop.f32.mrf.mxu0 }
0x217d   :  { %6394 = vmatprep.mubr.msk.bf16.mxu1 %vm590_vm3, %v4407_v53 }
0x217e   :  { %v4401_v60 = vpop.f32.mrf.mxu0 }
0x217f   :  { %v4408_v61 = vpack.c.bf16 %v4401_v60, %v4398_v4 }
0x2180   :  { %v6391_v28 = vpop.f32.mrf.mxu0 }
0x2181   :  { %6395 = vmatmul.mubr.msk.bf16.vlgmr.msra.gmra.mxu1 %vm590_vm3, %v4408_v61 }
0x2182   :  { %6407 = vmatpush3.bf16.msra.mxu1 %v4542_v54  ;;  %6410 = vmatprep.mubr.msk.bf16.mxu1 %vm318_vm1, %v7611_v17  ;;  %v6404_v62 = vpop.f32.mrf.mxu0  ;;  %v3961_v17 = vadd.f32 %v7759_v41, %v7783_v56  ;;  %v5725_v56 = vld [vmem:[%s8038_s23 + $0x3] ss:$0 sm:$0xff] }
0x2183   :  { %6408 = vmatprep.subr.bf16.mxu1 %v4541_v7  ;;  %v4530_v40 = vadd.f32 %v6404_v62, %v5717_v31 }
0x2184   :  { %v4521_v63 = vpop.f32.mrf.mxu0 }
0x2185   :  { %v4522_v46 = vadd.f32 %v5717_v31, %v4521_v63 }
0x2186   :  { %6409 = vmatpush3.bf16.msra.mxu1 %v4541_v7  ;;  %v6405_v1 = vpop.f32.mrf.mxu0 }
0x2187   :  { %6422 = vmatprep.subr.bf16.mxu1 %v6850_v50  ;;  %v4533_v32 = vadd.f32 %v6405_v1, %v5717_v31 }
0x2188   :  { %v4524_v26 = vpop.f32.mrf.mxu0 }
0x2189   :  { %6411 = vmatmul.mubr.msk.bf16.vlgmr.msra.gmra.mxu1 %vm318_vm1, %v7619_v19  ;;  %v3972_v19 = vadd.f32 %v7763_v42, %v7785_v33  ;;  %v4525_v45 = vadd.f32 %v5717_v31, %v4524_v26  ;;  %v4665_v43 = vpack.c.bf16 %v4533_v32, %v4530_v40 }
0x218a   :  { %6424 = vmatprep.mubr.msk.bf16.mxu1 %vm6851_vm2, %v6850_v50  ;;  %v6420_v22 = vpop.f32.mrf.mxu0 }
0x218b   :  { %v4658_v52 = vadd.f32 %v6420_v22, %v5733_v34  ;;  %v4664_v54 = vpack.c.bf16 %v4525_v45, %v4522_v46  ;;  %v5740_v46 = vld [vmem:[%s8041_s1 + $0x18] sm:$0xff] }
0x218c   :  { %v4649_v12 = vpop.f32.mrf.mxu0 }
0x218d   :  { %v4650_v44 = vadd.f32 %v5733_v34, %v4649_v12 }
0x218e   :  { %v6421_v20 = vpop.f32.mrf.mxu0 }
0x218f   :  { %v4661_v38 = vadd.f32 %v6421_v20, %v5733_v34 }
0x2190   :  { %v4652_v35 = vpop.f32.mrf.mxu0 }
0x2191   :  { %v4653_v47 = vadd.f32 %v5733_v34, %v4652_v35  ;;  %v4813_v49 = vpack.c.bf16 %v4661_v38, %v4658_v52 }
0x2193   :  { %v4812_v2 = vpack.c.bf16 %v4653_v47, %v4650_v44 }
0x2241   :  { %v6396_v3 = vpop.f32.mrf.mxu1 }
0x2242   :  { %v7846_v5 = vadd.f32 %v6396_v3, %v3969_v0 }
0x2243   :  { %v4453_v18 = vpop.f32.mrf.mxu1 }
0x2244   :  { %v7850_v14 = vadd.f32 %v4453_v18, %v3961_v17 }
0x2245   :  { %v6397_v16 = vpop.f32.mrf.mxu1 }
0x2246   :  { %v7854_v39 = vadd.f32 %v6397_v16, %v3972_v19 }
0x2247   :  { %v4456_v55 = vpop.f32.mrf.mxu1 }
0x2248   :  { %v7856_v6 = vadd.f32 %v4456_v55, %v3964_v29 }
0x2249   :  { %v6412_v41 = vpop.f32.mrf.mxu1 }
0x224a   :  { %v4594_v33 = vadd.f32 %v6412_v41, %v5725_v56 }
0x224b   :  { %v4585_v11 = vpop.f32.mrf.mxu1 }
0x224c   :  { %v4586_v21 = vadd.f32 %v5725_v56, %v4585_v11 }
0x224d   :  { %v6413_v42 = vpop.f32.mrf.mxu1 }
0x224e   :  { %v4597_v13 = vadd.f32 %v6413_v42, %v5725_v56 }
0x224f   :  { %v4588_v15 = vpop.f32.mrf.mxu1 }
0x2250   :  { %v4667_v23 = vpack.c.bf16 %v4597_v13, %v4594_v33  ;;  %v4589_v48 = vadd.f32 %v5725_v56, %v4588_v15 }
0x2252   :  { %v4666_v36 = vpack.c.bf16 %v4589_v48, %v4586_v21  ;;  %v4719_v24 = vsel %vm590_vm3, %v4667_v23, 0 }
0x2253   :  { %6429 = vmatpush3.bf16.xpose.msra.mxu0 %v4719_v24 }
0x2254   :  { %v4672_v37 = vsel %vm590_vm3, %v4666_v36, 0  ;;  %6440 = vmatprep.subr.bf16.mxu0 %v6850_v50 }
0x2255   :  { %6423 = vmatpush3.bf16.xpose.msra.mxu1 %v4672_v37 }
0x2256   :  { %6434 = vmatprep.subr.bf16.mxu1 %v6850_v50 }
0x225a   :  { %6431 = vmatmul.mubr.msk.bf16.vlgmr.msra.gmra.mxu0 %vm590_vm3, %v4665_v43  ;;  %v4906_v43 = vpack.c.bf16 %v5740_v46, %v5740_v46 }
0x225b   :  { %6441 = vmatpush3.bf16.msra.mxu0 %v4813_v49  ;;  %6442 = vmatprep.mubr.msk.bf16.mxu0 %vm6851_vm2, %v6850_v50 }
0x225c   :  { %6425 = vmatmul.mubr.msk.bf16.vlgmr.msra.gmra.mxu1 %vm590_vm3, %v4664_v54  ;;  %v4914_v44 = vsel %vm1270_vm4, %v4906_v43, 0 }
0x225d   :  { %6435 = vmatpush3.bf16.msra.mxu1 %v4812_v2  ;;  %6436 = vmatprep.mubr.msk.bf16.mxu1 %vm6851_vm2, %v6850_v50 }
0x225e   :  { %6487 = vmatprep.subr.msk.bf16.mxu1 %vm1270_vm4, %v4906_v43 }
0x231a   :  { %v4755_v25 = vpop.f32.mrf.mxu0 }
0x231b   :  { %v4764_v51 = vmul.f32 0.35355338, %v4755_v25 }
0x231c   :  { %v4708_v57 = vpop.f32.mrf.mxu1  ;;  %v6432_v4 = vpop.f32.mrf.mxu0 }
0x231d   :  { %v4762_v53 = vmul.f32 0.35355338, %v4708_v57  ;;  %v4772_v63 = vsel %vm223_vm0, %v4764_v51, -inf }
0x231e   :  { %v6426_v9 = vpop.f32.mrf.mxu1  ;;  %v4758_v30 = vpop.f32.mrf.mxu0 }
0x231f   :  { %v4766_v59 = vsel %vm223_vm0, %v4762_v53, -inf  ;;  %v4765_v62 = vmul.f32 0.35355338, %v4758_v30 }
0x2320   :  { %v6433_v60 = vpop.f32.mrf.mxu0  ;;  %4767 = vmax.xlane.f32.xlu0 %v4766_v59  ;;  %v4711_v61 = vpop.f32.mrf.mxu1 }
0x2321   :  { %v4763_v7 = vmul.f32 0.35355338, %v4711_v61  ;;  %v4775_v50 = vsel %vm223_vm0, %v4765_v62, -inf }
0x2322   :  { %v6427_v28 = vpop.f32.mrf.mxu1 }
0x2323   :  { %v4769_v0 = vsel %vm223_vm0, %v4763_v7, -inf }
0x2324   :  { %4773 = vmax.xlane.f32.xlu0 %v4772_v63  ;;  %4770 = vmax.xlane.f32.xlu1 %v4769_v0 }
0x2328   :  { %4776 = vmax.xlane.f32.xlu1 %v4775_v50  ;;  %v5743_v50 = vld [vmem:[%s8042_s2] ss:$0 sm:$0xff] }
0x23a9   :  { %v4768_v1 = vpop.xlane.xlu0 %4767 }
0x23aa   :  { %v4778_v3 = vsub.f32 %v4762_v53, %v4768_v1 }
0x23ac   :  { %v4782_v17 = vmul.f32 1.442695, %v4778_v3 }
0x23ad   :  { %v4774_v18 = vpop.xlane.xlu0 %4773  ;;  %v4771_v19 = vpop.xlane.xlu1 %4770 }
0x23ae   :  { %6697 = vpow2.f32 %v4782_v17  ;;  %v4780_v26 = vsub.f32 %v4764_v51, %v4774_v18  ;;  %v4779_v16 = vsub.f32 %v4763_v7, %v4771_v19 }
0x23b0   :  { %v4786_v29 = vmul.f32 1.442695, %v4780_v26  ;;  %v4784_v55 = vmul.f32 1.442695, %v4779_v16 }
0x23b1   :  { %v4777_v22 = vpop.xlane.xlu1 %4776 }
0x23b2   :  { %6699 = vpow2.f32 %v4786_v29  ;;  %v4781_v41 = vsub.f32 %v4765_v62, %v4777_v22 }
0x23b3   :  { %6701 = vpow2.f32 %v4784_v55 }
0x23b4   :  { %v4788_v56 = vmul.f32 1.442695, %v4781_v41 }
0x23b6   :  { %6703 = vpow2.f32 %v4788_v56 }
0x23bb   :  { %v6698_v11 = vpop.eup %6697 }
0x23bc   :  { %v4790_v12 = vsel %vm223_vm0, %v6698_v11, 0.0 }
0x23bd   :  { %4791 = vadd.xlane.f32.xlu0 %v4790_v12 }
0x23bf   :  { %v6700_v42 = vpop.eup %6699 }
0x23c0   :  { %v6702_v33 = vpop.eup %6701  ;;  %v4796_v13 = vsel %vm223_vm0, %v6700_v42, 0.0 }
0x23c1   :  { %4797 = vadd.xlane.f32.xlu0 %v4796_v13  ;;  %v4793_v15 = vsel %vm223_vm0, %v6702_v33, 0.0 }
0x23c2   :  { %4794 = vadd.xlane.f32.xlu1 %v4793_v15 }
0x23c3   :  { %v6704_v20 = vpop.eup %6703 }
0x23c4   :  { %v4799_v21 = vsel %vm223_vm0, %v6704_v20, 0.0 }
0x23c6   :  { %4800 = vadd.xlane.f32.xlu1 %v4799_v21 }
0x2446   :  { %v4792_v23 = vpop.xlane.xlu0 %4791 }
0x2447   :  { %6705 = vrcp.f32 %v4792_v23 }
0x244a   :  { %v4798_v48 = vpop.xlane.xlu0 %4797 }
0x244b   :  { %v4795_v36 = vpop.xlane.xlu1 %4794 }
0x244c   :  { %6707 = vrcp.f32 %v4795_v36 }
0x244d   :  { %6709 = vrcp.f32 %v4798_v48 }
0x244f   :  { %v4801_v24 = vpop.xlane.xlu1 %4800 }
0x2450   :  { %6711 = vrcp.f32 %v4801_v24 }
0x2454   :  { %v6706_v31 = vpop.eup %6705 }
0x2455   :  { %v4806_v34 = vmul.f32 %v6706_v31, %v6698_v11  ;;  %v5060_v31 = vld [vmem:[%s8043_s7 + $0x10] sm:$0xff] }
0x2459   :  { %v6708_v32 = vpop.eup %6707 }
0x245a   :  { %v4807_v35 = vmul.f32 %v6708_v32, %v6702_v33  ;;  %v6710_v37 = vpop.eup %6709  ;;  %v5061_v32 = vld [vmem:[%s8043_s7 + $0x18] sm:$0xff] }
0x245b   :  { %v4808_v45 = vmul.f32 %v6710_v37, %v6700_v42  ;;  %v5059_v37 = vld [vmem:[%s8043_s7 + $0x8] sm:$0xff] }
0x245c   :  { %v4810_v38 = vpack.c.bf16 %v4807_v35, %v4806_v34  ;;  %v5065_v34 = vpack.c.bf16 %v5061_v32, %v5060_v31  ;;  %v5058_v35 = vld [vmem:[%s8043_s7] sm:$0xff] }
0x245d   :  { %v6712_v40 = vpop.eup %6711 }
0x245e   :  { %v4809_v52 = vmul.f32 %v6712_v40, %v6704_v20  ;;  %6437 = vmatmul.mubr.msk.bf16.vlgmr.msra.gmra.mxu1 %vm223_vm0, %v4810_v38  ;;  %6452 = vmatprep.subr.bf16.mxu0 %v5065_v34  ;;  %v5064_v38 = vpack.c.bf16 %v5059_v37, %v5058_v35 }
0x245f   :  { %6447 = vmatpush3.bf16.msra.mxu1 %v4914_v44 }
0x2460   :  { %v4811_v47 = vpack.c.bf16 %v4809_v52, %v4808_v45 }
0x2462   :  { %6443 = vmatmul.mubr.msk.bf16.vlgmr.msra.gmra.mxu0 %vm223_vm0, %v4811_v47 }
0x2463   :  { %6453 = vmatpush3.bf16.msra.mxu0 %v5065_v34 }
0x2464   :  { %6454 = vmatprep.subr.bf16.mxu0 %v5064_v38 }
0x2467   :  { %6455 = vmatpush3.bf16.msra.mxu0 %v5064_v38 }
0x251e   :  { %v4851_v49 = vpop.f32.mrf.mxu1 }
0x2520   :  { %v6438_v54 = vpop.f32.mrf.mxu1 }
0x2522   :  { %v4854_v2 = vpop.f32.mrf.mxu1  ;;  %v4895_v25 = vpop.f32.mrf.mxu0 }
0x2523   :  { %v4904_v57 = vpack.c.bf16 %v4854_v2, %v4851_v49 }
0x2524   :  { %v6439_v4 = vpop.f32.mrf.mxu1  ;;  %v6444_v53 = vpop.f32.mrf.mxu0 }
0x2525   :  { %6448 = vmatprep.mubr.msk.bf16.mxu1 %vm590_vm3, %v4904_v57 }
0x2526   :  { %v4898_v9 = vpop.f32.mrf.mxu0 }
0x2527   :  { %v4905_v30 = vpack.c.bf16 %v4898_v9, %v4895_v25  ;;  %v5744_v9 = vld [vmem:[%s8044_s10] ss:$0 sm:$0xff] }
0x2528   :  { %v6445_v51 = vpop.f32.mrf.mxu0 }
0x2529   :  { %6449 = vmatmul.mubr.msk.bf16.vlgmr.msra.gmra.mxu1 %vm590_vm3, %v4905_v30 }
0x25e9   :  { %v6450_v59 = vpop.f32.mrf.mxu1 }
0x25ea   :  { %v4967_v60 = vadd.f32 %v6450_v59, %v7846_v5 }
0x25eb   :  { %v4950_v61 = vpop.f32.mrf.mxu1 }
0x25ec   :  { %v4965_v7 = vadd.f32 %v4950_v61, %v7850_v14  ;;  %v4971_v62 = vadd.f32 %v4967_v60, %v7564_v27 }
0x25ed   :  { %v6451_v28 = vpop.f32.mrf.mxu1 }
0x25ee   :  { %v4969_v63 = vadd.f32 %v4965_v7, %v7555_v10  ;;  %v4968_v0 = vadd.f32 %v6451_v28, %v7854_v39  ;;  %v7895_v18 = vadd.f32 %v5743_v50, %v4971_v62  ;;  %v5745_v7 = vld [vmem:[%s8045_s11] ss:$0 sm:$0xff] }
0x25ef   :  { %v4953_v1 = vpop.f32.mrf.mxu1 }
0x25f0   :  { %v7892_v3 = vadd.f32 %v5743_v50, %v4969_v63  ;;  %v4966_v17 = vadd.f32 %v4953_v1, %v7856_v6  ;;  %v4972_v5 = vadd.f32 %v4968_v0, %v7562_v58  ;;  %v4992_v39 = vsel %vm318_vm1, %v7895_v18, 0.0 }
0x25f2   :  { %v4970_v19 = vadd.f32 %v4966_v17, %v7553_v8  ;;  %v4986_v14 = vsel %vm318_vm1, %v7892_v3, 0.0  ;;  %v7903_v10 = vadd.f32 %v5743_v50, %v4972_v5 }
0x25f3   :  { %4987 = vadd.xlane.f32.xlu0 %v4986_v14 }
0x25f4   :  { %v7901_v27 = vadd.f32 %v5743_v50, %v4970_v19  ;;  %v4995_v58 = vsel %vm318_vm1, %v7903_v10, 0.0 }
0x25f6   :  { %v4989_v6 = vsel %vm318_vm1, %v7901_v27, 0.0 }
0x25f7   :  { %4993 = vadd.xlane.f32.xlu0 %v4992_v39  ;;  %4990 = vadd.xlane.f32.xlu1 %v4989_v6  ;;  %v5170_v6 = vld [vmem:[%s8046_s0 + $0x30] sm:$0xff] }
0x25fb   :  { %4996 = vadd.xlane.f32.xlu1 %v4995_v58  ;;  %v5171_v58 = vld [vmem:[%s8046_s0 + $0x38] sm:$0xff] }
0x267c   :  { %v4988_v8 = vpop.xlane.xlu0 %4987 }
0x267d   :  { %v4998_v26 = vmul.f32 0.03125, %v4988_v8  ;;  %v5177_v8 = vpack.c.bf16 %v5171_v58, %v5170_v6 }
0x267f   :  { %v5002_v16 = vsub.f32 %v7892_v3, %v4998_v26  ;;  %6460 = vmatprep.subr.bf16.mxu1 %v5177_v8  ;;  %v5168_v26 = vld [vmem:[%s8046_s0 + $0x20] sm:$0xff] }
0x2680   :  { %v4994_v29 = vpop.xlane.xlu0 %4993  ;;  %v4991_v55 = vpop.xlane.xlu1 %4990  ;;  %6461 = vmatpush3.bf16.msra.mxu1 %v5177_v8 }
0x2681   :  { %v5000_v22 = vmul.f32 0.03125, %v4994_v29  ;;  %v4999_v41 = vmul.f32 0.03125, %v4991_v55  ;;  %v5006_v56 = vmul.f32 %v5002_v16, %v5002_v16  ;;  %v5166_v55 = vld [vmem:[%s8046_s0 + $0x10] sm:$0xff] }
0x2683   :  { %v5004_v11 = vsub.f32 %v7895_v18, %v5000_v22  ;;  %v5003_v12 = vsub.f32 %v7901_v27, %v4999_v41  ;;  %v5010_v42 = vsel %vm318_vm1, %v5006_v56, 0.0  ;;  %v5167_v22 = vld [vmem:[%s8046_s0 + $0x18] sm:$0xff]  ;;  %v5164_v56 = vld [vmem:[%s8046_s0] sm:$0xff] }
0x2684   :  { %5011 = vadd.xlane.f32.xlu0 %v5010_v42  ;;  %v4997_v33 = vpop.xlane.xlu1 %4996  ;;  %v5175_v41 = vpack.c.bf16 %v5167_v22, %v5166_v55  ;;  %v5746_v42 = vld [vmem:[%s8047_s5] ss:$0 sm:$0xff] }
0x2685   :  { %v5001_v13 = vmul.f32 0.03125, %v4997_v33  ;;  %v5008_v15 = vmul.f32 %v5004_v11, %v5004_v11  ;;  %v5007_v20 = vmul.f32 %v5003_v12, %v5003_v12 }
0x2687   :  { %v5005_v21 = vsub.f32 %v7903_v10, %v5001_v13  ;;  %v5016_v23 = vsel %vm318_vm1, %v5008_v15, 0.0  ;;  %v5013_v48 = vsel %vm318_vm1, %v5007_v20, 0.0 }
0x2688   :  { %5017 = vadd.xlane.f32.xlu0 %v5016_v23  ;;  %5014 = vadd.xlane.f32.xlu1 %v5013_v48 }
0x2689   :  { %v5009_v36 = vmul.f32 %v5005_v21, %v5005_v21 }
0x268b   :  { %v5019_v24 = vsel %vm318_vm1, %v5009_v36, 0.0 }
0x268c   :  { %5020 = vadd.xlane.f32.xlu1 %v5019_v24 }
0x270d   :  { %v5012_v40 = vpop.xlane.xlu0 %5011 }
0x270e   :  { %v5022_v45 = vmul.f32 0.03125, %v5012_v40 }
0x2710   :  { %v5026_v52 = vadd.f32 1e-05, %v5022_v45 }
0x2711   :  { %v5018_v47 = vpop.xlane.xlu0 %5017  ;;  %v5015_v46 = vpop.xlane.xlu1 %5014 }
0x2712   :  { %6713 = vrsqrt.f32 %v5026_v52  ;;  %v5024_v43 = vmul.f32 0.03125, %v5018_v47  ;;  %v5023_v44 = vmul.f32 0.03125, %v5015_v46 }
0x2714   :  { %v5028_v49 = vadd.f32 1e-05, %v5024_v43  ;;  %v5027_v54 = vadd.f32 1e-05, %v5023_v44 }
0x2715   :  { %v5021_v2 = vpop.xlane.xlu1 %5020 }
0x2716   :  { %6715 = vrsqrt.f32 %v5028_v49  ;;  %v5025_v25 = vmul.f32 0.03125, %v5021_v2 }
0x2717   :  { %6717 = vrsqrt.f32 %v5027_v54 }
0x2718   :  { %v5029_v57 = vadd.f32 1e-05, %v5025_v25 }
0x271a   :  { %6719 = vrsqrt.f32 %v5029_v57 }
0x271f   :  { %v6714_v4 = vpop.eup %6713 }
0x2720   :  { %v5034_v53 = vmul.f32 %v6714_v4, %v5002_v16  ;;  %v5169_v16 = vld [vmem:[%s8046_s0 + $0x28] sm:$0xff] }
0x2721   :  { %v5176_v29 = vpack.c.bf16 %v5169_v16, %v5168_v26  ;;  %v5751_v26 = vld [vmem:[%s8048_s17] ss:$0 sm:$0xff] }
0x2722   :  { %v5044_v61 = vmul.f32 %v5744_v9, %v5034_v53 }
0x2723   :  { %v6716_v30 = vpop.eup %6715  ;;  %6462 = vmatprep.subr.bf16.mxu1 %v5176_v29 }
0x2724   :  { %v6718_v51 = vpop.eup %6717  ;;  %v5036_v59 = vmul.f32 %v6716_v30, %v5004_v11  ;;  %v5054_v50 = vadd.f32 %v5745_v7, %v5044_v61  ;;  %6463 = vmatpush3.bf16.msra.mxu1 %v5176_v29  ;;  %v5165_v11 = vld [vmem:[%s8046_s0 + $0x8] sm:$0xff] }
0x2725   :  { %v5035_v60 = vmul.f32 %v6718_v51, %v5003_v12  ;;  %6464 = vmatprep.subr.bf16.mxu1 %v5175_v41  ;;  %v5174_v12 = vpack.c.bf16 %v5165_v11, %v5164_v56 }
0x2726   :  { %v5046_v0 = vmul.f32 %v5744_v9, %v5036_v59 }
0x2727   :  { %v6720_v28 = vpop.eup %6719  ;;  %v5045_v62 = vmul.f32 %v5744_v9, %v5035_v60 }
0x2728   :  { %v5037_v63 = vmul.f32 %v6720_v28, %v5005_v21  ;;  %v5056_v19 = vadd.f32 %v5745_v7, %v5046_v0  ;;  %6465 = vmatpush3.bf16.msra.mxu1 %v5175_v41 }
0x2729   :  { %v5055_v1 = vadd.f32 %v5745_v7, %v5045_v62  ;;  %6466 = vmatprep.subr.bf16.mxu1 %v5174_v12 }
0x272a   :  { %v5047_v17 = vmul.f32 %v5744_v9, %v5037_v63 }
0x272b   :  { %v5062_v5 = vpack.c.bf16 %v5055_v1, %v5054_v50 }
0x272c   :  { %v5057_v14 = vadd.f32 %v5745_v7, %v5047_v17  ;;  %6467 = vmatpush3.bf16.msra.mxu1 %v5174_v12 }
0x272d   :  { %6456 = vmatprep.mubr.msk.bf16.mxu0 %vm318_vm1, %v5062_v5 }
0x272e   :  { %v5063_v39 = vpack.c.bf16 %v5057_v14, %v5056_v19 }
0x2730   :  { %6457 = vmatmul.mubr.msk.bf16.vlgmr.msra.gmra.mxu0 %vm318_vm1, %v5063_v39 }
0x27f0   :  { %v6458_v33 = vpop.f32.mrf.mxu0 }
0x27f1   :  { %v5122_v13 = vadd.f32 %v6458_v33, %v5746_v42 }
0x27f2   :  { %v5113_v15 = vpop.f32.mrf.mxu0 }
0x27f3   :  { %v5130_v20 = vmul.f32 %v5122_v13, %v5122_v13  ;;  %v5114_v21 = vadd.f32 %v5746_v42, %v5113_v15 }
0x27f4   :  { %v6459_v23 = vpop.f32.mrf.mxu0 }
0x27f5   :  { %v5134_v48 = vmul.f32 %v5130_v20, %v5122_v13  ;;  %v5128_v36 = vmul.f32 %v5114_v21, %v5114_v21  ;;  %v5125_v24 = vadd.f32 %v6459_v23, %v5746_v42 }
0x27f6   :  { %v5116_v31 = vpop.f32.mrf.mxu0 }
0x27f7   :  { %v5138_v32 = vmul.f32 0.044715, %v5134_v48  ;;  %v5132_v34 = vmul.f32 %v5128_v36, %v5114_v21  ;;  %v5131_v35 = vmul.f32 %v5125_v24, %v5125_v24  ;;  %v5117_v37 = vadd.f32 %v5746_v42, %v5116_v31 }
0x27f9   :  { %v5142_v38 = vadd.f32 %v5138_v32, %v5122_v13  ;;  %v5136_v40 = vmul.f32 0.044715, %v5132_v34  ;;  %v5135_v45 = vmul.f32 %v5131_v35, %v5125_v24  ;;  %v5129_v52 = vmul.f32 %v5117_v37, %v5117_v37 }
0x27fb   :  { %v5146_v47 = vmul.f32 0.7978846, %v5142_v38  ;;  %v5140_v46 = vadd.f32 %v5136_v40, %v5114_v21  ;;  %v5139_v43 = vmul.f32 0.044715, %v5135_v45  ;;  %v5133_v44 = vmul.f32 %v5129_v52, %v5117_v37 }
0x27fd   :  { %v5144_v49 = vmul.f32 0.7978846, %v5140_v46  ;;  %v5143_v54 = vadd.f32 %v5139_v43, %v5125_v24  ;;  %v5137_v2 = vmul.f32 0.044715, %v5133_v44  ;;  %6721 = vtanh.f32 %v5146_v47  ;;  %v5324_v46 = vld [vmem:[%s8049_s21 + $0x10] sm:$0xff]  ;;  %v5325_v43 = vld [vmem:[%s8049_s21 + $0x18] sm:$0xff] }
0x27fe   :  { %v5329_v44 = vpack.c.bf16 %v5325_v43, %v5324_v46 }
0x27ff   :  { %6723 = vtanh.f32 %v5144_v49  ;;  %v5147_v25 = vmul.f32 0.7978846, %v5143_v54  ;;  %v5141_v57 = vadd.f32 %v5137_v2, %v5117_v37  ;;  %v5322_v49 = vld [vmem:[%s8049_s21] sm:$0xff]  ;;  %v5323_v54 = vld [vmem:[%s8049_s21 + $0x8] sm:$0xff] }
0x2800   :  { %6472 = vmatprep.subr.bf16.mxu0 %v5329_v44  ;;  %v5328_v2 = vpack.c.bf16 %v5323_v54, %v5322_v49 }
0x2801   :  { %6725 = vtanh.f32 %v5147_v25  ;;  %v5145_v4 = vmul.f32 0.7978846, %v5141_v57  ;;  %6473 = vmatpush3.bf16.msra.mxu0 %v5329_v44 }
0x2802   :  { %6474 = vmatprep.subr.bf16.mxu0 %v5328_v2 }
0x2803   :  { %6727 = vtanh.f32 %v5145_v4 }
0x2805   :  { %6475 = vmatpush3.bf16.msra.mxu0 %v5328_v2 }
0x280a   :  { %v6722_v53 = vpop.eup %6721 }
0x280b   :  { %v5154_v59 = vadd.f32 1.0, %v6722_v53 }
0x280c   :  { %v6724_v9 = vpop.eup %6723 }
0x280d   :  { %v5152_v30 = vadd.f32 1.0, %v6724_v9  ;;  %v5158_v63 = vmul.f32 0.5, %v5154_v59 }
0x280e   :  { %v6726_v51 = vpop.eup %6725 }
0x280f   :  { %v5155_v60 = vadd.f32 1.0, %v6726_v51  ;;  %v5156_v7 = vmul.f32 0.5, %v5152_v30  ;;  %v5162_v5 = vmul.f32 %v5158_v63, %v5122_v13 }
0x2810   :  { %v6728_v61 = vpop.eup %6727 }
0x2811   :  { %v5159_v28 = vmul.f32 0.5, %v5155_v60  ;;  %v5153_v62 = vadd.f32 1.0, %v6728_v61  ;;  %v5160_v1 = vmul.f32 %v5156_v7, %v5114_v21 }
0x2813   :  { %v5157_v0 = vmul.f32 0.5, %v5153_v62  ;;  %v5163_v50 = vmul.f32 %v5159_v28, %v5125_v24 }
0x2815   :  { %v5161_v17 = vmul.f32 %v5157_v0, %v5117_v37  ;;  %v5173_v14 = vpack.c.bf16 %v5163_v50, %v5162_v5  ;;  %v5752_v0 = vld [vmem:[%s8050_s25] ss:$0 sm:$0xff] }
0x2817   :  { %v5172_v19 = vpack.c.bf16 %v5161_v17, %v5160_v1 }
0x2819   :  { %6468 = vmatprep.mubr.msk.bf16.mxu1 %vm2584_vm5, %v5172_v19 }
0x281a   :  { %6469 = vmatmul.mubr.msk.bf16.vlgmr.msra.gmra.mxu1 %vm2584_vm5, %v5173_v14  ;;  %v5753_v14 = vld [vmem:[%s8051_s29] ss:$0 sm:$0xff] }
0x28da   :  { %v6470_v39 = vpop.f32.mrf.mxu1 }
0x28db   :  { %v5235_v58 = vadd.f32 %v6470_v39, %v7895_v18 }
0x28dc   :  { %v5218_v6 = vpop.f32.mrf.mxu1 }
0x28dd   :  { %v5233_v8 = vadd.f32 %v5218_v6, %v7892_v3  ;;  %v5246_v22 = vadd.f32 %v5751_v26, %v5235_v58 }
0x28de   :  { %v6471_v16 = vpop.f32.mrf.mxu1 }
0x28df   :  { %v5244_v29 = vadd.f32 %v5751_v26, %v5233_v8  ;;  %v5236_v41 = vadd.f32 %v6471_v16, %v7903_v10  ;;  %v5256_v33 = vsel %vm318_vm1, %v5246_v22, 0.0 }
0x28e0   :  { %v5221_v55 = vpop.f32.mrf.mxu1 }
0x28e1   :  { %v5234_v56 = vadd.f32 %v5221_v55, %v7901_v27  ;;  %v5250_v11 = vsel %vm318_vm1, %v5244_v29, 0.0  ;;  %v5247_v42 = vadd.f32 %v5751_v26, %v5236_v41 }
0x28e2   :  { %5251 = vadd.xlane.f32.xlu0 %v5250_v11 }
0x28e3   :  { %v5245_v12 = vadd.f32 %v5751_v26, %v5234_v56  ;;  %v5259_v3 = vsel %vm318_vm1, %v5247_v42, 0.0 }
0x28e5   :  { %v5253_v18 = vsel %vm318_vm1, %v5245_v12, 0.0 }
0x28e6   :  { %5257 = vadd.xlane.f32.xlu0 %v5256_v33  ;;  %5254 = vadd.xlane.f32.xlu1 %v5253_v18 }
0x28ea   :  { %5260 = vadd.xlane.f32.xlu1 %v5259_v3 }
0x296b   :  { %v5252_v13 = vpop.xlane.xlu0 %5251 }
0x296c   :  { %v5262_v15 = vmul.f32 0.03125, %v5252_v13 }
0x296e   :  { %v5266_v20 = vsub.f32 %v5244_v29, %v5262_v15 }
0x296f   :  { %v5258_v10 = vpop.xlane.xlu0 %5257  ;;  %v5255_v21 = vpop.xlane.xlu1 %5254 }
0x2970   :  { %v5264_v27 = vmul.f32 0.03125, %v5258_v10  ;;  %v5263_v23 = vmul.f32 0.03125, %v5255_v21  ;;  %v5270_v48 = vmul.f32 %v5266_v20, %v5266_v20 }
0x2972   :  { %v5268_v36 = vsub.f32 %v5246_v22, %v5264_v27  ;;  %v5267_v24 = vsub.f32 %v5245_v12, %v5263_v23  ;;  %v5274_v31 = vsel %vm318_vm1, %v5270_v48, 0.0 }
0x2973   :  { %5275 = vadd.xlane.f32.xlu0 %v5274_v31  ;;  %v5261_v32 = vpop.xlane.xlu1 %5260 }
0x2974   :  { %v5265_v34 = vmul.f32 0.03125, %v5261_v32  ;;  %v5272_v35 = vmul.f32 %v5268_v36, %v5268_v36  ;;  %v5271_v37 = vmul.f32 %v5267_v24, %v5267_v24 }
0x2976   :  { %v5269_v38 = vsub.f32 %v5247_v42, %v5265_v34  ;;  %v5280_v40 = vsel %vm318_vm1, %v5272_v35, 0.0  ;;  %v5277_v45 = vsel %vm318_vm1, %v5271_v37, 0.0 }
0x2977   :  { %5281 = vadd.xlane.f32.xlu0 %v5280_v40  ;;  %5278 = vadd.xlane.f32.xlu1 %v5277_v45 }
0x2978   :  { %v5273_v52 = vmul.f32 %v5269_v38, %v5269_v38 }
0x297a   :  { %v5283_v47 = vsel %vm318_vm1, %v5273_v52, 0.0 }
0x297b   :  { %5284 = vadd.xlane.f32.xlu1 %v5283_v47 }
0x29fc   :  { %v5276_v25 = vpop.xlane.xlu0 %5275 }
0x29fd   :  { %v5286_v57 = vmul.f32 0.03125, %v5276_v25 }
0x29ff   :  { %v5290_v4 = vadd.f32 1e-05, %v5286_v57 }
0x2a00   :  { %v5282_v53 = vpop.xlane.xlu0 %5281  ;;  %v5279_v9 = vpop.xlane.xlu1 %5278 }
0x2a01   :  { %6729 = vrsqrt.f32 %v5290_v4  ;;  %v5288_v30 = vmul.f32 0.03125, %v5282_v53  ;;  %v5287_v51 = vmul.f32 0.03125, %v5279_v9 }
0x2a03   :  { %v5292_v59 = vadd.f32 1e-05, %v5288_v30  ;;  %v5291_v60 = vadd.f32 1e-05, %v5287_v51 }
0x2a04   :  { %v5285_v61 = vpop.xlane.xlu1 %5284 }
0x2a05   :  { %6731 = vrsqrt.f32 %v5292_v59  ;;  %v5289_v7 = vmul.f32 0.03125, %v5285_v61 }
0x2a06   :  { %6733 = vrsqrt.f32 %v5291_v60 }
0x2a07   :  { %v5293_v28 = vadd.f32 1e-05, %v5289_v7 }
0x2a09   :  { %6735 = vrsqrt.f32 %v5293_v28 }
0x2a0e   :  { %v6730_v62 = vpop.eup %6729 }
0x2a0f   :  { %v5298_v63 = vmul.f32 %v6730_v62, %v5266_v20 }
0x2a11   :  { %v5308_v19 = vmul.f32 %v5752_v0, %v5298_v63 }
0x2a12   :  { %v6732_v50 = vpop.eup %6731 }
0x2a13   :  { %v6734_v1 = vpop.eup %6733  ;;  %v5300_v17 = vmul.f32 %v6732_v50, %v5268_v36  ;;  %v5318_v26 = vadd.f32 %v5753_v14, %v5308_v19 }
0x2a14   :  { %v5299_v5 = vmul.f32 %v6734_v1, %v5267_v24 }
0x2a15   :  { %v5310_v8 = vmul.f32 %v5752_v0, %v5300_v17 }
0x2a16   :  { %v6736_v39 = vpop.eup %6735  ;;  %v5309_v6 = vmul.f32 %v5752_v0, %v5299_v5 }
0x2a17   :  { %v5301_v58 = vmul.f32 %v6736_v39, %v5269_v38  ;;  %v5320_v22 = vadd.f32 %v5753_v14, %v5310_v8 }
0x2a18   :  { %v5319_v16 = vadd.f32 %v5753_v14, %v5309_v6 }
0x2a19   :  { %v5311_v29 = vmul.f32 %v5752_v0, %v5301_v58 }
0x2a1a   :  { %v5326_v55 = vpack.c.bf16 %v5319_v16, %v5318_v26 }
0x2a1b   :  { %v5321_v41 = vadd.f32 %v5753_v14, %v5311_v29 }
0x2a1c   :  { %6476 = vmatprep.mubr.msk.bf16.mxu0 %vm318_vm1, %v5326_v55 }
0x2a1d   :  { %v5327_v56 = vpack.c.bf16 %v5321_v41, %v5320_v22 }
0x2a1f   :  { %6477 = vmatmul.mubr.msk.bf16.vlgmr.msra.gmra.mxu0 %vm318_vm1, %v5327_v56 }
0x2a20   :  { %6766 = shalt.err (!%p6763_p4)
}
0x2a21   :  { %5434 = dma.vmem_to_hbm [thread:$0]  %s5432_s8, 32, %s7107_s4, [#allocation3]  }
0x2a22   :  { %s6775_s30 = scalar_lea.vmem %s5442_s19, 32  ;;  %p6780_p6 = scmp.lt.s32.totalorder %s5442_s19, %s5442_s19 }
0x2a23   :  { %p6776_p5 = scmp.ne.s32.totalorder %s5442_s19, %s6775_s30  ;;  %p6781_p7 = scmp.lt.s32.totalorder %s6775_s30, %s6775_s30 }
0x2a25   :  { %p6782_p8 = por %p6781_p7, %p6780_p6 }
0x2a27   :  { %p6783_p9 = pnand %p6782_p8, %p6776_p5 }
0x2a29   :  { %6786 = shalt.err (!%p6783_p9)
}
0x2a2a   :  { %5444 = dma.vmem_to_hbm [thread:$0]  %s5442_s19, 32, %s7112_s13, [#allocation5]   ;;  %v5754_v11 = vld [vmem:[%s7097_s20] ss:$0 sm:$0xff] }
0x2adf   :  { %v6478_v12 = vpop.f32.mrf.mxu0 }
0x2ae0   :  { %v5386_v42 = vadd.f32 %v6478_v12, %v5754_v11 }
0x2ae1   :  { %v5377_v33 = vpop.f32.mrf.mxu0 }
0x2ae2   :  { %v5759_v18 = vmul.f32 -1.442695, %v5386_v42  ;;  %v5378_v3 = vadd.f32 %v5754_v11, %v5377_v33 }
0x2ae3   :  { %v6479_v13 = vpop.f32.mrf.mxu0 }
0x2ae4   :  { %6737 = vpow2.f32 %v5759_v18  ;;  %v5757_v15 = vmul.f32 -1.442695, %v5378_v3  ;;  %v5389_v20 = vadd.f32 %v6479_v13, %v5754_v11 }
0x2ae5   :  { %v5380_v10 = vpop.f32.mrf.mxu0 }
0x2ae6   :  { %6739 = vpow2.f32 %v5757_v15  ;;  %v5760_v21 = vmul.f32 -1.442695, %v5389_v20  ;;  %v5381_v27 = vadd.f32 %v5754_v11, %v5380_v10 }
0x2ae8   :  { %6741 = vpow2.f32 %v5760_v21  ;;  %v5758_v23 = vmul.f32 -1.442695, %v5381_v27 }
0x2aea   :  { %6743 = vpow2.f32 %v5758_v23 }
0x2af1   :  { %v6738_v48 = vpop.eup %6737 }
0x2af2   :  { %v5406_v36 = vadd.f32 1.0, %v6738_v48 }
0x2af3   :  { %v6740_v24 = vpop.eup %6739 }
0x2af4   :  { %6745 = vrcp.f32 %v5406_v36  ;;  %v5404_v31 = vadd.f32 1.0, %v6740_v24 }
0x2af5   :  { %v6742_v32 = vpop.eup %6741 }
0x2af6   :  { %6747 = vrcp.f32 %v5404_v31  ;;  %v5407_v34 = vadd.f32 1.0, %v6742_v32 }
0x2af7   :  { %v6744_v35 = vpop.eup %6743 }
0x2af8   :  { %6749 = vrcp.f32 %v5407_v34  ;;  %v5405_v37 = vadd.f32 1.0, %v6744_v35 }
0x2afa   :  { %6751 = vrcp.f32 %v5405_v37 }
0x2b01   :  { %v6746_v38 = vpop.eup %6745 }
0x2b02   :  { %5418 = vst.msk [vmem:[%s7102_s27 + $0x10] sm:$0xff] %vm223_vm0, %v6746_v38 }
0x2b03   :  { %v6748_v40 = vpop.eup %6747 }
0x2b04   :  { %5416 = vst.msk [vmem:[%s7102_s27] sm:$0xff] %vm223_vm0, %v6748_v40 }
0x2b05   :  { %v6750_v45 = vpop.eup %6749 }
0x2b06   :  { %5419 = vst.msk [vmem:[%s7102_s27 + $0x18] sm:$0xff] %vm223_vm0, %v6750_v45 }
0x2b07   :  { %v6752_v52 = vpop.eup %6751 }
0x2b08   :  { %5417 = vst.msk [vmem:[%s7102_s27 + $0x8] sm:$0xff] %vm223_vm0, %v6752_v52 }
0x2b09   :  { %6795 = dma.done.wait [#allocation3], 32  }
0x2b0a   :  { %6796 = vsyncadd [#allocation3], 4294967264 }
0x2b0b   :  { %6797 = dma.done.wait [#allocation5], 32  }
0x2b0c   :  { %6798 = vsyncadd [#allocation5], 4294967264 }
0x2b0d   :  { %5453 = vsyncpa [#allocation3], 1 }
0x2b0e   :  { %5454 = vsyncpa [#allocation5], 1 }

</bundles_post_ra>
